<compile_context>
chip_gen: v5e
topology: v5e:2x2
jax: 0.10.0
libtpu: 0.0.40
codegen_flags: <defaults>
</compile_context>

<pallas_src>
import jax
import jax.numpy as jnp
from jax import lax
from jax.experimental import pallas as pl
from jax.experimental.pallas import tpu as pltpu

LANE = 128
ROW_ALIGN = 16            # bf16 packs 2 rows per sublane -> 16-row granularity
TM_CAP = 512              # rows per grid step (review: 512-1024; VMEM ~6 MiB)
TM_SPLIT_THRESHOLD = 256  # above this, force >=2 grid steps (v7x dual-TC)


def _round_up(x, m):
    return ((x + m - 1) // m) * m


def _cdiv(a, b):
    return (a + b - 1) // b


def _pad_axis(a, axis, target):
    pad = target - a.shape[axis]
    if pad <= 0:
        return a
    widths = [(0, 0)] * a.ndim
    widths[axis] = (0, pad)
    return jnp.pad(a, widths)


def _choose_batch_tile(batch):
    """Rows per grid step.

    * multiple of 16 (clean unmasked bf16 vld/vst),
    * capped at TM_CAP (amortizes ~0.35us/step overhead; VMEM stays tiny),
    * >=2 grid steps once the batch exceeds TM_SPLIT_THRESHOLD so the
      "parallel" grid axis actually shards across v7x's two TensorCores.
      The split is an (almost) even halving, so single-TC v5e/v6e pay no
      meaningful padding penalty.
    """
    b16 = max(ROW_ALIGN, _round_up(batch, ROW_ALIGN))
    if b16 <= TM_SPLIT_THRESHOLD:
        return b16
    n_steps = max(2, _cdiv(b16, TM_CAP))
    return _round_up(_cdiv(b16, n_steps), ROW_ALIGN)


# ----------------------------------------------------------------------------
# One-time parameter preparation (outside the forward pass).
# Conv2d(kernel, stride, pad=2) -> dense matrix M so that
#   y_flat[n, (ho*Wo + wo)*Co + co] = x_flat[n, rows] @ M
# where rows are ordered (ci, h, w) for the first layer (matches NCHW flatten
# of the network input) and (h, w, ci) for later layers (matches the previous
# layer's output column order).
# ----------------------------------------------------------------------------
def _conv_to_matmul_weight(w, h_in, w_in, stride, pad, row_order):
    co, ci, kh, kw = w.shape
    ho = (h_in + 2 * pad - kh) // stride + 1
    wo = (w_in + 2 * pad - kw) // stride + 1

    dh = jnp.arange(h_in)[:, None] + pad - stride * jnp.arange(ho)[None, :]  # (H, Ho)
    dw = jnp.arange(w_in)[:, None] + pad - stride * jnp.arange(wo)[None, :]  # (W, Wo)
    vh = (dh >= 0) & (dh < kh)
    vw = (dw >= 0) & (dw < kw)
    dh_c = jnp.clip(dh, 0, kh - 1)
    dw_c = jnp.clip(dw, 0, kw - 1)

    wt = w[:, :, dh_c, :]                       # (Co, Ci, H, Ho, kw)
    wt = wt[:, :, :, :, dw_c]                   # (Co, Ci, H, Ho, W, Wo)
    mask = vh[None, None, :, :, None, None] & vw[None, None, None, None, :, :]
    wt = jnp.where(mask, wt, 0.0)

    if row_order == "chw":                      # rows match NCHW flatten of input
        wt = wt.transpose(1, 2, 4, 3, 5, 0)     # (Ci, H, W, Ho, Wo, Co)
        mat = wt.reshape(ci * h_in * w_in, ho * wo * co)
    else:                                       # rows match (h, w, c) flatten
        wt = wt.transpose(2, 4, 1, 3, 5, 0)     # (H, W, Ci, Ho, Wo, Co)
        mat = wt.reshape(h_in * w_in * ci, ho * wo * co)
    return mat, ho, wo


def prepare_discriminator_params(conv_params, lin_params, params, in_shape):
    """Fold im2col, padding and PyTorch flatten order into the static weights.

    Returns a flat tuple [W1, b1, W2, b2, ..., WL, bL]; every K / N dimension
    is padded to a multiple of 128 (zero rows/cols), weights are bf16, biases
    f32.
    """
    c, h, w = in_shape
    flat_args = []
    k_in = _round_up(c * h * w, LANE)
    row_order = "chw"

    for (wconv, bconv), stride in zip(conv_params, params["stride"]):
        co = wconv.shape[0]
        mat, ho, wo = _conv_to_matmul_weight(
            wconv.astype(jnp.float32), h, w, stride, 2, row_order)
        n_out = _round_up(ho * wo * co, LANE)
        mat = _pad_axis(_pad_axis(mat, 0, k_in), 1, n_out)
        bias = _pad_axis(jnp.tile(bconv.astype(jnp.float32), ho * wo), 0, n_out)
        flat_args += [mat.astype(jnp.bfloat16), bias.reshape(1, -1)]
        h, w, c = ho, wo, co
        k_in = n_out
        row_order = "hwc"

    w_lin, b_lin = lin_params
    # torch flattens the conv output in (c, h, w) order; our activation
    # columns are ordered (h, w, c) -> permute the Linear weight accordingly.
    wl = w_lin.astype(jnp.float32).reshape(-1, c, h, w).transpose(2, 3, 1, 0)
    wl = wl.reshape(h * w * c, -1)
    n_lin = _round_up(wl.shape[1], LANE)        # lane-dense output slab (128)
    wl = _pad_axis(_pad_axis(wl, 0, k_in), 1, n_lin)
    bl = _pad_axis(b_lin.astype(jnp.float32), 0, n_lin).reshape(1, -1)
    flat_args += [wl.astype(jnp.bfloat16), bl]
    return tuple(flat_args)


# ----------------------------------------------------------------------------
# The single fused Pallas kernel: chained (bf16 x bf16 -> f32) matmuls with
# f32 bias + LeakyReLU epilogues; activations stay in registers/VMEM.
# ----------------------------------------------------------------------------
def _make_fused_kernel(n_conv, slope):
    def kernel(*refs):
        x_ref, o_ref = refs[0], refs[-1]
        h = x_ref[...]                                          # (tm, K) bf16
        for l in range(n_conv):
            w_ref, b_ref = refs[1 + 2 * l], refs[2 + 2 * l]
            acc = jnp.dot(h, w_ref[...], preferred_element_type=jnp.float32)
            acc = acc + b_ref[...]                              # f32 epilogue
            acc = jnp.where(acc >= 0.0, acc, slope * acc)       # LeakyReLU f32
            h = acc.astype(jnp.bfloat16)                        # bf16 MXU feed
        wl_ref, bl_ref = refs[1 + 2 * n_conv], refs[2 + 2 * n_conv]
        out = jnp.dot(h, wl_ref[...], preferred_element_type=jnp.float32)
        o_ref[...] = (out + bl_ref[...]).astype(o_ref.dtype)
    return kernel


def discriminator_forward(x_nchw, prepped, single_buffer_weights=True):
    """x_nchw: (N, C, H, W) float32 -> (N, 1) float32."""
    n_conv = (len(prepped) - 2) // 2
    k_in = prepped[0].shape[0]
    n_out = prepped[-2].shape[1]

    batch = x_nchw.shape[0]
    x_flat = x_nchw.reshape(batch, -1).astype(jnp.bfloat16)
    x_flat = _pad_axis(x_flat, 1, k_in)

    tm = _choose_batch_tile(batch)
    mp = _round_up(batch, tm)
    x_flat = _pad_axis(x_flat, 0, mp)

    # Weights/biases: whole-array blocks with a constant index_map -> resident
    # in VMEM across grid steps.  Since their block index never changes, the
    # default double-buffer only wastes VMEM -> single-buffer them.
    if single_buffer_weights:
        def w_spec(arr):
            return pl.BlockSpec(arr.shape, lambda i: (0, 0),
                                pipeline_mode=pl.Buffered(1))
    else:
        def w_spec(arr):
            return pl.BlockSpec(arr.shape, lambda i: (0, 0))

    in_specs = [pl.BlockSpec((tm, k_in), lambda i: (i, 0))]
    in_specs += [w_spec(arr) for arr in prepped]

    # Advisory cost estimate: lets XLA overlap this small, latency-bound
    # custom call with surrounding ops instead of treating it as opaque.
    flops = 2 * mp * sum(int(w.shape[0]) * int(w.shape[1])
                         for w in prepped[0::2])
    bytes_accessed = (mp * k_in * 2                                      # bf16 x
                      + sum(a.size * a.dtype.itemsize for a in prepped)  # weights
                      + mp * n_out * 4)                                  # f32 out
    cost = pl.CostEstimate(flops=int(flops), transcendentals=0,
                           bytes_accessed=int(bytes_accessed))

    out = pl.pallas_call(
        _make_fused_kernel(n_conv, 0.01),   # nn.LeakyReLU() default slope 0.01
        out_shape=jax.ShapeDtypeStruct((mp, n_out), jnp.float32),
        grid=(mp // tm,),
        in_specs=in_specs,
        out_specs=pl.BlockSpec((tm, n_out), lambda i: (i, 0)),
        compiler_params=pltpu.CompilerParams(
            dimension_semantics=("parallel",),
            vmem_limit_bytes=32 * 1024 * 1024),   # footprint ~6 MiB; v7x-safe
        cost_estimate=cost,
    )(x_flat, *prepped)
    return out[:batch, :1]


# ----------------------------------------------------------------------------
# Plain-JAX f32 reference (for verification)
# ----------------------------------------------------------------------------
def reference_forward(x, conv_params, lin_params, params):
    for (wc, bc), s in zip(conv_params, params["stride"]):
        x = lax.conv_general_dilated(
            x, wc, window_strides=(s, s), padding=[(2, 2), (2, 2)],
            dimension_numbers=("NCHW", "OIHW", "NCHW"),
            precision=lax.Precision.HIGHEST)
        x = x + bc.reshape(1, -1, 1, 1)
        x = jnp.where(x >= 0.0, x, 0.01 * x)
    flat = x.reshape(x.shape[0], -1)
    w_lin, b_lin = lin_params
    return flat @ w_lin.T + b_lin


# ----------------------------------------------------------------------------
# main
# ----------------------------------------------------------------------------
if __name__ == "__main__":
    params = {
        "data_size": 5,             # -> in_channels = data_size - 1 = 4
        "nfilter": [8, 16],
        "shape": [5, 5],            # kernel sizes
        "stride": [2, 2],
        "batch_size": 2,
    }
    in_shape = (4, 16, 16)          # (C, H, W)

    key = jax.random.PRNGKey(0)
    keys = jax.random.split(key, 8)

    # deterministic synthetic parameters
    conv_params = []
    c_in = params["data_size"] - 1
    ki = 0
    for nfilters, ksz in zip(params["nfilter"], params["shape"]):
        wc = 0.1 * jax.random.normal(keys[ki], (nfilters, c_in, ksz, ksz), jnp.float32)
        bc = 0.1 * jax.random.normal(keys[ki + 1], (nfilters,), jnp.float32)
        conv_params.append((wc, bc))
        c_in = nfilters
        ki += 2

    # conv output shape: H -> (H + 2*2 - k)//s + 1
    h = w_sp = in_shape[1]
    for ksz, s in zip(params["shape"], params["stride"]):
        h = (h + 4 - ksz) // s + 1
        w_sp = (w_sp + 4 - ksz) // s + 1
    linear_in = params["nfilter"][-1] * h * w_sp   # 16 * 4 * 4 = 256

    w_lin = 0.1 * jax.random.normal(keys[ki], (1, linear_in), jnp.float32)
    b_lin = 0.1 * jax.random.normal(keys[ki + 1], (1,), jnp.float32)
    lin_params = (w_lin, b_lin)

    # example input (NCHW), matching the PyTorch module
    x = jax.random.normal(keys[ki + 2], (params["batch_size"], *in_shape), jnp.float32)

    # one-time static weight preparation, then the fused-forward kernel
    prepped = prepare_discriminator_params(conv_params, lin_params, params, in_shape)
    fwd = jax.jit(discriminator_forward, static_argnames=("single_buffer_weights",))

    use_buffered = True
    try:
        out = jax.block_until_ready(fwd(x, prepped, single_buffer_weights=True))
    except Exception:
        # This jax build does not lower pipeline_mode=Buffered(1) for the
        # top-level TPU pipeline; fall back to default (double) buffering.
        use_buffered = False
        out = jax.block_until_ready(fwd(x, prepped, single_buffer_weights=False))
    assert out.shape == (params["batch_size"], 1)

    ref = jax.block_until_ready(reference_forward(x, conv_params, lin_params, params))
    # bf16 matmul operands with f32 accumulation -> compare at 2e-2
    assert jnp.allclose(out, ref, atol=2e-2, rtol=2e-2), (out, ref)

    # Second run at a batch large enough to exercise the multi-step "parallel"
    # grid path (tm=192, grid=(2,)); looser tolerance over many rows.
    x_big = jax.random.normal(keys[ki + 3], (384, *in_shape), jnp.float32)
    out_big = jax.block_until_ready(
        fwd(x_big, prepped, single_buffer_weights=use_buffered))
    ref_big = jax.block_until_ready(
        reference_forward(x_big, conv_params, lin_params, params))
    assert out_big.shape == (384, 1)
    assert jnp.allclose(out_big, ref_big, atol=1e-1, rtol=1e-1)

    print("KERNEL_OK")
</pallas_src>

<mosaic_0001>
module attributes {stable_mosaic.version = 11 : i64} {
  func.func @kernel(%arg0: i32, %arg1: memref<16x1024xbf16, #tpu.memory_space<vmem>>, %arg2: memref<1024x512xbf16, #tpu.memory_space<vmem>>, %arg3: memref<1x512xf32, #tpu.memory_space<vmem>>, %arg4: memref<512x256xbf16, #tpu.memory_space<vmem>>, %arg5: memref<1x256xf32, #tpu.memory_space<vmem>>, %arg6: memref<256x128xbf16, #tpu.memory_space<vmem>>, %arg7: memref<1x128xf32, #tpu.memory_space<vmem>>, %arg8: memref<16x128xf32, #tpu.memory_space<vmem>>) attributes {dimension_semantics = [#tpu.dimension_semantics<parallel>], iteration_bounds = array<i64: 1>, scalar_prefetch = 0 : i64, scratch_operands = 0 : i64, tpu.core_type = #tpu.core_type<tc>, window_params = [{transform_indices = @transform_0, window_bounds = array<i64: 16, 1024>}, {pipeline_mode = #tpu.pipeline_mode<synchronous>, transform_indices = @transform_1, window_bounds = array<i64: 1024, 512>}, {pipeline_mode = #tpu.pipeline_mode<synchronous>, transform_indices = @transform_2, window_bounds = array<i64: 1, 512>}, {pipeline_mode = #tpu.pipeline_mode<synchronous>, transform_indices = @transform_3, window_bounds = array<i64: 512, 256>}, {pipeline_mode = #tpu.pipeline_mode<synchronous>, transform_indices = @transform_4, window_bounds = array<i64: 1, 256>}, {pipeline_mode = #tpu.pipeline_mode<synchronous>, transform_indices = @transform_5, window_bounds = array<i64: 256, 128>}, {pipeline_mode = #tpu.pipeline_mode<synchronous>, transform_indices = @transform_6, window_bounds = array<i64: 1, 128>}, {transform_indices = @transform_7, window_bounds = array<i64: 16, 128>}]} {
    %c0 = arith.constant 0 : index
    %c0_0 = arith.constant 0 : index
    %0 = vector.load %arg1[%c0, %c0_0] : memref<16x1024xbf16, #tpu.memory_space<vmem>>, vector<16x1024xbf16>
    %c0_1 = arith.constant 0 : index
    %c0_2 = arith.constant 0 : index
    %1 = vector.load %arg2[%c0_1, %c0_2] : memref<1024x512xbf16, #tpu.memory_space<vmem>>, vector<1024x512xbf16>
    %cst = arith.constant dense<0.000000e+00> : vector<16x512xf32>
    %2 = tpu.matmul %0, %1, %cst {dimension_numbers = #tpu.dot_dimension_numbers<[1], [0], [0], [1], [0, 0, 1, 1], [], []>} : vector<16x1024xbf16>, vector<1024x512xbf16>, vector<16x512xf32> -> vector<16x512xf32>
    %c0_3 = arith.constant 0 : index
    %c0_4 = arith.constant 0 : index
    %3 = vector.load %arg3[%c0_3, %c0_4] : memref<1x512xf32, #tpu.memory_space<vmem>>, vector<1x512xf32>
    %4 = vector.broadcast %3 : vector<1x512xf32> to vector<16x512xf32>
    %5 = arith.addf %2, %4 : vector<16x512xf32>
    %cst_5 = arith.constant 0.000000e+00 : f32
    %6 = vector.broadcast %cst_5 : f32 to vector<16x512xf32>
    %7 = arith.cmpf oge, %5, %6 : vector<16x512xf32>
    %cst_6 = arith.constant 0.00999999977 : f32
    %8 = vector.broadcast %cst_6 : f32 to vector<16x512xf32>
    %9 = arith.mulf %8, %5 : vector<16x512xf32>
    %10 = arith.select %7, %5, %9 : vector<16x512xi1>, vector<16x512xf32>
    %11 = arith.truncf %10 : vector<16x512xf32> to vector<16x512xbf16>
    %c0_7 = arith.constant 0 : index
    %c0_8 = arith.constant 0 : index
    %12 = vector.load %arg4[%c0_7, %c0_8] : memref<512x256xbf16, #tpu.memory_space<vmem>>, vector<512x256xbf16>
    %cst_9 = arith.constant dense<0.000000e+00> : vector<16x256xf32>
    %13 = tpu.matmul %11, %12, %cst_9 {dimension_numbers = #tpu.dot_dimension_numbers<[1], [0], [0], [1], [0, 0, 1, 1], [], []>} : vector<16x512xbf16>, vector<512x256xbf16>, vector<16x256xf32> -> vector<16x256xf32>
    %c0_10 = arith.constant 0 : index
    %c0_11 = arith.constant 0 : index
    %14 = vector.load %arg5[%c0_10, %c0_11] : memref<1x256xf32, #tpu.memory_space<vmem>>, vector<1x256xf32>
    %15 = vector.broadcast %14 : vector<1x256xf32> to vector<16x256xf32>
    %16 = arith.addf %13, %15 : vector<16x256xf32>
    %cst_12 = arith.constant 0.000000e+00 : f32
    %17 = vector.broadcast %cst_12 : f32 to vector<16x256xf32>
    %18 = arith.cmpf oge, %16, %17 : vector<16x256xf32>
    %cst_13 = arith.constant 0.00999999977 : f32
    %19 = vector.broadcast %cst_13 : f32 to vector<16x256xf32>
    %20 = arith.mulf %19, %16 : vector<16x256xf32>
    %21 = arith.select %18, %16, %20 : vector<16x256xi1>, vector<16x256xf32>
    %22 = arith.truncf %21 : vector<16x256xf32> to vector<16x256xbf16>
    %c0_14 = arith.constant 0 : index
    %c0_15 = arith.constant 0 : index
    %23 = vector.load %arg6[%c0_14, %c0_15] : memref<256x128xbf16, #tpu.memory_space<vmem>>, vector<256x128xbf16>
    %cst_16 = arith.constant dense<0.000000e+00> : vector<16x128xf32>
    %24 = tpu.matmul %22, %23, %cst_16 {dimension_numbers = #tpu.dot_dimension_numbers<[1], [0], [0], [1], [0, 0, 1, 1], [], []>} : vector<16x256xbf16>, vector<256x128xbf16>, vector<16x128xf32> -> vector<16x128xf32>
    %c0_17 = arith.constant 0 : index
    %c0_18 = arith.constant 0 : index
    %25 = vector.load %arg7[%c0_17, %c0_18] : memref<1x128xf32, #tpu.memory_space<vmem>>, vector<1x128xf32>
    %26 = vector.broadcast %25 : vector<1x128xf32> to vector<16x128xf32>
    %27 = arith.addf %24, %26 : vector<16x128xf32>
    %c0_19 = arith.constant 0 : index
    %c0_20 = arith.constant 0 : index
    %28 = vector.load %arg8[%c0_19, %c0_20] : memref<16x128xf32, #tpu.memory_space<vmem>>, vector<16x128xf32>
    tpu.vector_store %arg8[%c0_19, %c0_20], %27 {strides = array<i32>} : memref<16x128xf32, #tpu.memory_space<vmem>>, vector<16x128xf32>,
    return
  }
  func.func @transform_0(%arg0: i32) -> (i32, i32) {
    %c0_i32 = arith.constant 0 : i32
    %c0_i32_0 = arith.constant 0 : i32
    return %arg0, %c0_i32 : i32, i32
  }
  func.func @transform_1(%arg0: i32) -> (i32, i32) {
    %c0_i32 = arith.constant 0 : i32
    %c0_i32_0 = arith.constant 0 : i32
    %c0_i32_1 = arith.constant 0 : i32
    return %c0_i32, %c0_i32_0 : i32, i32
  }
  func.func @transform_2(%arg0: i32) -> (i32, i32) {
    %c0_i32 = arith.constant 0 : i32
    %c0_i32_0 = arith.constant 0 : i32
    %c0_i32_1 = arith.constant 0 : i32
    return %c0_i32, %c0_i32_0 : i32, i32
  }
  func.func @transform_3(%arg0: i32) -> (i32, i32) {
    %c0_i32 = arith.constant 0 : i32
    %c0_i32_0 = arith.constant 0 : i32
    %c0_i32_1 = arith.constant 0 : i32
    return %c0_i32, %c0_i32_0 : i32, i32
  }
  func.func @transform_4(%arg0: i32) -> (i32, i32) {
    %c0_i32 = arith.constant 0 : i32
    %c0_i32_0 = arith.constant 0 : i32
    %c0_i32_1 = arith.constant 0 : i32
    return %c0_i32, %c0_i32_0 : i32, i32
  }
  func.func @transform_5(%arg0: i32) -> (i32, i32) {
    %c0_i32 = arith.constant 0 : i32
    %c0_i32_0 = arith.constant 0 : i32
    %c0_i32_1 = arith.constant 0 : i32
    return %c0_i32, %c0_i32_0 : i32, i32
  }
  func.func @transform_6(%arg0: i32) -> (i32, i32) {
    %c0_i32 = arith.constant 0 : i32
    %c0_i32_0 = arith.constant 0 : i32
    %c0_i32_1 = arith.constant 0 : i32
    return %c0_i32, %c0_i32_0 : i32, i32
  }
  func.func @transform_7(%arg0: i32) -> (i32, i32) {
    %c0_i32 = arith.constant 0 : i32
    %c0_i32_0 = arith.constant 0 : i32
    return %arg0, %c0_i32 : i32, i32
  }
}

module attributes {stable_mosaic.version = 11 : i64} {
  func.func @kernel(%arg0: i32, %arg1: memref<16x1024xbf16, #tpu.memory_space<vmem>>, %arg2: memref<1024x512xbf16, #tpu.memory_space<vmem>>, %arg3: memref<1x512xf32, #tpu.memory_space<vmem>>, %arg4: memref<512x256xbf16, #tpu.memory_space<vmem>>, %arg5: memref<1x256xf32, #tpu.memory_space<vmem>>, %arg6: memref<256x128xbf16, #tpu.memory_space<vmem>>, %arg7: memref<1x128xf32, #tpu.memory_space<vmem>>, %arg8: memref<16x128xf32, #tpu.memory_space<vmem>>) attributes {dimension_semantics = [#tpu.dimension_semantics<parallel>], iteration_bounds = array<i64: 1>, scalar_prefetch = 0 : i64, scratch_operands = 0 : i64, tpu.core_type = #tpu.core_type<tc>, window_params = [{transform_indices = @transform_0, window_bounds = array<i64: 16, 1024>}, {pipeline_mode = #tpu.pipeline_mode<synchronous>, transform_indices = @transform_1, window_bounds = array<i64: 1024, 512>}, {pipeline_mode = #tpu.pipeline_mode<synchronous>, transform_indices = @transform_2, window_bounds = array<i64: 1, 512>}, {pipeline_mode = #tpu.pipeline_mode<synchronous>, transform_indices = @transform_3, window_bounds = array<i64: 512, 256>}, {pipeline_mode = #tpu.pipeline_mode<synchronous>, transform_indices = @transform_4, window_bounds = array<i64: 1, 256>}, {pipeline_mode = #tpu.pipeline_mode<synchronous>, transform_indices = @transform_5, window_bounds = array<i64: 256, 128>}, {pipeline_mode = #tpu.pipeline_mode<synchronous>, transform_indices = @transform_6, window_bounds = array<i64: 1, 128>}, {transform_indices = @transform_7, window_bounds = array<i64: 16, 128>}]} {
    %c0 = arith.constant 0 : index
    %c0_0 = arith.constant 0 : index
    %0 = vector.load %arg1[%c0, %c0_0] : memref<16x1024xbf16, #tpu.memory_space<vmem>>, vector<16x1024xbf16>
    %c0_1 = arith.constant 0 : index
    %c0_2 = arith.constant 0 : index
    %1 = vector.load %arg2[%c0_1, %c0_2] : memref<1024x512xbf16, #tpu.memory_space<vmem>>, vector<1024x512xbf16>
    %cst = arith.constant dense<0.000000e+00> : vector<16x512xf32>
    %2 = tpu.matmul %0, %1, %cst {dimension_numbers = #tpu.dot_dimension_numbers<[1], [0], [0], [1], [0, 0, 1, 1], [], []>} : vector<16x1024xbf16>, vector<1024x512xbf16>, vector<16x512xf32> -> vector<16x512xf32>
    %c0_3 = arith.constant 0 : index
    %c0_4 = arith.constant 0 : index
    %3 = vector.load %arg3[%c0_3, %c0_4] : memref<1x512xf32, #tpu.memory_space<vmem>>, vector<1x512xf32>
    %4 = vector.broadcast %3 : vector<1x512xf32> to vector<16x512xf32>
    %5 = arith.addf %2, %4 : vector<16x512xf32>
    %cst_5 = arith.constant 0.000000e+00 : f32
    %6 = vector.broadcast %cst_5 : f32 to vector<16x512xf32>
    %7 = arith.cmpf oge, %5, %6 : vector<16x512xf32>
    %cst_6 = arith.constant 0.00999999977 : f32
    %8 = vector.broadcast %cst_6 : f32 to vector<16x512xf32>
    %9 = arith.mulf %8, %5 : vector<16x512xf32>
    %10 = arith.select %7, %5, %9 : vector<16x512xi1>, vector<16x512xf32>
    %11 = arith.truncf %10 : vector<16x512xf32> to vector<16x512xbf16>
    %c0_7 = arith.constant 0 : index
    %c0_8 = arith.constant 0 : index
    %12 = vector.load %arg4[%c0_7, %c0_8] : memref<512x256xbf16, #tpu.memory_space<vmem>>, vector<512x256xbf16>
    %cst_9 = arith.constant dense<0.000000e+00> : vector<16x256xf32>
    %13 = tpu.matmul %11, %12, %cst_9 {dimension_numbers = #tpu.dot_dimension_numbers<[1], [0], [0], [1], [0, 0, 1, 1], [], []>} : vector<16x512xbf16>, vector<512x256xbf16>, vector<16x256xf32> -> vector<16x256xf32>
    %c0_10 = arith.constant 0 : index
    %c0_11 = arith.constant 0 : index
    %14 = vector.load %arg5[%c0_10, %c0_11] : memref<1x256xf32, #tpu.memory_space<vmem>>, vector<1x256xf32>
    %15 = vector.broadcast %14 : vector<1x256xf32> to vector<16x256xf32>
    %16 = arith.addf %13, %15 : vector<16x256xf32>
    %cst_12 = arith.constant 0.000000e+00 : f32
    %17 = vector.broadcast %cst_12 : f32 to vector<16x256xf32>
    %18 = arith.cmpf oge, %16, %17 : vector<16x256xf32>
    %cst_13 = arith.constant 0.00999999977 : f32
    %19 = vector.broadcast %cst_13 : f32 to vector<16x256xf32>
    %20 = arith.mulf %19, %16 : vector<16x256xf32>
    %21 = arith.select %18, %16, %20 : vector<16x256xi1>, vector<16x256xf32>
    %22 = arith.truncf %21 : vector<16x256xf32> to vector<16x256xbf16>
    %c0_14 = arith.constant 0 : index
    %c0_15 = arith.constant 0 : index
    %23 = vector.load %arg6[%c0_14, %c0_15] : memref<256x128xbf16, #tpu.memory_space<vmem>>, vector<256x128xbf16>
    %cst_16 = arith.constant dense<0.000000e+00> : vector<16x128xf32>
    %24 = tpu.matmul %22, %23, %cst_16 {dimension_numbers = #tpu.dot_dimension_numbers<[1], [0], [0], [1], [0, 0, 1, 1], [], []>} : vector<16x256xbf16>, vector<256x128xbf16>, vector<16x128xf32> -> vector<16x128xf32>
    %c0_17 = arith.constant 0 : index
    %c0_18 = arith.constant 0 : index
    %25 = vector.load %arg7[%c0_17, %c0_18] : memref<1x128xf32, #tpu.memory_space<vmem>>, vector<1x128xf32>
    %26 = vector.broadcast %25 : vector<1x128xf32> to vector<16x128xf32>
    %27 = arith.addf %24, %26 : vector<16x128xf32>
    %c0_19 = arith.constant 0 : index
    %c0_20 = arith.constant 0 : index
    %28 = vector.load %arg8[%c0_19, %c0_20] : memref<16x128xf32, #tpu.memory_space<vmem>>, vector<16x128xf32>
    tpu.vector_store %arg8[%c0_19, %c0_20], %27 {strides = array<i32>} : memref<16x128xf32, #tpu.memory_space<vmem>>, vector<16x128xf32>,
    return
  }
  func.func @transform_0(%arg0: i32) -> (i32, i32) {
    %c0_i32 = arith.constant 0 : i32
    %c0_i32_0 = arith.constant 0 : i32
    return %arg0, %c0_i32 : i32, i32
  }
  func.func @transform_1(%arg0: i32) -> (i32, i32) {
    %c0_i32 = arith.constant 0 : i32
    %c0_i32_0 = arith.constant 0 : i32
    %c0_i32_1 = arith.constant 0 : i32
    return %c0_i32, %c0_i32_0 : i32, i32
  }
  func.func @transform_2(%arg0: i32) -> (i32, i32) {
    %c0_i32 = arith.constant 0 : i32
    %c0_i32_0 = arith.constant 0 : i32
    %c0_i32_1 = arith.constant 0 : i32
    return %c0_i32, %c0_i32_0 : i32, i32
  }
  func.func @transform_3(%arg0: i32) -> (i32, i32) {
    %c0_i32 = arith.constant 0 : i32
    %c0_i32_0 = arith.constant 0 : i32
    %c0_i32_1 = arith.constant 0 : i32
    return %c0_i32, %c0_i32_0 : i32, i32
  }
  func.func @transform_4(%arg0: i32) -> (i32, i32) {
    %c0_i32 = arith.constant 0 : i32
    %c0_i32_0 = arith.constant 0 : i32
    %c0_i32_1 = arith.constant 0 : i32
    return %c0_i32, %c0_i32_0 : i32, i32
  }
  func.func @transform_5(%arg0: i32) -> (i32, i32) {
    %c0_i32 = arith.constant 0 : i32
    %c0_i32_0 = arith.constant 0 : i32
    %c0_i32_1 = arith.constant 0 : i32
    return %c0_i32, %c0_i32_0 : i32, i32
  }
  func.func @transform_6(%arg0: i32) -> (i32, i32) {
    %c0_i32 = arith.constant 0 : i32
    %c0_i32_0 = arith.constant 0 : i32
    %c0_i32_1 = arith.constant 0 : i32
    return %c0_i32, %c0_i32_0 : i32, i32
  }
  func.func @transform_7(%arg0: i32) -> (i32, i32) {
    %c0_i32 = arith.constant 0 : i32
    %c0_i32_0 = arith.constant 0 : i32
    return %arg0, %c0_i32 : i32, i32
  }
}

</mosaic_0001>

<bundles_post_ra>
// kernel: discriminator_forward.1
= control target key start
LH: loop header
LB: loop body
LE: loop exit
PB: predicated region body
PF: predicated region fallthrough
CT: control target
= control target key end

     0   :  { %12 = vsyncpa [#allocation3], 0  ;;  %s4866_s0 = inlined_call_operand.vmem [shape: bf16[16,1024], index: 0, kind: input, shape index: {}]   ;;  %s4867_s1 = inlined_call_operand.hbm [shape: bf16[1024,512], index: 1, kind: input, shape index: {}]   ;;  %s4868_s2 = inlined_call_operand.vmem [shape: f32[1,512], index: 2, kind: input, shape index: {}]   ;;  %s4869_s3 = inlined_call_operand.hbm [shape: bf16[512,256], index: 3, kind: input, shape index: {}]   ;;  %s4870_s4 = inlined_call_operand.vmem [shape: f32[1,256], index: 4, kind: input, shape index: {}]   ;;  %s4871_s5 = inlined_call_operand.vmem [shape: bf16[256,128], index: 5, kind: input, shape index: {}]   ;;  %s4872_s6 = inlined_call_operand.vmem [shape: f32[1,128], index: 6, kind: input, shape index: {}]   ;;  %s4873_s7 = inlined_call_operand.vmem [shape: f32[16,128], index: 7, kind: output, shape index: {}]  }
   0x1   :  { %s20_s26 = sshll.u32 %s4867_s1, 4  ;;  %s21_s26 = int_to_ptr.hbm [resolvable:$true] %s20_s26 }
   0x2   :  { %13 = vsyncpa [#allocation5], 0  ;;  %s4591_s27 = smov [#allocation2]   ;;  %s35_s8 = sshll.u32 %s4869_s3, 4  ;;  %s36_s8 = int_to_ptr.hbm [resolvable:$true] %s35_s8 }
   0x3   :  { %s22_s28 = sshll.u32 %s4591_s27, 4  ;;  %s4592_s9 = smov 256   ;;  %s23_s28 = int_to_ptr.vmem [resolvable:$true] %s22_s28 }
   0x4   :  { %s4593_s10 = smov 16   ;;  %s4594_s11 = smov [#allocation4]  }
   0x5   :  { %28 = dma.hbm_to_vmem [thread:$0]  %s21_s26, 32768, %s23_s28, [#allocation3], %s4592_s9, %s4592_s9, %s4593_s10  }
   0x6   :  { %s37_s12 = sshll.u32 %s4594_s11, 4  ;;  %s4595_s13 = smov 128   ;;  %s38_s12 = int_to_ptr.vmem [resolvable:$true] %s37_s12 }
   0x7   :  { %s4596_s14 = smov 8  }
   0x8   :  { %43 = dma.hbm_to_vmem [thread:$0]  %s36_s8, 8192, %s38_s12, [#allocation5], %s4595_s13, %s4595_s13, %s4596_s14  }
   0x9   :  { %4587 = dma.done.wait [#allocation3], 32768  }
   0xa   :  { %4588 = vsyncadd [#allocation3], 4294934528 }
   0xb   :  { %4589 = dma.done.wait [#allocation5], 8192  }
   0xc   :  { %4590 = vsyncadd [#allocation5], 4294959104  ;;  %v2958_v0 = vld [vmem:[#allocation2 + $0xe0] sm:$0xf]  ;;  %v4226_v1 = vld [vmem:[#allocation2 + $0xec] sm:$0xf0] }
   0xd   :  { %v3086_v2 = vld [vmem:[#allocation2 + $0x1e0] sm:$0xf]  ;;  %v2959_v3 = vor.u32 %v4226_v1, %v2958_v0  ;;  %v4258_v4 = vld [vmem:[#allocation2 + $0x1ec] sm:$0xf0] }
   0xe   :  { %v3214_v5 = vld [vmem:[#allocation2 + $0x2e0] sm:$0xf]  ;;  %v4290_v6 = vld [vmem:[#allocation2 + $0x2ec] sm:$0xf0]  ;;  %v3087_v7 = vor.u32 %v4258_v4, %v3086_v2 }
   0xf   :  { %v3215_v8 = vor.u32 %v4290_v6, %v3214_v5  ;;  %v3342_v9 = vld [vmem:[#allocation2 + $0x3e0] sm:$0xf]  ;;  %v4322_v10 = vld [vmem:[#allocation2 + $0x3ec] sm:$0xf0]  ;;  %1652 = vmatpush.bf16.msra.mxu0 %v2959_v3 }
  0x10   :  { %v2942_v11 = vld [vmem:[#allocation2 + $0xc0] sm:$0xf]  ;;  %v3343_v12 = vor.u32 %v4322_v10, %v3342_v9  ;;  %v4222_v13 = vld [vmem:[#allocation2 + $0xcc] sm:$0xf0]  ;;  %1666 = vmatpush.bf16.msra.mxu1 %v3087_v7 }
  0x11   :  { %v3070_v14 = vld [vmem:[#allocation2 + $0x1c0] sm:$0xf]  ;;  %v4254_v15 = vld [vmem:[#allocation2 + $0x1cc] sm:$0xf0]  ;;  %1680 = vmatpush.bf16.msra.mxu2 %v3215_v8  ;;  %v2943_v16 = vor.u32 %v4222_v13, %v2942_v11 }
  0x12   :  { %v3071_v17 = vor.u32 %v4254_v15, %v3070_v14  ;;  %v3198_v18 = vld [vmem:[#allocation2 + $0x2c0] sm:$0xf]  ;;  %v4286_v19 = vld [vmem:[#allocation2 + $0x2cc] sm:$0xf0]  ;;  %1694 = vmatpush.bf16.msra.mxu3 %v3343_v12 }
  0x13   :  { %v3326_v20 = vld [vmem:[#allocation2 + $0x3c0] sm:$0xf]  ;;  %v3199_v21 = vor.u32 %v4286_v19, %v3198_v18  ;;  %v4318_v22 = vld [vmem:[#allocation2 + $0x3cc] sm:$0xf0]  ;;  %1653 = vmatpush.bf16.msra.mxu0 %v2943_v16 }
  0x14   :  { %v2926_v23 = vld [vmem:[#allocation2 + $0xa0] sm:$0xf]  ;;  %v4218_v24 = vld [vmem:[#allocation2 + $0xac] sm:$0xf0]  ;;  %v3327_v25 = vor.u32 %v4318_v22, %v3326_v20  ;;  %1667 = vmatpush.bf16.msra.mxu1 %v3071_v17 }
  0x15   :  { %v3054_v26 = vld [vmem:[#allocation2 + $0x1a0] sm:$0xf]  ;;  %v4250_v27 = vld [vmem:[#allocation2 + $0x1ac] sm:$0xf0]  ;;  %v2927_v29 = vor.u32 %v4218_v24, %v2926_v23  ;;  %1681 = vmatpush.bf16.msra.mxu2 %v3199_v21 }
  0x16   :  { %v3182_v28 = vld [vmem:[#allocation2 + $0x2a0] sm:$0xf]  ;;  %v4282_v30 = vld [vmem:[#allocation2 + $0x2ac] sm:$0xf0]  ;;  %v3055_v33 = vor.u32 %v4250_v27, %v3054_v26  ;;  %1695 = vmatpush.bf16.msra.mxu3 %v3327_v25 }
  0x17   :  { %v3310_v31 = vld [vmem:[#allocation2 + $0x3a0] sm:$0xf]  ;;  %v4314_v32 = vld [vmem:[#allocation2 + $0x3ac] sm:$0xf0]  ;;  %v3183_v34 = vor.u32 %v4282_v30, %v3182_v28  ;;  %1654 = vmatpush.bf16.msra.mxu0 %v2927_v29 }
  0x18   :  { %v2910_v35 = vld [vmem:[#allocation2 + $0x80] sm:$0xf]  ;;  %v4214_v36 = vld [vmem:[#allocation2 + $0x8c] sm:$0xf0]  ;;  %v3311_v38 = vor.u32 %v4314_v32, %v3310_v31  ;;  %1668 = vmatpush.bf16.msra.mxu1 %v3055_v33 }
  0x19   :  { %v3038_v37 = vld [vmem:[#allocation2 + $0x180] sm:$0xf]  ;;  %v4246_v39 = vld [vmem:[#allocation2 + $0x18c] sm:$0xf0]  ;;  %v2911_v44 = vor.u32 %v4214_v36, %v2910_v35  ;;  %1682 = vmatpush.bf16.msra.mxu2 %v3183_v34 }
  0x1a   :  { %v3166_v40 = vld [vmem:[#allocation2 + $0x280] sm:$0xf]  ;;  %v4278_v41 = vld [vmem:[#allocation2 + $0x28c] sm:$0xf0]  ;;  %v3039_v45 = vor.u32 %v4246_v39, %v3038_v37  ;;  %1696 = vmatpush.bf16.msra.mxu3 %v3311_v38 }
  0x1b   :  { %v3294_v42 = vld [vmem:[#allocation2 + $0x380] sm:$0xf]  ;;  %v4310_v43 = vld [vmem:[#allocation2 + $0x38c] sm:$0xf0]  ;;  %v3167_v46 = vor.u32 %v4278_v41, %v3166_v40  ;;  %1655 = vmatpush.bf16.msra.mxu0 %v2911_v44 }
  0x1c   :  { %v2894_v47 = vld [vmem:[#allocation2 + $0x60] sm:$0xf]  ;;  %v4210_v48 = vld [vmem:[#allocation2 + $0x6c] sm:$0xf0]  ;;  %v3295_v50 = vor.u32 %v4310_v43, %v3294_v42  ;;  %1669 = vmatpush.bf16.msra.mxu1 %v3039_v45 }
  0x1d   :  { %v3022_v49 = vld [vmem:[#allocation2 + $0x160] sm:$0xf]  ;;  %v4242_v51 = vld [vmem:[#allocation2 + $0x16c] sm:$0xf0]  ;;  %v2895_v56 = vor.u32 %v4210_v48, %v2894_v47  ;;  %1683 = vmatpush.bf16.msra.mxu2 %v3167_v46 }
  0x1e   :  { %v3150_v52 = vld [vmem:[#allocation2 + $0x260] sm:$0xf]  ;;  %v4274_v53 = vld [vmem:[#allocation2 + $0x26c] sm:$0xf0]  ;;  %v3023_v57 = vor.u32 %v4242_v51, %v3022_v49  ;;  %1697 = vmatpush.bf16.msra.mxu3 %v3295_v50 }
  0x1f   :  { %v3278_v54 = vld [vmem:[#allocation2 + $0x360] sm:$0xf]  ;;  %v4306_v55 = vld [vmem:[#allocation2 + $0x36c] sm:$0xf0]  ;;  %v3151_v58 = vor.u32 %v4274_v53, %v3150_v52  ;;  %1656 = vmatpush.bf16.msra.mxu0 %v2895_v56 }
  0x20   :  { %v2878_v59 = vld [vmem:[#allocation2 + $0x40] sm:$0xf]  ;;  %v4206_v60 = vld [vmem:[#allocation2 + $0x4c] sm:$0xf0]  ;;  %v3279_v62 = vor.u32 %v4306_v55, %v3278_v54  ;;  %1670 = vmatpush.bf16.msra.mxu1 %v3023_v57  ;;  %v2822_v54 = vld [vmem:[%s4866_s0 + $0x8] sm:$0xf] }
  0x21   :  { %v3006_v61 = vld [vmem:[#allocation2 + $0x140] sm:$0xf]  ;;  %v4238_v63 = vld [vmem:[#allocation2 + $0x14c] sm:$0xf0]  ;;  %v2879_v4 = vor.u32 %v4206_v60, %v2878_v59  ;;  %1684 = vmatpush.bf16.msra.mxu2 %v3151_v58  ;;  %v4193_v59 = vld [vmem:[%s4866_s0 + $0x24] sm:$0xf0] }
  0x22   :  { %v3134_v0 = vld [vmem:[#allocation2 + $0x240] sm:$0xf]  ;;  %v4270_v1 = vld [vmem:[#allocation2 + $0x24c] sm:$0xf0]  ;;  %v3007_v5 = vor.u32 %v4238_v63, %v3006_v61  ;;  %1698 = vmatpush.bf16.msra.mxu3 %v3279_v62 }
  0x23   :  { %v3262_v2 = vld [vmem:[#allocation2 + $0x340] sm:$0xf]  ;;  %v4302_v3 = vld [vmem:[#allocation2 + $0x34c] sm:$0xf0]  ;;  %v3135_v6 = vor.u32 %v4270_v1, %v3134_v0  ;;  %1657 = vmatpush.bf16.msra.mxu0 %v2879_v4  ;;  %v4657_v1 = vor.u32 %v4193_v59, %v2822_v54 }
  0x24   :  { %v2862_v7 = vld [vmem:[#allocation2 + $0x20] sm:$0xf]  ;;  %v4202_v8 = vld [vmem:[#allocation2 + $0x2c] sm:$0xf0]  ;;  %v3263_v10 = vor.u32 %v4302_v3, %v3262_v2  ;;  %1671 = vmatpush.bf16.msra.mxu1 %v3007_v5 }
  0x25   :  { %v2990_v9 = vld [vmem:[#allocation2 + $0x120] sm:$0xf]  ;;  %v4234_v11 = vld [vmem:[#allocation2 + $0x12c] sm:$0xf0]  ;;  %v2863_v16 = vor.u32 %v4202_v8, %v2862_v7  ;;  %1685 = vmatpush.bf16.msra.mxu2 %v3135_v6  ;;  %v4188_v6 = vld [vmem:[%s4866_s0 + $0x4] sm:$0xf] }
  0x26   :  { %v3118_v12 = vld [vmem:[#allocation2 + $0x220] sm:$0xf]  ;;  %v4266_v13 = vld [vmem:[#allocation2 + $0x22c] sm:$0xf0]  ;;  %v2991_v19 = vor.u32 %v4234_v11, %v2990_v9  ;;  %1699 = vmatpush.bf16.msra.mxu3 %v3263_v10  ;;  %v2816_v7 = vld [vmem:[%s4866_s0 + $0x20] sm:$0xf0] }
  0x27   :  { %v3246_v14 = vld [vmem:[#allocation2 + $0x320] sm:$0xf]  ;;  %v4298_v15 = vld [vmem:[#allocation2 + $0x32c] sm:$0xf0]  ;;  %v3119_v20 = vor.u32 %v4266_v13, %v3118_v12  ;;  %1658 = vmatpush.bf16.msra.mxu0 %v2863_v16  ;;  %v4189_v8 = vld [vmem:[%s4866_s0 + $0xc] sm:$0xf]  ;;  %v4670_v10 = vor.u32 %v4188_v6, %v2816_v7 }
  0x28   :  { %v2846_v17 = vld [vmem:[#allocation2] sm:$0xf]  ;;  %v4198_v18 = vld [vmem:[#allocation2 + $0xc] sm:$0xf0]  ;;  %v3247_v24 = vor.u32 %v4298_v15, %v3246_v14  ;;  %1672 = vmatpush.bf16.msra.mxu1 %v2991_v19  ;;  %v2824_v11 = vld [vmem:[%s4866_s0 + $0x28] sm:$0xf0] }
  0x29   :  { %v2974_v21 = vld [vmem:[#allocation2 + $0x100] sm:$0xf]  ;;  %v4230_v22 = vld [vmem:[#allocation2 + $0x10c] sm:$0xf0]  ;;  %v2847_v31 = vor.u32 %v4198_v18, %v2846_v17  ;;  %1686 = vmatpush.bf16.msra.mxu2 %v3119_v20  ;;  %v4675_v17 = vor.u32 %v4189_v8, %v2824_v11 }
  0x2a   :  { %v3102_v23 = vld [vmem:[#allocation2 + $0x200] sm:$0xf]  ;;  %v4262_v25 = vld [vmem:[#allocation2 + $0x20c] sm:$0xf0]  ;;  %v2975_v35 = vor.u32 %v4230_v22, %v2974_v21  ;;  %1700 = vmatpush.bf16.msra.mxu3 %v3247_v24 }
  0x2b   :  { %v3230_v26 = vld [vmem:[#allocation2 + $0x300] sm:$0xf]  ;;  %v4294_v27 = vld [vmem:[#allocation2 + $0x30c] sm:$0xf0]  ;;  %v3103_v36 = vor.u32 %v4262_v25, %v3102_v23  ;;  %1659 = vmatpush.bf16.msra.mxu0 %v2847_v31 }
  0x2c   :  { %v3470_v28 = vld [vmem:[#allocation2 + $0x4e0] sm:$0xf]  ;;  %v4354_v29 = vld [vmem:[#allocation2 + $0x4ec] sm:$0xf0]  ;;  %v3231_v39 = vor.u32 %v4294_v27, %v3230_v26  ;;  %1673 = vmatpush.bf16.msra.mxu1 %v2975_v35 }
  0x2d   :  { %v3598_v30 = vld [vmem:[#allocation2 + $0x5e0] sm:$0xf]  ;;  %v4386_v32 = vld [vmem:[#allocation2 + $0x5ec] sm:$0xf0]  ;;  %v3471_v40 = vor.u32 %v4354_v29, %v3470_v28  ;;  %1687 = vmatpush.bf16.msra.mxu2 %v3103_v36 }
  0x2e   :  { %v3726_v33 = vld [vmem:[#allocation2 + $0x6e0] sm:$0xf]  ;;  %v4418_v34 = vld [vmem:[#allocation2 + $0x6ec] sm:$0xf0]  ;;  %v3599_v43 = vor.u32 %v4386_v32, %v3598_v30  ;;  %1701 = vmatpush.bf16.msra.mxu3 %v3231_v39 }
  0x2f   :  { %v3854_v37 = vld [vmem:[#allocation2 + $0x7e0] sm:$0xf]  ;;  %v4450_v38 = vld [vmem:[#allocation2 + $0x7ec] sm:$0xf0]  ;;  %v3727_v44 = vor.u32 %v4418_v34, %v3726_v33  ;;  %1708 = vmatpush.bf16.msrb.mxu0 %v3471_v40  ;;  %1674 = vmatmul.bf16.vlgmr.msra.gmra.mxu1 %v4670_v10 }
  0x30   :  { %v3454_v41 = vld [vmem:[#allocation2 + $0x4c0] sm:$0xf]  ;;  %v4350_v42 = vld [vmem:[#allocation2 + $0x4cc] sm:$0xf0]  ;;  %v3855_v48 = vor.u32 %v4450_v38, %v3854_v37  ;;  %1722 = vmatpush.bf16.msrb.mxu1 %v3599_v43  ;;  %1688 = vmatmul.bf16.vlgmr.msra.gmra.mxu2 %v4657_v1 }
  0x31   :  { %v3582_v45 = vld [vmem:[#allocation2 + $0x5c0] sm:$0xf]  ;;  %v4382_v46 = vld [vmem:[#allocation2 + $0x5cc] sm:$0xf0]  ;;  %v3455_v55 = vor.u32 %v4350_v42, %v3454_v41  ;;  %1736 = vmatpush.bf16.msrb.mxu2 %v3727_v44  ;;  %1702 = vmatmul.bf16.vlgmr.msra.gmra.mxu3 %v4675_v17 }
  0x32   :  { %v3710_v47 = vld [vmem:[#allocation2 + $0x6c0] sm:$0xf]  ;;  %v4414_v49 = vld [vmem:[#allocation2 + $0x6cc] sm:$0xf0]  ;;  %v3583_v60 = vor.u32 %v4382_v46, %v3582_v45  ;;  %1750 = vmatpush.bf16.msrb.mxu3 %v3855_v48 }
  0x33   :  { %v3838_v50 = vld [vmem:[#allocation2 + $0x7c0] sm:$0xf]  ;;  %v4446_v51 = vld [vmem:[#allocation2 + $0x7cc] sm:$0xf0]  ;;  %v3711_v61 = vor.u32 %v4414_v49, %v3710_v47  ;;  %1709 = vmatpush.bf16.msrb.mxu0 %v3455_v55 }
  0x34   :  { %v2814_v52 = vld [vmem:[%s4866_s0] sm:$0xf]  ;;  %v4346_v57 = vld [vmem:[#allocation2 + $0x4ac] sm:$0xf0]  ;;  %v3839_v2 = vor.u32 %v4446_v51, %v3838_v50  ;;  %1723 = vmatpush.bf16.msrb.mxu1 %v3583_v60 }
  0x35   :  { %v4192_v53 = vld [vmem:[%s4866_s0 + $0x1c] sm:$0xf0]  ;;  %v4378_v63 = vld [vmem:[#allocation2 + $0x5ac] sm:$0xf0]  ;;  %1737 = vmatpush.bf16.msrb.mxu2 %v3711_v61 }
  0x36   :  { %v3438_v56 = vld [vmem:[#allocation2 + $0x4a0] sm:$0xf]  ;;  %v4652_v58 = vor.u32 %v4192_v53, %v2814_v52  ;;  %v4410_v3 = vld [vmem:[#allocation2 + $0x6ac] sm:$0xf0]  ;;  %1751 = vmatpush.bf16.msrb.mxu3 %v3839_v2 }
  0x37   :  { %v3566_v62 = vld [vmem:[#allocation2 + $0x5a0] sm:$0xf]  ;;  %v4442_v5 = vld [vmem:[#allocation2 + $0x7ac] sm:$0xf0]  ;;  %v3439_v9 = vor.u32 %v4346_v57, %v3438_v56 }
  0x38   :  { %v3694_v0 = vld [vmem:[#allocation2 + $0x6a0] sm:$0xf]  ;;  %1660 = vmatmul.bf16.vlgmr.msra.gmra.mxu0 %v4652_v58  ;;  %v3567_v12 = vor.u32 %v4378_v63, %v3566_v62  ;;  %v4342_v15 = vld [vmem:[#allocation2 + $0x48c] sm:$0xf0] }
  0x39   :  { %v3822_v4 = vld [vmem:[#allocation2 + $0x7a0] sm:$0xf]  ;;  %v3695_v13 = vor.u32 %v4410_v3, %v3694_v0  ;;  %v4374_v19 = vld [vmem:[#allocation2 + $0x58c] sm:$0xf0]  ;;  %1710 = vmatpush.bf16.msrb.mxu0 %v3439_v9  ;;  %v4224_v9 = vld [vmem:[#allocation2 + $0xe4] sm:$0xf] }
  0x3a   :  { %v3422_v14 = vld [vmem:[#allocation2 + $0x480] sm:$0xf]  ;;  %v3823_v18 = vor.u32 %v4442_v5, %v3822_v4  ;;  %v4406_v21 = vld [vmem:[#allocation2 + $0x68c] sm:$0xf0]  ;;  %1724 = vmatpush.bf16.msrb.mxu1 %v3567_v12  ;;  %v2960_v12 = vld [vmem:[#allocation2 + $0xf0] sm:$0xf0] }
  0x3b   :  { %v3550_v16 = vld [vmem:[#allocation2 + $0x580] sm:$0xf]  ;;  %v4438_v23 = vld [vmem:[#allocation2 + $0x78c] sm:$0xf0]  ;;  %v3423_v24 = vor.u32 %v4342_v15, %v3422_v14  ;;  %1738 = vmatpush.bf16.msrb.mxu2 %v3695_v13  ;;  %v4256_v13 = vld [vmem:[#allocation2 + $0x1e4] sm:$0xf] }
  0x3c   :  { %v3678_v20 = vld [vmem:[#allocation2 + $0x680] sm:$0xf]  ;;  %v3551_v25 = vor.u32 %v4374_v19, %v3550_v16  ;;  %v4338_v28 = vld [vmem:[#allocation2 + $0x46c] sm:$0xf0]  ;;  %1752 = vmatpush.bf16.msrb.mxu3 %v3823_v18  ;;  %v3088_v14 = vld [vmem:[#allocation2 + $0x1f0] sm:$0xf0] }
  0x3d   :  { %v3806_v22 = vld [vmem:[#allocation2 + $0x780] sm:$0xf]  ;;  %v3679_v26 = vor.u32 %v4406_v21, %v3678_v20  ;;  %v4370_v31 = vld [vmem:[#allocation2 + $0x56c] sm:$0xf0]  ;;  %1711 = vmatpush.bf16.msrb.mxu0 %v3423_v24  ;;  %v4288_v15 = vld [vmem:[#allocation2 + $0x2e4] sm:$0xf] }
  0x3e   :  { %v3406_v27 = vld [vmem:[#allocation2 + $0x460] sm:$0xf]  ;;  %v3807_v30 = vor.u32 %v4438_v23, %v3806_v22  ;;  %v4402_v33 = vld [vmem:[#allocation2 + $0x66c] sm:$0xf0]  ;;  %1725 = vmatpush.bf16.msrb.mxu1 %v3551_v25  ;;  %v3216_v16 = vld [vmem:[#allocation2 + $0x2f0] sm:$0xf0] }
  0x3f   :  { %v3534_v29 = vld [vmem:[#allocation2 + $0x560] sm:$0xf]  ;;  %v4434_v35 = vld [vmem:[#allocation2 + $0x76c] sm:$0xf0]  ;;  %v3407_v36 = vor.u32 %v4338_v28, %v3406_v27  ;;  %1739 = vmatpush.bf16.msrb.mxu2 %v3679_v26  ;;  %v4320_v18 = vld [vmem:[#allocation2 + $0x3e4] sm:$0xf] }
  0x40   :  { %v3662_v32 = vld [vmem:[#allocation2 + $0x660] sm:$0xf]  ;;  %v3535_v37 = vor.u32 %v4370_v31, %v3534_v29  ;;  %v4334_v40 = vld [vmem:[#allocation2 + $0x44c] sm:$0xf0]  ;;  %1753 = vmatpush.bf16.msrb.mxu3 %v3807_v30  ;;  %v3344_v20 = vld [vmem:[#allocation2 + $0x3f0] sm:$0xf0]  ;;  %v2963_v29 = vor.u32 %v4224_v9, %v2960_v12 }
  0x41   :  { %v3790_v34 = vld [vmem:[#allocation2 + $0x760] sm:$0xf]  ;;  %v3663_v38 = vor.u32 %v4402_v33, %v3662_v32  ;;  %v4366_v43 = vld [vmem:[#allocation2 + $0x54c] sm:$0xf0]  ;;  %1712 = vmatpush.bf16.msrb.mxu0 %v3407_v36  ;;  %v2838_v25 = vld [vmem:[%s4866_s0 + $0x18] sm:$0xf]  ;;  %v3091_v33 = vor.u32 %v4256_v13, %v3088_v14 }
  0x42   :  { %v3390_v39 = vld [vmem:[#allocation2 + $0x440] sm:$0xf]  ;;  %v3791_v42 = vor.u32 %v4434_v35, %v3790_v34  ;;  %v4398_v45 = vld [vmem:[#allocation2 + $0x64c] sm:$0xf0]  ;;  %1726 = vmatpush.bf16.msrb.mxu1 %v3535_v37  ;;  %v4195_v26 = vld [vmem:[%s4866_s0 + $0x34] sm:$0xf0]  ;;  %v3219_v34 = vor.u32 %v4288_v15, %v3216_v16 }
  0x43   :  { %v3518_v41 = vld [vmem:[#allocation2 + $0x540] sm:$0xf]  ;;  %v4430_v47 = vld [vmem:[#allocation2 + $0x74c] sm:$0xf0]  ;;  %v3391_v48 = vor.u32 %v4334_v40, %v3390_v39  ;;  %1740 = vmatpush.bf16.msrb.mxu2 %v3663_v38  ;;  %v4190_v27 = vld [vmem:[%s4866_s0 + $0x14] sm:$0xf]  ;;  %v3347_v38 = vor.u32 %v4320_v18, %v3344_v20 }
  0x44   :  { %v3646_v44 = vld [vmem:[#allocation2 + $0x640] sm:$0xf]  ;;  %v3519_v50 = vor.u32 %v4366_v43, %v3518_v41  ;;  %v4330_v52 = vld [vmem:[#allocation2 + $0x42c] sm:$0xf0]  ;;  %1754 = vmatpush.bf16.msrb.mxu3 %v3791_v42  ;;  %v2832_v30 = vld [vmem:[%s4866_s0 + $0x30] sm:$0xf0]  ;;  %v4705_v43 = vor.u32 %v4195_v26, %v2838_v25 }
  0x45   :  { %v3774_v46 = vld [vmem:[#allocation2 + $0x740] sm:$0xf]  ;;  %v3647_v51 = vor.u32 %v4398_v45, %v3646_v44  ;;  %v4362_v54 = vld [vmem:[#allocation2 + $0x52c] sm:$0xf0]  ;;  %1713 = vmatpush.bf16.msrb.mxu0 %v3391_v48  ;;  %v4191_v31 = vld [vmem:[%s4866_s0 + $0x1c] sm:$0xf]  ;;  %v4707_v44 = vor.u32 %v4190_v27, %v2832_v30 }
  0x46   :  { %v3374_v49 = vld [vmem:[#allocation2 + $0x420] sm:$0xf]  ;;  %v3775_v55 = vor.u32 %v4430_v47, %v3774_v46  ;;  %v4394_v57 = vld [vmem:[#allocation2 + $0x62c] sm:$0xf0]  ;;  %1727 = vmatpush.bf16.msrb.mxu1 %v3519_v50  ;;  %v2840_v32 = vld [vmem:[%s4866_s0 + $0x38] sm:$0xf0] }
  0x47   :  { %v3502_v53 = vld [vmem:[#allocation2 + $0x520] sm:$0xf]  ;;  %v4426_v60 = vld [vmem:[#allocation2 + $0x72c] sm:$0xf0]  ;;  %v3375_v63 = vor.u32 %v4330_v52, %v3374_v49  ;;  %1741 = vmatpush.bf16.msrb.mxu2 %v3647_v51  ;;  %v4220_v35 = vld [vmem:[#allocation2 + $0xc4] sm:$0xf]  ;;  %v4709_v47 = vor.u32 %v4191_v31, %v2840_v32 }
  0x48   :  { %v3630_v56 = vld [vmem:[#allocation2 + $0x620] sm:$0xf]  ;;  %v4326_v62 = vld [vmem:[#allocation2 + $0x40c] sm:$0xf0]  ;;  %v3503_v5 = vor.u32 %v4362_v54, %v3502_v53  ;;  %1755 = vmatpush.bf16.msrb.mxu3 %v3775_v55  ;;  %v2944_v36 = vld [vmem:[#allocation2 + $0xd0] sm:$0xf0] }
  0x49   :  { %v3758_v59 = vld [vmem:[#allocation2 + $0x720] sm:$0xf]  ;;  %v4358_v2 = vld [vmem:[#allocation2 + $0x50c] sm:$0xf0]  ;;  %v3631_v6 = vor.u32 %v4394_v57, %v3630_v56  ;;  %1714 = vmatpush.bf16.msrb.mxu0 %v3375_v63  ;;  %v4252_v37 = vld [vmem:[#allocation2 + $0x1c4] sm:$0xf]  ;;  %v2947_v48 = vor.u32 %v4220_v35, %v2944_v36 }
  0x4a   :  { %v3358_v61 = vld [vmem:[#allocation2 + $0x400] sm:$0xf]  ;;  %v4390_v4 = vld [vmem:[#allocation2 + $0x60c] sm:$0xf0]  ;;  %v3759_v11 = vor.u32 %v4426_v60, %v3758_v59  ;;  %1728 = vmatpush.bf16.msrb.mxu1 %v3503_v5  ;;  %v3072_v40 = vld [vmem:[#allocation2 + $0x1d0] sm:$0xf0] }
  0x4b   :  { %v3486_v0 = vld [vmem:[#allocation2 + $0x500] sm:$0xf]  ;;  %v4422_v8 = vld [vmem:[#allocation2 + $0x70c] sm:$0xf0]  ;;  %v3359_v19 = vor.u32 %v4326_v62, %v3358_v61  ;;  %1742 = vmatpush.bf16.msrb.mxu2 %v3631_v6  ;;  %v4284_v41 = vld [vmem:[#allocation2 + $0x2c4] sm:$0xf]  ;;  %v3075_v49 = vor.u32 %v4252_v37, %v3072_v40 }
  0x4c   :  { %v3614_v3 = vld [vmem:[#allocation2 + $0x600] sm:$0xf]  ;;  %v2830_v21 = vld [vmem:[%s4866_s0 + $0x10] sm:$0xf]  ;;  %v3487_v23 = vor.u32 %v4358_v2, %v3486_v0  ;;  %1756 = vmatpush.bf16.msrb.mxu3 %v3759_v11  ;;  %v3200_v42 = vld [vmem:[#allocation2 + $0x2d0] sm:$0xf0] }
  0x4d   :  { %v3742_v7 = vld [vmem:[#allocation2 + $0x700] sm:$0xf]  ;;  %v4194_v22 = vld [vmem:[%s4866_s0 + $0x2c] sm:$0xf0]  ;;  %v3615_v24 = vor.u32 %v4390_v4, %v3614_v3  ;;  %1715 = vmatpush.bf16.msrb.mxu0 %v3359_v19  ;;  %v4316_v45 = vld [vmem:[#allocation2 + $0x3c4] sm:$0xf]  ;;  %v3203_v50 = vor.u32 %v4284_v41, %v3200_v42 }
  0x4e   :  { %v3743_v28 = vor.u32 %v4422_v8, %v3742_v7  ;;  %v4703_v39 = vor.u32 %v4194_v22, %v2830_v21  ;;  %1729 = vmatpush.bf16.msrb.mxu1 %v3487_v23  ;;  %v3328_v46 = vld [vmem:[#allocation2 + $0x3d0] sm:$0xf0]  ;;  %v4216_v51 = vld [vmem:[#allocation2 + $0xa4] sm:$0xf] }
  0x4f   :  { %1743 = vmatpush.bf16.msrb.mxu2 %v3615_v24  ;;  %v2928_v52 = vld [vmem:[#allocation2 + $0xb0] sm:$0xf0]  ;;  %v4248_v53 = vld [vmem:[#allocation2 + $0x1a4] sm:$0xf]  ;;  %v3331_v54 = vor.u32 %v4316_v45, %v3328_v46 }
  0x50   :  { %1757 = vmatpush.bf16.msrb.mxu3 %v3743_v28  ;;  %1716 = vmatmul.bf16.vlgmr.msrb.gmra.mxu0 %v4703_v39  ;;  %v3056_v55 = vld [vmem:[#allocation2 + $0x1b0] sm:$0xf0]  ;;  %v4280_v56 = vld [vmem:[#allocation2 + $0x2a4] sm:$0xf]  ;;  %v2931_v61 = vor.u32 %v4216_v51, %v2928_v52 }
  0x51   :  { %1764 = vmatpush.bf16.msra.mxu0 %v2963_v29  ;;  %v3184_v57 = vld [vmem:[#allocation2 + $0x2b0] sm:$0xf0]  ;;  %1730 = vmatmul.bf16.vlgmr.msrb.gmra.mxu1 %v4707_v44  ;;  %v4312_v59 = vld [vmem:[#allocation2 + $0x3a4] sm:$0xf]  ;;  %v3059_v62 = vor.u32 %v4248_v53, %v3056_v55 }
  0x52   :  { %1778 = vmatpush.bf16.msra.mxu1 %v3091_v33  ;;  %1744 = vmatmul.bf16.vlgmr.msrb.gmra.mxu2 %v4705_v43  ;;  %v3312_v60 = vld [vmem:[#allocation2 + $0x3b0] sm:$0xf0]  ;;  %v3187_v63 = vor.u32 %v4280_v56, %v3184_v57  ;;  %v4212_v0 = vld [vmem:[#allocation2 + $0x84] sm:$0xf] }
  0x53   :  { %1792 = vmatpush.bf16.msra.mxu2 %v3219_v34  ;;  %1758 = vmatmul.bf16.vlgmr.msrb.gmra.mxu3 %v4709_v47  ;;  %v2912_v2 = vld [vmem:[#allocation2 + $0x90] sm:$0xf0]  ;;  %v4244_v3 = vld [vmem:[#allocation2 + $0x184] sm:$0xf]  ;;  %v3315_v4 = vor.u32 %v4312_v59, %v3312_v60 }
  0x54   :  { %1806 = vmatpush.bf16.msra.mxu3 %v3347_v38  ;;  %v3040_v5 = vld [vmem:[#allocation2 + $0x190] sm:$0xf0]  ;;  %v4276_v6 = vld [vmem:[#allocation2 + $0x284] sm:$0xf]  ;;  %v2915_v11 = vor.u32 %v4212_v0, %v2912_v2 }
  0x55   :  { %1765 = vmatpush.bf16.msra.mxu0 %v2947_v48  ;;  %v3168_v7 = vld [vmem:[#allocation2 + $0x290] sm:$0xf0]  ;;  %v4308_v8 = vld [vmem:[#allocation2 + $0x384] sm:$0xf]  ;;  %v3043_v12 = vor.u32 %v4244_v3, %v3040_v5 }
  0x56   :  { %1779 = vmatpush.bf16.msra.mxu1 %v3075_v49  ;;  %v3296_v9 = vld [vmem:[#allocation2 + $0x390] sm:$0xf0]  ;;  %v3171_v13 = vor.u32 %v4276_v6, %v3168_v7  ;;  %v4208_v14 = vld [vmem:[#allocation2 + $0x64] sm:$0xf] }
  0x57   :  { %1793 = vmatpush.bf16.msra.mxu2 %v3203_v50  ;;  %v2896_v15 = vld [vmem:[#allocation2 + $0x70] sm:$0xf0]  ;;  %v4240_v16 = vld [vmem:[#allocation2 + $0x164] sm:$0xf]  ;;  %v3299_v18 = vor.u32 %v4308_v8, %v3296_v9 }
  0x58   :  { %1807 = vmatpush.bf16.msra.mxu3 %v3331_v54  ;;  %v3024_v19 = vld [vmem:[#allocation2 + $0x170] sm:$0xf0]  ;;  %v4272_v20 = vld [vmem:[#allocation2 + $0x264] sm:$0xf]  ;;  %v2899_v24 = vor.u32 %v4208_v14, %v2896_v15 }
  0x59   :  { %1766 = vmatpush.bf16.msra.mxu0 %v2931_v61  ;;  %v3152_v21 = vld [vmem:[#allocation2 + $0x270] sm:$0xf0]  ;;  %v4304_v22 = vld [vmem:[#allocation2 + $0x364] sm:$0xf]  ;;  %v3027_v25 = vor.u32 %v4240_v16, %v3024_v19 }
  0x5a   :  { %1780 = vmatpush.bf16.msra.mxu1 %v3059_v62  ;;  %v3280_v23 = vld [vmem:[#allocation2 + $0x370] sm:$0xf0]  ;;  %v3155_v26 = vor.u32 %v4272_v20, %v3152_v21  ;;  %v4204_v27 = vld [vmem:[#allocation2 + $0x44] sm:$0xf] }
  0x5b   :  { %1794 = vmatpush.bf16.msra.mxu2 %v3187_v63  ;;  %v2880_v28 = vld [vmem:[#allocation2 + $0x50] sm:$0xf0]  ;;  %v4236_v29 = vld [vmem:[#allocation2 + $0x144] sm:$0xf]  ;;  %v3283_v30 = vor.u32 %v4304_v22, %v3280_v23 }
  0x5c   :  { %1808 = vmatpush.bf16.msra.mxu3 %v3315_v4  ;;  %v3008_v31 = vld [vmem:[#allocation2 + $0x150] sm:$0xf0]  ;;  %v4268_v32 = vld [vmem:[#allocation2 + $0x244] sm:$0xf]  ;;  %v2883_v36 = vor.u32 %v4204_v27, %v2880_v28 }
  0x5d   :  { %1767 = vmatpush.bf16.msra.mxu0 %v2915_v11  ;;  %v3136_v33 = vld [vmem:[#allocation2 + $0x250] sm:$0xf0]  ;;  %v4300_v34 = vld [vmem:[#allocation2 + $0x344] sm:$0xf]  ;;  %v3011_v37 = vor.u32 %v4236_v29, %v3008_v31 }
  0x5e   :  { %1781 = vmatpush.bf16.msra.mxu1 %v3043_v12  ;;  %v3264_v35 = vld [vmem:[#allocation2 + $0x350] sm:$0xf0]  ;;  %v3139_v38 = vor.u32 %v4268_v32, %v3136_v33  ;;  %v4200_v40 = vld [vmem:[#allocation2 + $0x24] sm:$0xf] }
  0x5f   :  { %1795 = vmatpush.bf16.msra.mxu2 %v3171_v13  ;;  %v2864_v41 = vld [vmem:[#allocation2 + $0x30] sm:$0xf0]  ;;  %v4232_v42 = vld [vmem:[#allocation2 + $0x124] sm:$0xf]  ;;  %v3267_v45 = vor.u32 %v4300_v34, %v3264_v35 }
  0x60   :  { %1809 = vmatpush.bf16.msra.mxu3 %v3299_v18  ;;  %v2992_v46 = vld [vmem:[#allocation2 + $0x130] sm:$0xf0]  ;;  %v4264_v48 = vld [vmem:[#allocation2 + $0x224] sm:$0xf]  ;;  %v2867_v52 = vor.u32 %v4200_v40, %v2864_v41 }
  0x61   :  { %1768 = vmatpush.bf16.msra.mxu0 %v2899_v24  ;;  %v3120_v49 = vld [vmem:[#allocation2 + $0x230] sm:$0xf0]  ;;  %v4296_v50 = vld [vmem:[#allocation2 + $0x324] sm:$0xf]  ;;  %v2995_v55 = vor.u32 %v4232_v42, %v2992_v46 }
  0x62   :  { %1782 = vmatpush.bf16.msra.mxu1 %v3027_v25  ;;  %v3248_v51 = vld [vmem:[#allocation2 + $0x330] sm:$0xf0]  ;;  %v4196_v53 = vld [vmem:[#allocation2 + $0x4] sm:$0xf]  ;;  %v3123_v56 = vor.u32 %v4264_v48, %v3120_v49 }
  0x63   :  { %1796 = vmatpush.bf16.msra.mxu2 %v3155_v26  ;;  %v2848_v54 = vld [vmem:[#allocation2 + $0x10] sm:$0xf0]  ;;  %v4228_v57 = vld [vmem:[#allocation2 + $0x104] sm:$0xf]  ;;  %v3251_v61 = vor.u32 %v4296_v50, %v3248_v51 }
  0x64   :  { %1810 = vmatpush.bf16.msra.mxu3 %v3283_v30  ;;  %v2976_v59 = vld [vmem:[#allocation2 + $0x110] sm:$0xf0]  ;;  %v4260_v60 = vld [vmem:[#allocation2 + $0x204] sm:$0xf]  ;;  %v2851_v5 = vor.u32 %v4196_v53, %v2848_v54 }
  0x65   :  { %1769 = vmatpush.bf16.msra.mxu0 %v2883_v36  ;;  %v3104_v62 = vld [vmem:[#allocation2 + $0x210] sm:$0xf0]  ;;  %v4292_v63 = vld [vmem:[#allocation2 + $0x304] sm:$0xf]  ;;  %v2979_v9 = vor.u32 %v4228_v57, %v2976_v59 }
  0x66   :  { %1783 = vmatpush.bf16.msra.mxu1 %v3011_v37  ;;  %v3232_v0 = vld [vmem:[#allocation2 + $0x310] sm:$0xf0]  ;;  %v4352_v2 = vld [vmem:[#allocation2 + $0x4e4] sm:$0xf]  ;;  %v3107_v11 = vor.u32 %v4260_v60, %v3104_v62 }
  0x67   :  { %1797 = vmatpush.bf16.msra.mxu2 %v3139_v38  ;;  %v3472_v3 = vld [vmem:[#allocation2 + $0x4f0] sm:$0xf0]  ;;  %v4384_v4 = vld [vmem:[#allocation2 + $0x5e4] sm:$0xf]  ;;  %v3235_v14 = vor.u32 %v4292_v63, %v3232_v0 }
  0x68   :  { %1811 = vmatpush.bf16.msra.mxu3 %v3267_v45  ;;  %v3600_v6 = vld [vmem:[#allocation2 + $0x5f0] sm:$0xf0]  ;;  %v4416_v7 = vld [vmem:[#allocation2 + $0x6e4] sm:$0xf]  ;;  %v3475_v15 = vor.u32 %v4352_v2, %v3472_v3 }
  0x69   :  { %1770 = vmatpush.bf16.msra.mxu0 %v2867_v52  ;;  %v3728_v8 = vld [vmem:[#allocation2 + $0x6f0] sm:$0xf0]  ;;  %v4448_v12 = vld [vmem:[#allocation2 + $0x7e4] sm:$0xf]  ;;  %v3603_v16 = vor.u32 %v4384_v4, %v3600_v6 }
  0x6a   :  { %1784 = vmatpush.bf16.msra.mxu1 %v2995_v55  ;;  %v3856_v13 = vld [vmem:[#allocation2 + $0x7f0] sm:$0xf0]  ;;  %v3731_v18 = vor.u32 %v4416_v7, %v3728_v8  ;;  %v4348_v19 = vld [vmem:[#allocation2 + $0x4c4] sm:$0xf] }
  0x6b   :  { %1798 = vmatpush.bf16.msra.mxu2 %v3123_v56  ;;  %v3456_v20 = vld [vmem:[#allocation2 + $0x4d0] sm:$0xf0]  ;;  %v4380_v21 = vld [vmem:[#allocation2 + $0x5c4] sm:$0xf]  ;;  %v3859_v22 = vor.u32 %v4448_v12, %v3856_v13 }
  0x6c   :  { %1812 = vmatpush.bf16.msra.mxu3 %v3251_v61  ;;  %v3584_v23 = vld [vmem:[#allocation2 + $0x5d0] sm:$0xf0]  ;;  %v4412_v24 = vld [vmem:[#allocation2 + $0x6c4] sm:$0xf]  ;;  %v3459_v28 = vor.u32 %v4348_v19, %v3456_v20 }
  0x6d   :  { %1771 = vmatpush.bf16.msra.mxu0 %v2851_v5  ;;  %v3712_v25 = vld [vmem:[#allocation2 + $0x6d0] sm:$0xf0]  ;;  %v4444_v26 = vld [vmem:[#allocation2 + $0x7c4] sm:$0xf]  ;;  %v3587_v29 = vor.u32 %v4380_v21, %v3584_v23 }
  0x6e   :  { %1785 = vmatpush.bf16.msra.mxu1 %v2979_v9  ;;  %v3840_v27 = vld [vmem:[#allocation2 + $0x7d0] sm:$0xf0]  ;;  %v3715_v30 = vor.u32 %v4412_v24, %v3712_v25  ;;  %v4344_v31 = vld [vmem:[#allocation2 + $0x4a4] sm:$0xf] }
  0x6f   :  { %1799 = vmatpush.bf16.msra.mxu2 %v3107_v11  ;;  %v3440_v32 = vld [vmem:[#allocation2 + $0x4b0] sm:$0xf0]  ;;  %v4376_v33 = vld [vmem:[#allocation2 + $0x5a4] sm:$0xf]  ;;  %v3843_v34 = vor.u32 %v4444_v26, %v3840_v27 }
  0x70   :  { %1813 = vmatpush.bf16.msra.mxu3 %v3235_v14  ;;  %v3568_v35 = vld [vmem:[#allocation2 + $0x5b0] sm:$0xf0]  ;;  %v4408_v36 = vld [vmem:[#allocation2 + $0x6a4] sm:$0xf]  ;;  %1772 = vmatmul.bf16.vlgmr.msra.gmra.mxu0 %v4652_v58  ;;  %v3443_v41 = vor.u32 %v4344_v31, %v3440_v32 }
  0x71   :  { %1820 = vmatpush.bf16.msrb.mxu0 %v3475_v15  ;;  %v3696_v37 = vld [vmem:[#allocation2 + $0x6b0] sm:$0xf0]  ;;  %v4440_v38 = vld [vmem:[#allocation2 + $0x7a4] sm:$0xf]  ;;  %1786 = vmatmul.bf16.vlgmr.msra.gmra.mxu1 %v4670_v10  ;;  %v3571_v42 = vor.u32 %v4376_v33, %v3568_v35 }
  0x72   :  { %1834 = vmatpush.bf16.msrb.mxu1 %v3603_v16  ;;  %v3824_v40 = vld [vmem:[#allocation2 + $0x7b0] sm:$0xf0]  ;;  %1800 = vmatmul.bf16.vlgmr.msra.gmra.mxu2 %v4657_v1  ;;  %v3699_v45 = vor.u32 %v4408_v36, %v3696_v37  ;;  %v4340_v46 = vld [vmem:[#allocation2 + $0x484] sm:$0xf] }
  0x73   :  { %1848 = vmatpush.bf16.msrb.mxu2 %v3731_v18  ;;  %1814 = vmatmul.bf16.vlgmr.msra.gmra.mxu3 %v4675_v17  ;;  %v3424_v48 = vld [vmem:[#allocation2 + $0x490] sm:$0xf0]  ;;  %v4372_v49 = vld [vmem:[#allocation2 + $0x584] sm:$0xf]  ;;  %v3827_v50 = vor.u32 %v4440_v38, %v3824_v40 }
  0x74   :  { %1862 = vmatpush.bf16.msrb.mxu3 %v3859_v22  ;;  %v3552_v51 = vld [vmem:[#allocation2 + $0x590] sm:$0xf0]  ;;  %v4404_v52 = vld [vmem:[#allocation2 + $0x684] sm:$0xf]  ;;  %v3427_v56 = vor.u32 %v4340_v46, %v3424_v48  ;;  %v2966_v48 = vld [vmem:[#allocation2 + $0xe8] sm:$0xf] }
  0x75   :  { %1821 = vmatpush.bf16.msrb.mxu0 %v3459_v28  ;;  %v3680_v53 = vld [vmem:[#allocation2 + $0x690] sm:$0xf0]  ;;  %v4436_v54 = vld [vmem:[#allocation2 + $0x784] sm:$0xf]  ;;  %v3555_v57 = vor.u32 %v4372_v49, %v3552_v51  ;;  %v4227_v49 = vld [vmem:[#allocation2 + $0xf4] sm:$0xf0] }
  0x76   :  { %1835 = vmatpush.bf16.msrb.mxu1 %v3587_v29  ;;  %v3808_v55 = vld [vmem:[#allocation2 + $0x790] sm:$0xf0]  ;;  %v3683_v59 = vor.u32 %v4404_v52, %v3680_v53  ;;  %v4336_v60 = vld [vmem:[#allocation2 + $0x464] sm:$0xf]  ;;  %v4259_v52 = vld [vmem:[#allocation2 + $0x1f4] sm:$0xf0] }
  0x77   :  { %1849 = vmatpush.bf16.msrb.mxu2 %v3715_v30  ;;  %v3408_v61 = vld [vmem:[#allocation2 + $0x470] sm:$0xf0]  ;;  %v4368_v62 = vld [vmem:[#allocation2 + $0x564] sm:$0xf]  ;;  %v3811_v63 = vor.u32 %v4436_v54, %v3808_v55  ;;  %v3222_v53 = vld [vmem:[#allocation2 + $0x2e8] sm:$0xf] }
  0x78   :  { %1863 = vmatpush.bf16.msrb.mxu3 %v3843_v34  ;;  %v3536_v0 = vld [vmem:[#allocation2 + $0x570] sm:$0xf0]  ;;  %v4400_v2 = vld [vmem:[#allocation2 + $0x664] sm:$0xf]  ;;  %v3411_v6 = vor.u32 %v4336_v60, %v3408_v61  ;;  %v4291_v54 = vld [vmem:[#allocation2 + $0x2f4] sm:$0xf0]  ;;  %v2967_v61 = vor.u32 %v4227_v49, %v2966_v48 }
  0x79   :  { %1822 = vmatpush.bf16.msrb.mxu0 %v3443_v41  ;;  %v3664_v3 = vld [vmem:[#allocation2 + $0x670] sm:$0xf0]  ;;  %v4432_v4 = vld [vmem:[#allocation2 + $0x764] sm:$0xf]  ;;  %v3539_v7 = vor.u32 %v4368_v62, %v3536_v0  ;;  %v2950_v0 = vld [vmem:[#allocation2 + $0xc8] sm:$0xf] }
  0x7a   :  { %1836 = vmatpush.bf16.msrb.mxu1 %v3571_v42  ;;  %v3792_v5 = vld [vmem:[#allocation2 + $0x770] sm:$0xf0]  ;;  %v3667_v8 = vor.u32 %v4400_v2, %v3664_v3  ;;  %v4332_v9 = vld [vmem:[#allocation2 + $0x444] sm:$0xf]  ;;  %v4223_v2 = vld [vmem:[#allocation2 + $0xd4] sm:$0xf0] }
  0x7b   :  { %1850 = vmatpush.bf16.msrb.mxu2 %v3699_v45  ;;  %v3392_v11 = vld [vmem:[#allocation2 + $0x450] sm:$0xf0]  ;;  %v4364_v12 = vld [vmem:[#allocation2 + $0x544] sm:$0xf]  ;;  %v3795_v13 = vor.u32 %v4432_v4, %v3792_v5  ;;  %v3078_v3 = vld [vmem:[#allocation2 + $0x1c8] sm:$0xf] }
  0x7c   :  { %1864 = vmatpush.bf16.msrb.mxu3 %v3827_v50  ;;  %v3520_v14 = vld [vmem:[#allocation2 + $0x550] sm:$0xf0]  ;;  %v4396_v15 = vld [vmem:[#allocation2 + $0x644] sm:$0xf]  ;;  %v3395_v20 = vor.u32 %v4332_v9, %v3392_v11  ;;  %v3094_v50 = vld [vmem:[#allocation2 + $0x1e8] sm:$0xf]  ;;  %v2951_v11 = vor.u32 %v4223_v2, %v2950_v0 }
  0x7d   :  { %1823 = vmatpush.bf16.msrb.mxu0 %v3427_v56  ;;  %v3648_v16 = vld [vmem:[#allocation2 + $0x650] sm:$0xf0]  ;;  %v4428_v18 = vld [vmem:[#allocation2 + $0x744] sm:$0xf]  ;;  %v3523_v21 = vor.u32 %v4364_v12, %v3520_v14  ;;  %v3095_v62 = vor.u32 %v4259_v52, %v3094_v50  ;;  %v4255_v5 = vld [vmem:[#allocation2 + $0x1d4] sm:$0xf0] }
  0x7e   :  { %1837 = vmatpush.bf16.msrb.mxu1 %v3555_v57  ;;  %v3776_v19 = vld [vmem:[#allocation2 + $0x750] sm:$0xf0]  ;;  %v3651_v22 = vor.u32 %v4396_v15, %v3648_v16  ;;  %v4328_v23 = vld [vmem:[#allocation2 + $0x424] sm:$0xf]  ;;  %v3350_v57 = vld [vmem:[#allocation2 + $0x3e8] sm:$0xf]  ;;  %v3079_v12 = vor.u32 %v4255_v5, %v3078_v3 }
  0x7f   :  { %1851 = vmatpush.bf16.msrb.mxu2 %v3683_v59  ;;  %v3376_v24 = vld [vmem:[#allocation2 + $0x430] sm:$0xf0]  ;;  %v4360_v25 = vld [vmem:[#allocation2 + $0x524] sm:$0xf]  ;;  %v3779_v26 = vor.u32 %v4428_v18, %v3776_v19  ;;  %v4323_v59 = vld [vmem:[#allocation2 + $0x3f4] sm:$0xf0] }
  0x80   :  { %1865 = vmatpush.bf16.msrb.mxu3 %v3811_v63  ;;  %v3504_v27 = vld [vmem:[#allocation2 + $0x530] sm:$0xf0]  ;;  %v4392_v28 = vld [vmem:[#allocation2 + $0x624] sm:$0xf]  ;;  %v3379_v32 = vor.u32 %v4328_v23, %v3376_v24  ;;  %v3223_v63 = vor.u32 %v4291_v54, %v3222_v53  ;;  %v3351_v4 = vor.u32 %v4323_v59, %v3350_v57  ;;  %v4319_v9 = vld [vmem:[#allocation2 + $0x3d4] sm:$0xf0] }
  0x81   :  { %1824 = vmatpush.bf16.msrb.mxu0 %v3411_v6  ;;  %v3632_v29 = vld [vmem:[#allocation2 + $0x630] sm:$0xf0]  ;;  %v4424_v30 = vld [vmem:[#allocation2 + $0x724] sm:$0xf]  ;;  %v3507_v35 = vor.u32 %v4360_v25, %v3504_v27  ;;  %v3206_v6 = vld [vmem:[#allocation2 + $0x2c8] sm:$0xf] }
  0x82   :  { %1838 = vmatpush.bf16.msrb.mxu1 %v3539_v7  ;;  %v3760_v31 = vld [vmem:[#allocation2 + $0x730] sm:$0xf0]  ;;  %v4324_v33 = vld [vmem:[#allocation2 + $0x404] sm:$0xf]  ;;  %v3635_v36 = vor.u32 %v4392_v28, %v3632_v29  ;;  %v4287_v7 = vld [vmem:[#allocation2 + $0x2d4] sm:$0xf0] }
  0x83   :  { %1852 = vmatpush.bf16.msrb.mxu2 %v3667_v8  ;;  %v3360_v34 = vld [vmem:[#allocation2 + $0x410] sm:$0xf0]  ;;  %v4356_v37 = vld [vmem:[#allocation2 + $0x504] sm:$0xf]  ;;  %v3763_v41 = vor.u32 %v4424_v30, %v3760_v31  ;;  %v3334_v8 = vld [vmem:[#allocation2 + $0x3c8] sm:$0xf] }
  0x84   :  { %1866 = vmatpush.bf16.msrb.mxu3 %v3795_v13  ;;  %v3488_v38 = vld [vmem:[#allocation2 + $0x510] sm:$0xf0]  ;;  %v4388_v40 = vld [vmem:[#allocation2 + $0x604] sm:$0xf]  ;;  %v3363_v51 = vor.u32 %v4324_v33, %v3360_v34  ;;  %v3207_v13 = vor.u32 %v4287_v7, %v3206_v6  ;;  %v2934_v14 = vld [vmem:[#allocation2 + $0xa8] sm:$0xf]  ;;  %v3335_v18 = vor.u32 %v4319_v9, %v3334_v8 }
  0x85   :  { %1825 = vmatpush.bf16.msrb.mxu0 %v3395_v20  ;;  %v3616_v42 = vld [vmem:[#allocation2 + $0x610] sm:$0xf0]  ;;  %v4420_v45 = vld [vmem:[#allocation2 + $0x704] sm:$0xf]  ;;  %v3491_v55 = vor.u32 %v4356_v37, %v3488_v38  ;;  %v4219_v15 = vld [vmem:[#allocation2 + $0xb4] sm:$0xf0] }
  0x86   :  { %1839 = vmatpush.bf16.msrb.mxu1 %v3523_v21  ;;  %v3744_v46 = vld [vmem:[#allocation2 + $0x710] sm:$0xf0]  ;;  %v3619_v56 = vor.u32 %v4388_v40, %v3616_v42  ;;  %v3062_v16 = vld [vmem:[#allocation2 + $0x1a8] sm:$0xf]  ;;  %v4251_v19 = vld [vmem:[#allocation2 + $0x1b4] sm:$0xf0]  ;;  %v2935_v24 = vor.u32 %v4219_v15, %v2934_v14 }
  0x87   :  { %1853 = vmatpush.bf16.msrb.mxu2 %v3651_v22  ;;  %v3747_v60 = vor.u32 %v4420_v45, %v3744_v46  ;;  %v3190_v20 = vld [vmem:[#allocation2 + $0x2a8] sm:$0xf]  ;;  %v4283_v21 = vld [vmem:[#allocation2 + $0x2b4] sm:$0xf0]  ;;  %v3063_v25 = vor.u32 %v4251_v19, %v3062_v16 }
  0x88   :  { %1867 = vmatpush.bf16.msrb.mxu3 %v3779_v26  ;;  %v3318_v22 = vld [vmem:[#allocation2 + $0x3a8] sm:$0xf]  ;;  %v4315_v23 = vld [vmem:[#allocation2 + $0x3b4] sm:$0xf0]  ;;  %v3191_v26 = vor.u32 %v4283_v21, %v3190_v20 }
  0x89   :  { %1826 = vmatpush.bf16.msrb.mxu0 %v3379_v32  ;;  %v2918_v27 = vld [vmem:[#allocation2 + $0x88] sm:$0xf]  ;;  %v4215_v28 = vld [vmem:[#allocation2 + $0x94] sm:$0xf0]  ;;  %v3319_v30 = vor.u32 %v4315_v23, %v3318_v22 }
  0x8a   :  { %1840 = vmatpush.bf16.msrb.mxu1 %v3507_v35  ;;  %v3046_v29 = vld [vmem:[#allocation2 + $0x188] sm:$0xf]  ;;  %v4247_v31 = vld [vmem:[#allocation2 + $0x194] sm:$0xf0] }
  0x8b   :  { %1854 = vmatpush.bf16.msrb.mxu2 %v3635_v36  ;;  %v3174_v32 = vld [vmem:[#allocation2 + $0x288] sm:$0xf]  ;;  %v4279_v33 = vld [vmem:[#allocation2 + $0x294] sm:$0xf0]  ;;  %v2919_v36 = vor.u32 %v4215_v28, %v2918_v27  ;;  %v3047_v37 = vor.u32 %v4247_v31, %v3046_v29 }
  0x8c   :  { %1868 = vmatpush.bf16.msrb.mxu3 %v3763_v41  ;;  %v3302_v34 = vld [vmem:[#allocation2 + $0x388] sm:$0xf]  ;;  %v4311_v35 = vld [vmem:[#allocation2 + $0x394] sm:$0xf0]  ;;  %v3175_v38 = vor.u32 %v4279_v33, %v3174_v32 }
  0x8d   :  { %1827 = vmatpush.bf16.msrb.mxu0 %v3363_v51  ;;  %v2902_v40 = vld [vmem:[#allocation2 + $0x68] sm:$0xf]  ;;  %v4211_v41 = vld [vmem:[#allocation2 + $0x74] sm:$0xf0]  ;;  %v3303_v45 = vor.u32 %v4311_v35, %v3302_v34 }
  0x8e   :  { %1841 = vmatpush.bf16.msrb.mxu1 %v3491_v55  ;;  %v3030_v42 = vld [vmem:[#allocation2 + $0x168] sm:$0xf]  ;;  %v4243_v46 = vld [vmem:[#allocation2 + $0x174] sm:$0xf0]  ;;  %v2903_v52 = vor.u32 %v4211_v41, %v2902_v40 }
  0x8f   :  { %1855 = vmatpush.bf16.msrb.mxu2 %v3619_v56  ;;  %v3158_v48 = vld [vmem:[#allocation2 + $0x268] sm:$0xf]  ;;  %v4275_v49 = vld [vmem:[#allocation2 + $0x274] sm:$0xf0]  ;;  %v3031_v53 = vor.u32 %v4243_v46, %v3030_v42 }
  0x90   :  { %1869 = vmatpush.bf16.msrb.mxu3 %v3747_v60  ;;  %1828 = vmatmul.bf16.vlgmr.msrb.gmra.mxu0 %v4703_v39  ;;  %v3286_v50 = vld [vmem:[#allocation2 + $0x368] sm:$0xf]  ;;  %v4307_v51 = vld [vmem:[#allocation2 + $0x374] sm:$0xf0]  ;;  %v3159_v54 = vor.u32 %v4275_v49, %v3158_v48 }
  0x91   :  { %1876 = vmatpush.bf16.msra.mxu0 %v2967_v61  ;;  %1842 = vmatmul.bf16.vlgmr.msrb.gmra.mxu1 %v4707_v44  ;;  %v2886_v55 = vld [vmem:[#allocation2 + $0x48] sm:$0xf]  ;;  %v4207_v56 = vld [vmem:[#allocation2 + $0x54] sm:$0xf0]  ;;  %v3287_v59 = vor.u32 %v4307_v51, %v3286_v50 }
  0x92   :  { %1890 = vmatpush.bf16.msra.mxu1 %v3095_v62  ;;  %1856 = vmatmul.bf16.vlgmr.msrb.gmra.mxu2 %v4705_v43  ;;  %v3014_v57 = vld [vmem:[#allocation2 + $0x148] sm:$0xf]  ;;  %v4239_v60 = vld [vmem:[#allocation2 + $0x154] sm:$0xf0]  ;;  %v2887_v2 = vor.u32 %v4207_v56, %v2886_v55 }
  0x93   :  { %1904 = vmatpush.bf16.msra.mxu2 %v3223_v63  ;;  %1870 = vmatmul.bf16.vlgmr.msrb.gmra.mxu3 %v4709_v47  ;;  %v3142_v61 = vld [vmem:[#allocation2 + $0x248] sm:$0xf]  ;;  %v4271_v62 = vld [vmem:[#allocation2 + $0x254] sm:$0xf0]  ;;  %v3015_v3 = vor.u32 %v4239_v60, %v3014_v57 }
  0x94   :  { %1918 = vmatpush.bf16.msra.mxu3 %v3351_v4  ;;  %v3270_v63 = vld [vmem:[#allocation2 + $0x348] sm:$0xf]  ;;  %v4303_v0 = vld [vmem:[#allocation2 + $0x354] sm:$0xf0]  ;;  %v3143_v4 = vor.u32 %v4271_v62, %v3142_v61 }
  0x95   :  { %1877 = vmatpush.bf16.msra.mxu0 %v2951_v11  ;;  %v2870_v5 = vld [vmem:[#allocation2 + $0x28] sm:$0xf]  ;;  %v4203_v6 = vld [vmem:[#allocation2 + $0x34] sm:$0xf0]  ;;  %v3271_v8 = vor.u32 %v4303_v0, %v3270_v63 }
  0x96   :  { %1891 = vmatpush.bf16.msra.mxu1 %v3079_v12  ;;  %v2998_v7 = vld [vmem:[#allocation2 + $0x128] sm:$0xf]  ;;  %v4235_v9 = vld [vmem:[#allocation2 + $0x134] sm:$0xf0]  ;;  %v2871_v15 = vor.u32 %v4203_v6, %v2870_v5 }
  0x97   :  { %1905 = vmatpush.bf16.msra.mxu2 %v3207_v13  ;;  %v3126_v11 = vld [vmem:[#allocation2 + $0x228] sm:$0xf]  ;;  %v4267_v12 = vld [vmem:[#allocation2 + $0x234] sm:$0xf0]  ;;  %v2999_v19 = vor.u32 %v4235_v9, %v2998_v7 }
  0x98   :  { %1919 = vmatpush.bf16.msra.mxu3 %v3335_v18  ;;  %v3254_v13 = vld [vmem:[#allocation2 + $0x328] sm:$0xf]  ;;  %v4299_v14 = vld [vmem:[#allocation2 + $0x334] sm:$0xf0]  ;;  %v3127_v20 = vor.u32 %v4267_v12, %v3126_v11 }
  0x99   :  { %1878 = vmatpush.bf16.msra.mxu0 %v2935_v24  ;;  %v2854_v16 = vld [vmem:[#allocation2 + $0x8] sm:$0xf]  ;;  %v4199_v18 = vld [vmem:[#allocation2 + $0x14] sm:$0xf0]  ;;  %v3255_v24 = vor.u32 %v4299_v14, %v3254_v13 }
  0x9a   :  { %1892 = vmatpush.bf16.msra.mxu1 %v3063_v25  ;;  %v2982_v21 = vld [vmem:[#allocation2 + $0x108] sm:$0xf]  ;;  %v4231_v22 = vld [vmem:[#allocation2 + $0x114] sm:$0xf0]  ;;  %v2855_v31 = vor.u32 %v4199_v18, %v2854_v16 }
  0x9b   :  { %1906 = vmatpush.bf16.msra.mxu2 %v3191_v26  ;;  %v3110_v23 = vld [vmem:[#allocation2 + $0x208] sm:$0xf]  ;;  %v4263_v25 = vld [vmem:[#allocation2 + $0x214] sm:$0xf0]  ;;  %v2983_v35 = vor.u32 %v4231_v22, %v2982_v21 }
  0x9c   :  { %1920 = vmatpush.bf16.msra.mxu3 %v3319_v30  ;;  %v3238_v26 = vld [vmem:[#allocation2 + $0x308] sm:$0xf]  ;;  %v4295_v27 = vld [vmem:[#allocation2 + $0x314] sm:$0xf0] }
  0x9d   :  { %1879 = vmatpush.bf16.msra.mxu0 %v2919_v36  ;;  %v3478_v28 = vld [vmem:[#allocation2 + $0x4e8] sm:$0xf]  ;;  %v4355_v29 = vld [vmem:[#allocation2 + $0x4f4] sm:$0xf0]  ;;  %v3111_v36 = vor.u32 %v4263_v25, %v3110_v23  ;;  %v3239_v40 = vor.u32 %v4295_v27, %v3238_v26 }
  0x9e   :  { %1893 = vmatpush.bf16.msra.mxu1 %v3047_v37  ;;  %v3606_v30 = vld [vmem:[#allocation2 + $0x5e8] sm:$0xf]  ;;  %v4387_v32 = vld [vmem:[#allocation2 + $0x5f4] sm:$0xf0]  ;;  %v3479_v41 = vor.u32 %v4355_v29, %v3478_v28 }
  0x9f   :  { %1907 = vmatpush.bf16.msra.mxu2 %v3175_v38  ;;  %v3734_v33 = vld [vmem:[#allocation2 + $0x6e8] sm:$0xf]  ;;  %v4419_v34 = vld [vmem:[#allocation2 + $0x6f4] sm:$0xf0]  ;;  %v3607_v42 = vor.u32 %v4387_v32, %v3606_v30 }
  0xa0   :  { %1921 = vmatpush.bf16.msra.mxu3 %v3303_v45  ;;  %v3862_v37 = vld [vmem:[#allocation2 + $0x7e8] sm:$0xf]  ;;  %v4451_v38 = vld [vmem:[#allocation2 + $0x7f4] sm:$0xf0]  ;;  %v3735_v45 = vor.u32 %v4419_v34, %v3734_v33 }
  0xa1   :  { %1880 = vmatpush.bf16.msra.mxu0 %v2903_v52  ;;  %v3462_v46 = vld [vmem:[#allocation2 + $0x4c8] sm:$0xf]  ;;  %v4351_v48 = vld [vmem:[#allocation2 + $0x4d4] sm:$0xf0]  ;;  %v3863_v50 = vor.u32 %v4451_v38, %v3862_v37 }
  0xa2   :  { %1894 = vmatpush.bf16.msra.mxu1 %v3031_v53  ;;  %v3590_v49 = vld [vmem:[#allocation2 + $0x5c8] sm:$0xf]  ;;  %v4383_v51 = vld [vmem:[#allocation2 + $0x5d4] sm:$0xf0]  ;;  %v3463_v56 = vor.u32 %v4351_v48, %v3462_v46 }
  0xa3   :  { %1908 = vmatpush.bf16.msra.mxu2 %v3159_v54  ;;  %v3718_v52 = vld [vmem:[#allocation2 + $0x6c8] sm:$0xf]  ;;  %v4415_v53 = vld [vmem:[#allocation2 + $0x6d4] sm:$0xf0]  ;;  %v3591_v57 = vor.u32 %v4383_v51, %v3590_v49 }
  0xa4   :  { %1922 = vmatpush.bf16.msra.mxu3 %v3287_v59  ;;  %v3846_v54 = vld [vmem:[#allocation2 + $0x7c8] sm:$0xf]  ;;  %v4447_v55 = vld [vmem:[#allocation2 + $0x7d4] sm:$0xf0]  ;;  %v3719_v59 = vor.u32 %v4415_v53, %v3718_v52 }
  0xa5   :  { %1881 = vmatpush.bf16.msra.mxu0 %v2887_v2  ;;  %v3446_v60 = vld [vmem:[#allocation2 + $0x4a8] sm:$0xf]  ;;  %v4347_v61 = vld [vmem:[#allocation2 + $0x4b4] sm:$0xf0]  ;;  %v3847_v63 = vor.u32 %v4447_v55, %v3846_v54 }
  0xa6   :  { %1895 = vmatpush.bf16.msra.mxu1 %v3015_v3  ;;  %v3574_v62 = vld [vmem:[#allocation2 + $0x5a8] sm:$0xf]  ;;  %v4379_v0 = vld [vmem:[#allocation2 + $0x5b4] sm:$0xf0]  ;;  %v3447_v6 = vor.u32 %v4347_v61, %v3446_v60 }
  0xa7   :  { %1909 = vmatpush.bf16.msra.mxu2 %v3143_v4  ;;  %v3702_v2 = vld [vmem:[#allocation2 + $0x6a8] sm:$0xf]  ;;  %v4411_v3 = vld [vmem:[#allocation2 + $0x6b4] sm:$0xf0]  ;;  %v3575_v7 = vor.u32 %v4379_v0, %v3574_v62 }
  0xa8   :  { %1923 = vmatpush.bf16.msra.mxu3 %v3271_v8  ;;  %v3830_v4 = vld [vmem:[#allocation2 + $0x7a8] sm:$0xf]  ;;  %v4443_v5 = vld [vmem:[#allocation2 + $0x7b4] sm:$0xf0]  ;;  %v3703_v8 = vor.u32 %v4411_v3, %v3702_v2 }
  0xa9   :  { %1882 = vmatpush.bf16.msra.mxu0 %v2871_v15  ;;  %v3430_v9 = vld [vmem:[#allocation2 + $0x488] sm:$0xf]  ;;  %v4343_v11 = vld [vmem:[#allocation2 + $0x494] sm:$0xf0]  ;;  %v3831_v13 = vor.u32 %v4443_v5, %v3830_v4 }
  0xaa   :  { %1896 = vmatpush.bf16.msra.mxu1 %v2999_v19  ;;  %v3558_v12 = vld [vmem:[#allocation2 + $0x588] sm:$0xf]  ;;  %v4375_v14 = vld [vmem:[#allocation2 + $0x594] sm:$0xf0] }
  0xab   :  { %1910 = vmatpush.bf16.msra.mxu2 %v3127_v20  ;;  %v3686_v15 = vld [vmem:[#allocation2 + $0x688] sm:$0xf]  ;;  %v4407_v16 = vld [vmem:[#allocation2 + $0x694] sm:$0xf0]  ;;  %v3431_v20 = vor.u32 %v4343_v11, %v3430_v9  ;;  %v3559_v21 = vor.u32 %v4375_v14, %v3558_v12  ;;  %v4225_v11 = vld [vmem:[#allocation2 + $0xec] sm:$0xf] }
  0xac   :  { %1924 = vmatpush.bf16.msra.mxu3 %v3255_v24  ;;  %v3814_v18 = vld [vmem:[#allocation2 + $0x788] sm:$0xf]  ;;  %v4439_v19 = vld [vmem:[#allocation2 + $0x794] sm:$0xf0]  ;;  %v3687_v22 = vor.u32 %v4407_v16, %v3686_v15  ;;  %v2968_v12 = vld [vmem:[#allocation2 + $0xf8] sm:$0xf0] }
  0xad   :  { %1883 = vmatpush.bf16.msra.mxu0 %v2855_v31  ;;  %v3414_v23 = vld [vmem:[#allocation2 + $0x468] sm:$0xf]  ;;  %v4339_v24 = vld [vmem:[#allocation2 + $0x474] sm:$0xf0]  ;;  %v3815_v26 = vor.u32 %v4439_v19, %v3814_v18  ;;  %v3096_v15 = vld [vmem:[#allocation2 + $0x1f8] sm:$0xf0] }
  0xae   :  { %1897 = vmatpush.bf16.msra.mxu1 %v2983_v35  ;;  %v3542_v25 = vld [vmem:[#allocation2 + $0x568] sm:$0xf]  ;;  %v4371_v27 = vld [vmem:[#allocation2 + $0x574] sm:$0xf0]  ;;  %v3415_v32 = vor.u32 %v4339_v24, %v3414_v23  ;;  %v4289_v16 = vld [vmem:[#allocation2 + $0x2ec] sm:$0xf]  ;;  %v2971_v24 = vor.u32 %v4225_v11, %v2968_v12 }
  0xaf   :  { %1911 = vmatpush.bf16.msra.mxu2 %v3111_v36  ;;  %v3670_v28 = vld [vmem:[#allocation2 + $0x668] sm:$0xf]  ;;  %v4403_v29 = vld [vmem:[#allocation2 + $0x674] sm:$0xf0]  ;;  %v3543_v33 = vor.u32 %v4371_v27, %v3542_v25  ;;  %v3224_v18 = vld [vmem:[#allocation2 + $0x2f8] sm:$0xf0] }
  0xb0   :  { %1925 = vmatpush.bf16.msra.mxu3 %v3239_v40  ;;  %1884 = vmatmul.bf16.vlgmr.msra.gmra.mxu0 %v4652_v58  ;;  %v3798_v30 = vld [vmem:[#allocation2 + $0x768] sm:$0xf]  ;;  %v4435_v31 = vld [vmem:[#allocation2 + $0x774] sm:$0xf0]  ;;  %v3671_v34 = vor.u32 %v4403_v29, %v3670_v28  ;;  %v4221_v27 = vld [vmem:[#allocation2 + $0xcc] sm:$0xf] }
  0xb1   :  { %1932 = vmatpush.bf16.msrb.mxu0 %v3479_v41  ;;  %1898 = vmatmul.bf16.vlgmr.msra.gmra.mxu1 %v4670_v10  ;;  %v3398_v35 = vld [vmem:[#allocation2 + $0x448] sm:$0xf]  ;;  %v4335_v36 = vld [vmem:[#allocation2 + $0x454] sm:$0xf0]  ;;  %v3799_v38 = vor.u32 %v4435_v31, %v3798_v30  ;;  %v2952_v28 = vld [vmem:[#allocation2 + $0xd8] sm:$0xf0] }
  0xb2   :  { %1946 = vmatpush.bf16.msrb.mxu1 %v3607_v42  ;;  %1912 = vmatmul.bf16.vlgmr.msra.gmra.mxu2 %v4657_v1  ;;  %v3526_v37 = vld [vmem:[#allocation2 + $0x548] sm:$0xf]  ;;  %v4367_v40 = vld [vmem:[#allocation2 + $0x554] sm:$0xf0]  ;;  %v3399_v48 = vor.u32 %v4335_v36, %v3398_v35  ;;  %v4253_v29 = vld [vmem:[#allocation2 + $0x1cc] sm:$0xf]  ;;  %v2955_v36 = vor.u32 %v4221_v27, %v2952_v28 }
  0xb3   :  { %1960 = vmatpush.bf16.msrb.mxu2 %v3735_v45  ;;  %1926 = vmatmul.bf16.vlgmr.msra.gmra.mxu3 %v4675_v17  ;;  %v3654_v41 = vld [vmem:[#allocation2 + $0x648] sm:$0xf]  ;;  %v4399_v42 = vld [vmem:[#allocation2 + $0x654] sm:$0xf0]  ;;  %v3527_v49 = vor.u32 %v4367_v40, %v3526_v37  ;;  %v3080_v31 = vld [vmem:[#allocation2 + $0x1d8] sm:$0xf0] }
  0xb4   :  { %1974 = vmatpush.bf16.msrb.mxu3 %v3863_v50  ;;  %v3782_v45 = vld [vmem:[#allocation2 + $0x748] sm:$0xf]  ;;  %v4431_v46 = vld [vmem:[#allocation2 + $0x754] sm:$0xf0]  ;;  %v3655_v50 = vor.u32 %v4399_v42, %v3654_v41  ;;  %v3336_v35 = vld [vmem:[#allocation2 + $0x3d8] sm:$0xf0]  ;;  %v3083_v37 = vor.u32 %v4253_v29, %v3080_v31 }
  0xb5   :  { %1933 = vmatpush.bf16.msrb.mxu0 %v3463_v56  ;;  %v3382_v51 = vld [vmem:[#allocation2 + $0x428] sm:$0xf]  ;;  %v4331_v52 = vld [vmem:[#allocation2 + $0x434] sm:$0xf0]  ;;  %v3783_v54 = vor.u32 %v4431_v46, %v3782_v45  ;;  %v4217_v40 = vld [vmem:[#allocation2 + $0xac] sm:$0xf] }
  0xb6   :  { %1947 = vmatpush.bf16.msrb.mxu1 %v3591_v57  ;;  %v3510_v53 = vld [vmem:[#allocation2 + $0x528] sm:$0xf]  ;;  %v4363_v55 = vld [vmem:[#allocation2 + $0x534] sm:$0xf0]  ;;  %v3383_v61 = vor.u32 %v4331_v52, %v3382_v51  ;;  %v2936_v41 = vld [vmem:[#allocation2 + $0xb8] sm:$0xf0] }
  0xb7   :  { %1961 = vmatpush.bf16.msrb.mxu2 %v3719_v59  ;;  %v3638_v56 = vld [vmem:[#allocation2 + $0x628] sm:$0xf]  ;;  %v4395_v57 = vld [vmem:[#allocation2 + $0x634] sm:$0xf0]  ;;  %v3511_v0 = vor.u32 %v4363_v55, %v3510_v53  ;;  %v4249_v42 = vld [vmem:[#allocation2 + $0x1ac] sm:$0xf]  ;;  %v2939_v52 = vor.u32 %v4217_v40, %v2936_v41 }
  0xb8   :  { %1975 = vmatpush.bf16.msrb.mxu3 %v3847_v63  ;;  %v3766_v59 = vld [vmem:[#allocation2 + $0x728] sm:$0xf]  ;;  %v4427_v60 = vld [vmem:[#allocation2 + $0x734] sm:$0xf0]  ;;  %v3639_v2 = vor.u32 %v4395_v57, %v3638_v56  ;;  %v3064_v46 = vld [vmem:[#allocation2 + $0x1b8] sm:$0xf0] }
  0xb9   :  { %1934 = vmatpush.bf16.msrb.mxu0 %v3447_v6  ;;  %v3366_v62 = vld [vmem:[#allocation2 + $0x408] sm:$0xf]  ;;  %v4327_v63 = vld [vmem:[#allocation2 + $0x414] sm:$0xf0]  ;;  %v3767_v6 = vor.u32 %v4427_v60, %v3766_v59  ;;  %v3320_v51 = vld [vmem:[#allocation2 + $0x3b8] sm:$0xf0]  ;;  %v3067_v53 = vor.u32 %v4249_v42, %v3064_v46 }
  0xba   :  { %1948 = vmatpush.bf16.msrb.mxu1 %v3575_v7  ;;  %v3494_v3 = vld [vmem:[#allocation2 + $0x508] sm:$0xf]  ;;  %v4359_v4 = vld [vmem:[#allocation2 + $0x514] sm:$0xf0]  ;;  %v3367_v14 = vor.u32 %v4327_v63, %v3366_v62  ;;  %v4213_v55 = vld [vmem:[#allocation2 + $0x8c] sm:$0xf] }
  0xbb   :  { %1962 = vmatpush.bf16.msrb.mxu2 %v3703_v8  ;;  %v3622_v5 = vld [vmem:[#allocation2 + $0x608] sm:$0xf]  ;;  %v4391_v7 = vld [vmem:[#allocation2 + $0x614] sm:$0xf0]  ;;  %v3495_v19 = vor.u32 %v4359_v4, %v3494_v3  ;;  %v2920_v56 = vld [vmem:[#allocation2 + $0x98] sm:$0xf0]  ;;  %v4731_v3 = vpop.f32.mrf.mxu0 }
  0xbc   :  { %1976 = vmatpush.bf16.msrb.mxu3 %v3831_v13  ;;  %v3750_v8 = vld [vmem:[#allocation2 + $0x708] sm:$0xf]  ;;  %v4423_v9 = vld [vmem:[#allocation2 + $0x714] sm:$0xf0]  ;;  %v4257_v13 = vld [vmem:[#allocation2 + $0x1ec] sm:$0xf] }
  0xbd   :  { %1935 = vmatpush.bf16.msrb.mxu0 %v3431_v20  ;;  %v3623_v20 = vor.u32 %v4391_v7, %v3622_v5  ;;  %v3751_v23 = vor.u32 %v4423_v9, %v3750_v8  ;;  %v3099_v25 = vor.u32 %v4257_v13, %v3096_v15  ;;  %v4245_v57 = vld [vmem:[#allocation2 + $0x18c] sm:$0xf]  ;;  %v3048_v60 = vld [vmem:[#allocation2 + $0x198] sm:$0xf0]  ;;  %v4733_v9 = vpop.f32.mrf.mxu1 }
  0xbe   :  { %1949 = vmatpush.bf16.msrb.mxu1 %v3559_v21  ;;  %v4321_v21 = vld [vmem:[#allocation2 + $0x3ec] sm:$0xf]  ;;  %v3176_v62 = vld [vmem:[#allocation2 + $0x298] sm:$0xf0]  ;;  %v3051_v4 = vor.u32 %v4245_v57, %v3048_v60 }
  0xbf   :  { %1963 = vmatpush.bf16.msrb.mxu2 %v3687_v22  ;;  %v3352_v22 = vld [vmem:[#allocation2 + $0x3f8] sm:$0xf0]  ;;  %v4309_v63 = vld [vmem:[#allocation2 + $0x38c] sm:$0xf] }
  0xc0   :  { %1977 = vmatpush.bf16.msrb.mxu3 %v3815_v26  ;;  %v3227_v26 = vor.u32 %v4289_v16, %v3224_v18  ;;  %v3355_v30 = vor.u32 %v4321_v21, %v3352_v22  ;;  %v2904_v7 = vld [vmem:[#allocation2 + $0x78] sm:$0xf0]  ;;  %v4241_v8 = vld [vmem:[#allocation2 + $0x16c] sm:$0xf] }
  0xc1   :  { %1936 = vmatpush.bf16.msrb.mxu0 %v3415_v32  ;;  %v4285_v32 = vld [vmem:[#allocation2 + $0x2cc] sm:$0xf]  ;;  %v3032_v12 = vld [vmem:[#allocation2 + $0x178] sm:$0xf0] }
  0xc2   :  { %1950 = vmatpush.bf16.msrb.mxu1 %v3543_v33  ;;  %v3208_v33 = vld [vmem:[#allocation2 + $0x2d8] sm:$0xf0]  ;;  %v4273_v13 = vld [vmem:[#allocation2 + $0x26c] sm:$0xf] }
  0xc3   :  { %1964 = vmatpush.bf16.msrb.mxu2 %v3671_v34  ;;  %v4317_v34 = vld [vmem:[#allocation2 + $0x3cc] sm:$0xf]  ;;  %v3288_v16 = vld [vmem:[#allocation2 + $0x378] sm:$0xf0] }
  0xc4   :  { %1978 = vmatpush.bf16.msrb.mxu3 %v3799_v38  ;;  %v3211_v38 = vor.u32 %v4285_v32, %v3208_v33  ;;  %v3339_v45 = vor.u32 %v4317_v34, %v3336_v35  ;;  %v4305_v15 = vld [vmem:[#allocation2 + $0x36c] sm:$0xf]  ;;  %v2888_v22 = vld [vmem:[#allocation2 + $0x58] sm:$0xf0]  ;;  %v4737_v32 = vpop.f32.mrf.mxu3 }
  0xc5   :  { %1937 = vmatpush.bf16.msrb.mxu0 %v3399_v48  ;;  %v4281_v48 = vld [vmem:[#allocation2 + $0x2ac] sm:$0xf]  ;;  %v3144_v27 = vld [vmem:[#allocation2 + $0x258] sm:$0xf0] }
  0xc6   :  { %1951 = vmatpush.bf16.msrb.mxu1 %v3527_v49  ;;  %v3192_v49 = vld [vmem:[#allocation2 + $0x2b8] sm:$0xf0]  ;;  %v4205_v21 = vld [vmem:[#allocation2 + $0x4c] sm:$0xf] }
  0xc7   :  { %1965 = vmatpush.bf16.msrb.mxu2 %v3655_v50  ;;  %v4313_v50 = vld [vmem:[#allocation2 + $0x3ac] sm:$0xf]  ;;  %v3272_v29 = vld [vmem:[#allocation2 + $0x358] sm:$0xf0]  ;;  %v2891_v31 = vor.u32 %v4205_v21, %v2888_v22 }
  0xc8   :  { %1979 = vmatpush.bf16.msrb.mxu3 %v3783_v54  ;;  %v3195_v54 = vor.u32 %v4281_v48, %v3192_v49  ;;  %v3323_v59 = vor.u32 %v4313_v50, %v3320_v51  ;;  %v4301_v28 = vld [vmem:[#allocation2 + $0x34c] sm:$0xf]  ;;  %v3000_v40 = vld [vmem:[#allocation2 + $0x138] sm:$0xf0]  ;;  %v4741_v49 = vpop.f32.mrf.mxu1 }
  0xc9   :  { %1938 = vmatpush.bf16.msrb.mxu0 %v3383_v61  ;;  %v4277_v61 = vld [vmem:[#allocation2 + $0x28c] sm:$0xf]  ;;  %v3128_v42 = vld [vmem:[#allocation2 + $0x238] sm:$0xf0] }
  0xca   :  { %1952 = vmatpush.bf16.msrb.mxu1 %v3511_v0  ;;  %v3304_v0 = vld [vmem:[#allocation2 + $0x398] sm:$0xf0]  ;;  %v3179_v5 = vor.u32 %v4277_v61, %v3176_v62  ;;  %v4201_v35 = vld [vmem:[#allocation2 + $0x2c] sm:$0xf] }
  0xcb   :  { %1966 = vmatpush.bf16.msrb.mxu2 %v3639_v2  ;;  %v2923_v2 = vor.u32 %v4213_v55, %v2920_v56  ;;  %v3307_v11 = vor.u32 %v4309_v63, %v3304_v0  ;;  %v4265_v41 = vld [vmem:[#allocation2 + $0x22c] sm:$0xf]  ;;  %v3256_v48 = vld [vmem:[#allocation2 + $0x338] sm:$0xf0] }
  0xcc   :  { %1980 = vmatpush.bf16.msrb.mxu3 %v3767_v6  ;;  %v4209_v6 = vld [vmem:[#allocation2 + $0x6c] sm:$0xf]  ;;  %v2984_v56 = vld [vmem:[#allocation2 + $0x118] sm:$0xf0] }
  0xcd   :  { %1939 = vmatpush.bf16.msrb.mxu0 %v3367_v14  ;;  %v3160_v14 = vld [vmem:[#allocation2 + $0x278] sm:$0xf0]  ;;  %v2907_v18 = vor.u32 %v4209_v6, %v2904_v7  ;;  %v4297_v46 = vld [vmem:[#allocation2 + $0x32c] sm:$0xf] }
  0xce   :  { %1953 = vmatpush.bf16.msrb.mxu1 %v3495_v19  ;;  %v3035_v19 = vor.u32 %v4241_v8, %v3032_v12  ;;  %v4197_v51 = vld [vmem:[#allocation2 + $0xc] sm:$0xf]  ;;  %v3112_v60 = vld [vmem:[#allocation2 + $0x218] sm:$0xf0] }
  0xcf   :  { %1967 = vmatpush.bf16.msrb.mxu2 %v3623_v20  ;;  %v3163_v20 = vor.u32 %v4273_v13, %v3160_v14  ;;  %v4229_v55 = vld [vmem:[#allocation2 + $0x10c] sm:$0xf]  ;;  %v3240_v62 = vld [vmem:[#allocation2 + $0x318] sm:$0xf0] }
  0xd0   :  { %1981 = vmatpush.bf16.msrb.mxu3 %v3751_v23  ;;  %1940 = vmatmul.bf16.vlgmr.msrb.gmra.mxu0 %v4703_v39  ;;  %v4237_v23 = vld [vmem:[#allocation2 + $0x14c] sm:$0xf]  ;;  %v3480_v0 = vld [vmem:[#allocation2 + $0x4f8] sm:$0xf0]  ;;  %v2987_v8 = vor.u32 %v4229_v55, %v2984_v56 }
  0xd1   :  { %1988 = vmatpush.bf16.msra.mxu0 %v2971_v24  ;;  %1954 = vmatmul.bf16.vlgmr.msrb.gmra.mxu1 %v4707_v44  ;;  %v3291_v24 = vor.u32 %v4305_v15, %v3288_v16  ;;  %v4261_v57 = vld [vmem:[#allocation2 + $0x20c] sm:$0xf]  ;;  %v3736_v7 = vld [vmem:[#allocation2 + $0x6f8] sm:$0xf0] }
  0xd2   :  { %2002 = vmatpush.bf16.msra.mxu1 %v3099_v25  ;;  %1968 = vmatmul.bf16.vlgmr.msrb.gmra.mxu2 %v4705_v43  ;;  %v3016_v25 = vld [vmem:[#allocation2 + $0x158] sm:$0xf0]  ;;  %v4293_v61 = vld [vmem:[#allocation2 + $0x30c] sm:$0xf] }
  0xd3   :  { %2016 = vmatpush.bf16.msra.mxu2 %v3227_v26  ;;  %1982 = vmatmul.bf16.vlgmr.msrb.gmra.mxu3 %v4709_v47  ;;  %v4269_v26 = vld [vmem:[#allocation2 + $0x24c] sm:$0xf]  ;;  %v3019_v33 = vor.u32 %v4237_v23, %v3016_v25  ;;  %v3864_v13 = vld [vmem:[#allocation2 + $0x7f8] sm:$0xf0]  ;;  %v3243_v15 = vor.u32 %v4293_v61, %v3240_v62 }
  0xd4   :  { %2030 = vmatpush.bf16.msra.mxu3 %v3355_v30  ;;  %v4735_v30 = vpop.f32.mrf.mxu2  ;;  %v3147_v34 = vor.u32 %v4269_v26, %v3144_v27  ;;  %v4353_v63 = vld [vmem:[#allocation2 + $0x4ec] sm:$0xf]  ;;  %v3464_v22 = vld [vmem:[#allocation2 + $0x4d8] sm:$0xf0] }
  0xd5   :  { %1989 = vmatpush.bf16.msra.mxu0 %v2955_v36  ;;  %v2872_v36 = vld [vmem:[#allocation2 + $0x38] sm:$0xf0]  ;;  %v4417_v6 = vld [vmem:[#allocation2 + $0x6ec] sm:$0xf]  ;;  %v3483_v16 = vor.u32 %v4353_v63, %v3480_v0 }
  0xd6   :  { %2003 = vmatpush.bf16.msra.mxu1 %v3083_v37  ;;  %v4233_v37 = vld [vmem:[#allocation2 + $0x12c] sm:$0xf]  ;;  %v2875_v50 = vor.u32 %v4201_v35, %v2872_v36  ;;  %v3592_v25 = vld [vmem:[#allocation2 + $0x5d8] sm:$0xf0] }
  0xd7   :  { %2017 = vmatpush.bf16.msra.mxu2 %v3211_v38  ;;  %v3275_v38 = vor.u32 %v4301_v28, %v3272_v29  ;;  %v4449_v12 = vld [vmem:[#allocation2 + $0x7ec] sm:$0xf]  ;;  %v3720_v27 = vld [vmem:[#allocation2 + $0x6d8] sm:$0xf0] }
  0xd8   :  { %2031 = vmatpush.bf16.msra.mxu3 %v3339_v45  ;;  %v4739_v45 = vpop.f32.mrf.mxu0  ;;  %v4349_v21 = vld [vmem:[#allocation2 + $0x4cc] sm:$0xf]  ;;  %v3432_v56 = vld [vmem:[#allocation2 + $0x498] sm:$0xf0] }
  0xd9   :  { %1990 = vmatpush.bf16.msra.mxu0 %v2939_v52  ;;  %v2856_v52 = vld [vmem:[#allocation2 + $0x18] sm:$0xf0]  ;;  %v4381_v23 = vld [vmem:[#allocation2 + $0x5cc] sm:$0xf] }
  0xda   :  { %2004 = vmatpush.bf16.msra.mxu1 %v3067_v53  ;;  %v3003_v53 = vor.u32 %v4233_v37, %v3000_v40  ;;  %v4413_v26 = vld [vmem:[#allocation2 + $0x6cc] sm:$0xf]  ;;  %v3595_v35 = vor.u32 %v4381_v23, %v3592_v25  ;;  %v3816_v63 = vld [vmem:[#allocation2 + $0x798] sm:$0xf0] }
  0xdb   :  { %2018 = vmatpush.bf16.msra.mxu2 %v3195_v54  ;;  %v3131_v54 = vor.u32 %v4265_v41, %v3128_v42  ;;  %v4445_v29 = vld [vmem:[#allocation2 + $0x7cc] sm:$0xf]  ;;  %v3723_v36 = vor.u32 %v4413_v26, %v3720_v27  ;;  %v3576_v42 = vld [vmem:[#allocation2 + $0x5b8] sm:$0xf0] }
  0xdc   :  { %2032 = vmatpush.bf16.msra.mxu3 %v3323_v59  ;;  %v3259_v59 = vor.u32 %v4297_v46, %v3256_v48  ;;  %v4743_v14 = vpop.f32.mrf.mxu2  ;;  %v4345_v37 = vld [vmem:[#allocation2 + $0x4ac] sm:$0xf]  ;;  %v3704_v48 = vld [vmem:[#allocation2 + $0x6b8] sm:$0xf0] }
  0xdd   :  { %1991 = vmatpush.bf16.msra.mxu0 %v2923_v2  ;;  %v4385_v2 = vld [vmem:[#allocation2 + $0x5ec] sm:$0xf]  ;;  %v3400_v25 = vld [vmem:[#allocation2 + $0x458] sm:$0xf0] }
  0xde   :  { %2005 = vmatpush.bf16.msra.mxu1 %v3051_v4  ;;  %v2859_v4 = vor.u32 %v4197_v51, %v2856_v52  ;;  %v4377_v40 = vld [vmem:[#allocation2 + $0x5ac] sm:$0xf]  ;;  %v3832_v51 = vld [vmem:[#allocation2 + $0x7b8] sm:$0xf0] }
  0xdf   :  { %2019 = vmatpush.bf16.msra.mxu2 %v3179_v5  ;;  %v3608_v5 = vld [vmem:[#allocation2 + $0x5f8] sm:$0xf0]  ;;  %v4409_v46 = vld [vmem:[#allocation2 + $0x6ac] sm:$0xf] }
  0xe0   :  { %2033 = vmatpush.bf16.msra.mxu3 %v3307_v11  ;;  %v3115_v11 = vor.u32 %v4261_v57, %v3112_v60  ;;  %v4747_v28 = vpop.f32.mrf.mxu0  ;;  %v4341_v55 = vld [vmem:[#allocation2 + $0x48c] sm:$0xf]  ;;  %v3560_v60 = vld [vmem:[#allocation2 + $0x598] sm:$0xf0] }
  0xe1   :  { %1992 = vmatpush.bf16.msra.mxu0 %v2907_v18  ;;  %v4745_v18 = vpop.f32.mrf.mxu3  ;;  %v4405_v61 = vld [vmem:[#allocation2 + $0x68c] sm:$0xf] }
  0xe2   :  { %2006 = vmatpush.bf16.msra.mxu1 %v3035_v19  ;;  %v3611_v19 = vor.u32 %v4385_v2, %v3608_v5  ;;  %v4337_v5 = vld [vmem:[#allocation2 + $0x46c] sm:$0xf] }
  0xe3   :  { %2020 = vmatpush.bf16.msra.mxu2 %v3163_v20  ;;  %v3739_v20 = vor.u32 %v4417_v6, %v3736_v7  ;;  %v3416_v6 = vld [vmem:[#allocation2 + $0x478] sm:$0xf0]  ;;  %v4369_v7 = vld [vmem:[#allocation2 + $0x56c] sm:$0xf] }
  0xe4   :  { %2034 = vmatpush.bf16.msra.mxu3 %v3291_v24  ;;  %v3867_v24 = vor.u32 %v4449_v12, %v3864_v13  ;;  %v4755_v57 = vpop.f32.mrf.mxu2  ;;  %v3544_v12 = vld [vmem:[#allocation2 + $0x578] sm:$0xf0]  ;;  %v4401_v13 = vld [vmem:[#allocation2 + $0x66c] sm:$0xf] }
  0xe5   :  { %1993 = vmatpush.bf16.msra.mxu0 %v2891_v31  ;;  %v3848_v31 = vld [vmem:[#allocation2 + $0x7d8] sm:$0xf0]  ;;  %v4365_v26 = vld [vmem:[#allocation2 + $0x54c] sm:$0xf] }
  0xe6   :  { %2007 = vmatpush.bf16.msra.mxu1 %v3019_v33  ;;  %v4749_v33 = vpop.f32.mrf.mxu1  ;;  %v3851_v41 = vor.u32 %v4445_v29, %v3848_v31  ;;  %v3528_v29 = vld [vmem:[#allocation2 + $0x558] sm:$0xf0]  ;;  %v4397_v31 = vld [vmem:[#allocation2 + $0x64c] sm:$0xf] }
  0xe7   :  { %2021 = vmatpush.bf16.msra.mxu2 %v3147_v34  ;;  %v3467_v34 = vor.u32 %v4349_v21, %v3464_v22  ;;  %v3419_v21 = vor.u32 %v4337_v5, %v3416_v6  ;;  %v3547_v22 = vor.u32 %v4369_v7, %v3544_v12  ;;  %v4357_v5 = vld [vmem:[#allocation2 + $0x50c] sm:$0xf]  ;;  %v3496_v6 = vld [vmem:[#allocation2 + $0x518] sm:$0xf0] }
  0xe8   :  { %2035 = vmatpush.bf16.msra.mxu3 %v3275_v38  ;;  %v3448_v38 = vld [vmem:[#allocation2 + $0x4b8] sm:$0xf0]  ;;  %v4759_v0 = vpop.f32.mrf.mxu0  ;;  %v4389_v12 = vld [vmem:[#allocation2 + $0x60c] sm:$0xf] }
  0xe9   :  { %1994 = vmatpush.bf16.msra.mxu0 %v2875_v50  ;;  %v4441_v50 = vld [vmem:[#allocation2 + $0x7ac] sm:$0xf]  ;;  %v3451_v52 = vor.u32 %v4345_v37, %v3448_v38  ;;  %v4757_v62 = vpop.f32.mrf.mxu3 }
  0xea   :  { %2008 = vmatpush.bf16.msra.mxu1 %v3003_v53  ;;  %v3579_v53 = vor.u32 %v4377_v40, %v3576_v42  ;;  %v3531_v42 = vor.u32 %v4365_v26, %v3528_v29 }
  0xeb   :  { %2022 = vmatpush.bf16.msra.mxu2 %v3131_v54  ;;  %v3707_v54 = vor.u32 %v4409_v46, %v3704_v48 }
  0xec   :  { %2036 = vmatpush.bf16.msra.mxu3 %v3259_v59  ;;  %v3835_v59 = vor.u32 %v4441_v50, %v3832_v51  ;;  %v4769_v38 = vpop.f32.mrf.mxu2  ;;  %v4329_v50 = vld [vmem:[#allocation2 + $0x42c] sm:$0xf]  ;;  %v3384_v51 = vld [vmem:[#allocation2 + $0x438] sm:$0xf0] }
  0xed   :  { %1995 = vmatpush.bf16.msra.mxu0 %v2859_v4 }
  0xee   :  { %2009 = vmatpush.bf16.msra.mxu1 %v2987_v8  ;;  %v4761_v8 = vpop.f32.mrf.mxu1 }
  0xef   :  { %2023 = vmatpush.bf16.msra.mxu2 %v3115_v11 }
  0xf0   :  { %2037 = vmatpush.bf16.msra.mxu3 %v3243_v15  ;;  %1996 = vmatmul.bf16.vlgmr.msra.gmra.mxu0 %v4652_v58  ;;  %v3688_v58 = vld [vmem:[#allocation2 + $0x698] sm:$0xf0]  ;;  %v1773_v48 = vpop.f32.mrf.mxu0 }
  0xf1   :  { %2044 = vmatpush.bf16.msrb.mxu0 %v3483_v16  ;;  %2010 = vmatmul.bf16.vlgmr.msra.gmra.mxu1 %v4670_v10  ;;  %v3435_v10 = vor.u32 %v4341_v55, %v3432_v56  ;;  %v3691_v4 = vor.u32 %v4405_v61, %v3688_v58  ;;  %v3672_v15 = vld [vmem:[#allocation2 + $0x678] sm:$0xf0]  ;;  %v4433_v16 = vld [vmem:[#allocation2 + $0x76c] sm:$0xf] }
  0xf2   :  { %2058 = vmatpush.bf16.msrb.mxu1 %v3611_v19  ;;  %2024 = vmatmul.bf16.vlgmr.msra.gmra.mxu2 %v4657_v1  ;;  %v4373_v1 = vld [vmem:[#allocation2 + $0x58c] sm:$0xf]  ;;  %v3800_v19 = vld [vmem:[#allocation2 + $0x778] sm:$0xf0]  ;;  %v3675_v23 = vor.u32 %v4401_v13, %v3672_v15 }
  0xf3   :  { %2072 = vmatpush.bf16.msrb.mxu2 %v3739_v20  ;;  %2038 = vmatmul.bf16.vlgmr.msra.gmra.mxu3 %v4675_v17  ;;  %v4437_v17 = vld [vmem:[#allocation2 + $0x78c] sm:$0xf]  ;;  %v3563_v2 = vor.u32 %v4373_v1, %v3560_v60  ;;  %v4766_v20 = vld [vmem:[%s4868_s2] sm:$0xf]  ;;  %v3803_v27 = vor.u32 %v4433_v16, %v3800_v19  ;;  %v3512_v55 = vld [vmem:[#allocation2 + $0x538] sm:$0xf0] }
  0xf4   :  { %2086 = vmatpush.bf16.msrb.mxu3 %v3867_v24  ;;  %v3819_v11 = vor.u32 %v4437_v17, %v3816_v63  ;;  %v4333_v24 = vld [vmem:[#allocation2 + $0x44c] sm:$0xf]  ;;  %v324_v37 = vperm.slane %v4766_v20, 0  ;;  %v3640_v1 = vld [vmem:[#allocation2 + $0x638] sm:$0xf0]  ;;  %v325_v60 = vperm.slane %v4766_v20, 1  ;;  %v3387_v17 = vor.u32 %v4329_v50, %v3384_v51 }
  0xf5   :  { %2045 = vmatpush.bf16.msrb.mxu0 %v3467_v34  ;;  %v3656_v34 = vld [vmem:[#allocation2 + $0x658] sm:$0xf0]  ;;  %v3403_v40 = vor.u32 %v4333_v24, %v3400_v25  ;;  %v4393_v56 = vld [vmem:[#allocation2 + $0x62c] sm:$0xf]  ;;  %v4483_v24 = vld [vmem:[#allocation4 + $0xf4] sm:$0xf0]  ;;  %v1801_v25 = vpop.f32.mrf.mxu2 }
  0xf6   :  { %2059 = vmatpush.bf16.msrb.mxu1 %v3595_v35  ;;  %v4429_v35 = vld [vmem:[#allocation2 + $0x74c] sm:$0xf]  ;;  %v3659_v46 = vor.u32 %v4397_v31, %v3656_v34  ;;  %v3768_v58 = vld [vmem:[#allocation2 + $0x738] sm:$0xf0]  ;;  %v1774_v16 = vadd.f32 %v1773_v48, %v325_v60  ;;  %v3982_v48 = vld [vmem:[#allocation4 + $0xe0] sm:$0xf] }
  0xf7   :  { %2073 = vmatpush.bf16.msrb.mxu2 %v3723_v36  ;;  %v3784_v36 = vld [vmem:[#allocation2 + $0x758] sm:$0xf0]  ;;  %v4425_v61 = vld [vmem:[#allocation2 + $0x72c] sm:$0xf]  ;;  %v4481_v50 = vld [vmem:[#allocation4 + $0xe4] sm:$0xf0] }
  0xf8   :  { %2087 = vmatpush.bf16.msrb.mxu3 %v3851_v41  ;;  %v4771_v41 = vpop.f32.mrf.mxu3  ;;  %v4325_v63 = vld [vmem:[#allocation2 + $0x40c] sm:$0xf]  ;;  %v3624_v13 = vld [vmem:[#allocation2 + $0x618] sm:$0xf0] }
  0xf9   :  { %2046 = vmatpush.bf16.msrb.mxu0 %v3451_v52  ;;  %v4361_v52 = vld [vmem:[#allocation2 + $0x52c] sm:$0xf]  ;;  %v3752_v19 = vld [vmem:[#allocation2 + $0x718] sm:$0xf0] }
  0xfa   :  { %2060 = vmatpush.bf16.msrb.mxu1 %v3579_v53  ;;  %v1664_v53 = vadd.f32 %v4739_v45, %v324_v37  ;;  %v3368_v45 = vld [vmem:[#allocation2 + $0x418] sm:$0xf0]  ;;  %v4421_v15 = vld [vmem:[#allocation2 + $0x70c] sm:$0xf] }
  0xfb   :  { %2074 = vmatpush.bf16.msrb.mxu2 %v3707_v54  ;;  %v3787_v54 = vor.u32 %v4429_v35, %v3784_v36  ;;  %v3755_v34 = vor.u32 %v4421_v15, %v3752_v19  ;;  %v3958_v15 = vld [vmem:[#allocation4 + $0xb0] sm:$0xf] }
  0xfc   :  { %2088 = vmatpush.bf16.msrb.mxu3 %v3835_v59  ;;  %v1787_v59 = vpop.f32.mrf.mxu1  ;;  %v1678_v7 = vadd.f32 %v4741_v49, %v1664_v53  ;;  %v3627_v49 = vor.u32 %v4389_v12, %v3624_v13  ;;  %v3894_v12 = vld [vmem:[#allocation4 + $0x30] sm:$0xf]  ;;  %v4459_v13 = vld [vmem:[#allocation4 + $0x34] sm:$0xf0] }
  0xfd   :  { %2047 = vmatpush.bf16.msrb.mxu0 %v3435_v10  ;;  %v1662_v10 = vadd.f32 %v4731_v3, %v324_v37  ;;  %v3371_v3 = vor.u32 %v4325_v63, %v3368_v45  ;;  %v1788_v36 = vadd.f32 %v1787_v59, %v1774_v16  ;;  %v4479_v59 = vld [vmem:[#allocation4 + $0xd4] sm:$0xf0] }
  0xfe   :  { %2061 = vmatpush.bf16.msrb.mxu1 %v3563_v2  ;;  %v3515_v2 = vor.u32 %v4361_v52, %v3512_v55  ;;  %v1692_v31 = vadd.f32 %v4743_v14, %v1678_v7  ;;  %v3983_v55 = vor.u32 %v4481_v50, %v3982_v48  ;;  %v4475_v16 = vld [vmem:[#allocation4 + $0xb4] sm:$0xf0]  ;;  %v3942_v50 = vld [vmem:[#allocation4 + $0x90] sm:$0xf] }
  0xff   :  { %2075 = vmatpush.bf16.msrb.mxu2 %v3691_v4  ;;  %v3643_v4 = vor.u32 %v4393_v56, %v3640_v1  ;;  %v1676_v26 = vadd.f32 %v4733_v9, %v1662_v10  ;;  %v1802_v53 = vadd.f32 %v1801_v25, %v1788_v36  ;;  %v3910_v56 = vld [vmem:[#allocation4 + $0x50] sm:$0xf]  ;;  %v4463_v1 = vld [vmem:[#allocation4 + $0x54] sm:$0xf0]  ;;  %v3950_v25 = vld [vmem:[#allocation4 + $0xa0] sm:$0xf] }
 0x100   :  { %2089 = vmatpush.bf16.msrb.mxu3 %v3819_v11  ;;  %v3771_v11 = vor.u32 %v4425_v61, %v3768_v58  ;;  %v1815_v29 = vpop.f32.mrf.mxu3  ;;  %v1706_v52 = vadd.f32 %v4745_v18, %v1692_v31  ;;  %v3911_v18 = vor.u32 %v4463_v1, %v3910_v56  ;;  %v1803_v58 = vpop.f32.mrf.mxu2  ;;  %v4455_v48 = vld [vmem:[#allocation4 + $0x14] sm:$0xf0]  ;;  %v4453_v56 = vld [vmem:[#allocation4 + $0x4] sm:$0xf0] }
 0x101   :  { %2048 = vmatpush.bf16.msrb.mxu0 %v3419_v21  ;;  %v3926_v21 = vld [vmem:[#allocation4 + $0x70] sm:$0xf]  ;;  %v1690_v9 = vadd.f32 %v4735_v30, %v1676_v26 }
 0x102   :  { %2062 = vmatpush.bf16.msrb.mxu1 %v3547_v22  ;;  %v4467_v22 = vld [vmem:[#allocation4 + $0x74] sm:$0xf0]  ;;  %v3974_v30 = vld [vmem:[#allocation4 + $0xd0] sm:$0xf] }
 0x103   :  { %2076 = vmatpush.bf16.msrb.mxu2 %v3675_v23  ;;  %v3990_v23 = vld [vmem:[#allocation4 + $0xf0] sm:$0xf]  ;;  %v3927_v35 = vor.u32 %v4467_v22, %v3926_v21  ;;  %v1704_v61 = vadd.f32 %v4737_v32, %v1690_v9  ;;  %v3975_v63 = vor.u32 %v4479_v59, %v3974_v30  ;;  %v4471_v9 = vld [vmem:[#allocation4 + $0x94] sm:$0xf0] }
 0x104   :  { %2090 = vmatpush.bf16.msrb.mxu3 %v3803_v27  ;;  %v3499_v27 = vor.u32 %v4357_v5, %v3496_v6  ;;  %v3991_v37 = vor.u32 %v4483_v24, %v3990_v23  ;;  %v1789_v51 = vpop.f32.mrf.mxu1  ;;  %v3959_v23 = vor.u32 %v4475_v16, %v3958_v15  ;;  %v3886_v24 = vld [vmem:[#allocation4 + $0x20] sm:$0xf]  ;;  %v3943_v59 = vor.u32 %v4471_v9, %v3942_v50  ;;  %v3984_v15 = vld [vmem:[#allocation4 + $0xe8] sm:$0xf0]  ;;  %v4489_v50 = vld [vmem:[#allocation4 + $0x124] sm:$0xf0] }
 0x105   :  { %2049 = vmatpush.bf16.msrb.mxu0 %v3403_v40  ;;  %v1775_v40 = vpop.f32.mrf.mxu0  ;;  %v1718_v45 = vadd.f32 %v4747_v28, %v1704_v61  ;;  %v3895_v28 = vor.u32 %v4459_v13, %v3894_v12  ;;  %v3934_v61 = vld [vmem:[#allocation4 + $0x80] sm:$0xf]  ;;  %v4480_v13 = vld [vmem:[#allocation4 + $0xe4] sm:$0xf] }
 0x106   :  { %2063 = vmatpush.bf16.msrb.mxu1 %v3531_v42  ;;  %v3918_v42 = vld [vmem:[#allocation4 + $0x60] sm:$0xf] }
 0x107   :  { %2077 = vmatpush.bf16.msrb.mxu2 %v3659_v46  ;;  %v4465_v46 = vld [vmem:[#allocation4 + $0x64] sm:$0xf0]  ;;  %v1732_v19 = vadd.f32 %v4749_v33, %v1718_v45 }
 0x108   :  { %2091 = vmatpush.bf16.msrb.mxu3 %v3787_v54  ;;  %v3919_v14 = vor.u32 %v4465_v46, %v3918_v42  ;;  %v1776_v54 = vadd.f32 %v1775_v40, %v325_v60  ;;  %v1817_v10 = vpop.f32.mrf.mxu3  ;;  %v3878_v46 = vld [vmem:[#allocation4 + $0x10] sm:$0xf] }
 0x109   :  { %2050 = vmatpush.bf16.msrb.mxu0 %v3387_v17  ;;  %v1720_v17 = vadd.f32 %v4759_v0, %v1706_v52  ;;  %v1746_v31 = vadd.f32 %v4755_v57, %v1732_v19  ;;  %v4046_v52 = vld [vmem:[#allocation4 + $0x160] sm:$0xf] }
 0x10a   :  { %2064 = vmatpush.bf16.msrb.mxu1 %v3515_v2  ;;  %v1790_v60 = vadd.f32 %v1789_v51, %v1776_v54  ;;  %v3902_v2 = vld [vmem:[#allocation4 + $0x40] sm:$0xf]  ;;  %v3879_v54 = vor.u32 %v4455_v48, %v3878_v46  ;;  %v3968_v46 = vld [vmem:[#allocation4 + $0xc8] sm:$0xf0] }
 0x10b   :  { %2078 = vmatpush.bf16.msrb.mxu2 %v3643_v4  ;;  %v3966_v4 = vld [vmem:[#allocation4 + $0xc0] sm:$0xf]  ;;  %v1734_v6 = vadd.f32 %v4761_v8, %v1720_v17  ;;  %v4457_v8 = vld [vmem:[#allocation4 + $0x24] sm:$0xf0]  ;;  %v1760_v57 = vadd.f32 %v4757_v62, %v1746_v31  ;;  %v3912_v31 = vld [vmem:[#allocation4 + $0x58] sm:$0xf0] }
 0x10c   :  { %2092 = vmatpush.bf16.msrb.mxu3 %v3771_v11  ;;  %v1804_v7 = vadd.f32 %v1803_v58, %v1790_v60  ;;  %v3887_v36 = vor.u32 %v4457_v8, %v3886_v24  ;;  %v4466_v58 = vld [vmem:[#allocation4 + $0x74] sm:$0xf]  ;;  %v4038_v60 = vld [vmem:[#allocation4 + $0x150] sm:$0xf]  ;;  %v4014_v48 = vld [vmem:[#allocation4 + $0x120] sm:$0xf] }
 0x10d   :  { %2051 = vmatpush.bf16.msrb.mxu0 %v3371_v3  ;;  %v1829_v5 = vpop.f32.mrf.mxu0  ;;  %v1748_v21 = vadd.f32 %v4769_v38, %v1734_v6  ;;  %v2108_v62 = vmul.f32 0.01, %v1760_v57  ;;  %vm2100_vm1 = vcmp.ge.f32.partialorder %v1760_v57, 0.0 }
 0x10e   :  { %2065 = vmatpush.bf16.msrb.mxu1 %v3499_v27  ;;  %v1818_v22 = vadd.f32 %v1817_v10, %v1804_v7  ;;  %v4473_v27 = vld [vmem:[#allocation4 + $0xa4] sm:$0xf0] }
 0x10f   :  { %2079 = vmatpush.bf16.msrb.mxu2 %v3627_v49  ;;  %v4054_v49 = vld [vmem:[#allocation4 + $0x170] sm:$0xf]  ;;  %v3951_v42 = vor.u32 %v4473_v27, %v3950_v25  ;;  %v2116_v16 = vsel %vm2100_vm1, %v1760_v57, %v2108_v62  ;;  %v3896_v57 = vld [vmem:[#allocation4 + $0x38] sm:$0xf0] }
 0x110   :  { %2093 = vmatpush.bf16.msrb.mxu3 %v3755_v34  ;;  %2052 = vmatmul.bf16.vlgmr.msrb.gmra.mxu0 %v4703_v39  ;;  %v1816_v39 = vadd.f32 %v1815_v29, %v1802_v53  ;;  %v4499_v29 = vld [vmem:[#allocation4 + $0x174] sm:$0xf0]  ;;  %v1762_v34 = vadd.f32 %v4771_v41, %v1748_v21  ;;  %v4030_v21 = vld [vmem:[#allocation4 + $0x140] sm:$0xf]  ;;  %v4022_v25 = vld [vmem:[#allocation4 + $0x130] sm:$0xf] }
 0x111   :  { %2518 = vmatpush.bf16.msra.mxu0 %v3927_v35  ;;  %2066 = vmatmul.bf16.vlgmr.msrb.gmra.mxu1 %v4707_v44  ;;  %v4461_v44 = vld [vmem:[#allocation4 + $0x44] sm:$0xf0]  ;;  %v4055_v38 = vor.u32 %v4499_v29, %v4054_v49  ;;  %v3987_v49 = vor.u32 %v4480_v13, %v3984_v15  ;;  %v4462_v29 = vld [vmem:[#allocation4 + $0x54] sm:$0xf]  ;;  %v4056_v62 = vld [vmem:[#allocation4 + $0x178] sm:$0xf0] }
 0x112   :  { %2532 = vmatpush.bf16.msra.mxu1 %v3991_v37  ;;  %2080 = vmatmul.bf16.vlgmr.msrb.gmra.mxu2 %v4705_v43  ;;  %v4477_v43 = vld [vmem:[#allocation4 + $0xc4] sm:$0xf0]  ;;  %v3903_v32 = vor.u32 %v4461_v44, %v3902_v2  ;;  %v1830_v0 = vadd.f32 %v1829_v5, %v1816_v39  ;;  %vm2104_vm0 = vcmp.ge.f32.partialorder %v1762_v34, 0.0  ;;  %v2112_v53 = vmul.f32 0.01, %v1762_v34 }
 0x113   :  { %2094 = vmatmul.bf16.vlgmr.msrb.gmra.mxu3 %v4709_v47  ;;  %v1843_v47 = vpop.f32.mrf.mxu1  ;;  %v3967_v11 = vor.u32 %v4477_v43, %v3966_v4  ;;  %2546 = vmatpush.bf16.msra.mxu2 %v4055_v38  ;;  %v3928_v39 = vld [vmem:[#allocation4 + $0x78] sm:$0xf0]  ;;  %v4482_v44 = vld [vmem:[#allocation4 + $0xf4] sm:$0xf]  ;;  %v3915_v38 = vor.u32 %v4462_v29, %v3912_v31  ;;  %v4452_v15 = vld [vmem:[#allocation4 + $0x4] sm:$0xf] }
 0x114   :  { %v1844_v3 = vadd.f32 %v1843_v47, %v1830_v0  ;;  %v3992_v4 = vld [vmem:[#allocation4 + $0xf8] sm:$0xf0]  ;;  %v2120_v45 = vsel %vm2104_vm0, %v1762_v34, %v2112_v53  ;;  %v3931_v7 = vor.u32 %v4466_v58, %v3928_v39  ;;  %v4464_v0 = vld [vmem:[#allocation4 + $0x64] sm:$0xf]  ;;  %v4478_v34 = vld [vmem:[#allocation4 + $0xd4] sm:$0xf] }
 0x115   :  { %2519 = vmatpush.bf16.msra.mxu0 %v3919_v14  ;;  %v1857_v26 = vpop.f32.mrf.mxu2  ;;  %v1831_v33 = vpop.f32.mrf.mxu0  ;;  %v4497_v14 = vld [vmem:[#allocation4 + $0x164] sm:$0xf0]  ;;  %v3995_v12 = vor.u32 %v4482_v44, %v3992_v4  ;;  %v4487_v53 = vld [vmem:[#allocation4 + $0x114] sm:$0xf0]  ;;  %v3952_v58 = vld [vmem:[#allocation4 + $0xa8] sm:$0xf0] }
 0x116   :  { %2533 = vmatpush.bf16.msra.mxu1 %v3983_v55  ;;  %v1871_v35 = vpop.f32.mrf.mxu3  ;;  %v1858_v37 = vadd.f32 %v1857_v26, %v1844_v3  ;;  %v1832_v40 = vadd.f32 %v1831_v33, %v1818_v22  ;;  %v4047_v41 = vor.u32 %v4497_v14, %v4046_v52  ;;  %v3870_v55 = vld [vmem:[#allocation4] sm:$0xf]  ;;  %v4493_v3 = vld [vmem:[#allocation4 + $0x144] sm:$0xf0]  ;;  %v4491_v26 = vld [vmem:[#allocation4 + $0x134] sm:$0xf0] }
 0x117   :  { %v3871_v5 = vor.u32 %v4453_v56, %v3870_v55  ;;  %v4031_v8 = vor.u32 %v4493_v3, %v4030_v21  ;;  %v3976_v33 = vld [vmem:[#allocation4 + $0xd8] sm:$0xf0]  ;;  %v4458_v52 = vld [vmem:[#allocation4 + $0x34] sm:$0xf]  ;;  %v4485_v39 = vld [vmem:[#allocation4 + $0x104] sm:$0xf0] }
 0x118   :  { %v1872_v1 = vadd.f32 %v1871_v35, %v1858_v37  ;;  %2547 = vmatpush.bf16.msra.mxu2 %v4047_v41  ;;  %v4023_v35 = vor.u32 %v4491_v26, %v4022_v25  ;;  %v4460_v37 = vld [vmem:[#allocation4 + $0x44] sm:$0xf]  ;;  %v4006_v41 = vld [vmem:[#allocation4 + $0x110] sm:$0xf]  ;;  %v3960_v55 = vld [vmem:[#allocation4 + $0xb8] sm:$0xf0] }
 0x119   :  { %2520 = vmatpush.bf16.msra.mxu0 %v3911_v18  ;;  %v4469_v18 = vld [vmem:[#allocation4 + $0x84] sm:$0xf0]  ;;  %v4007_v56 = vor.u32 %v4487_v53, %v4006_v41  ;;  %v4454_v4 = vld [vmem:[#allocation4 + $0x14] sm:$0xf]  ;;  %v3936_v21 = vld [vmem:[#allocation4 + $0x88] sm:$0xf0] }
 0x11a   :  { %2534 = vmatpush.bf16.msra.mxu1 %v3975_v63  ;;  %v4495_v63 = vld [vmem:[#allocation4 + $0x154] sm:$0xf0]  ;;  %v3935_v6 = vor.u32 %v4469_v18, %v3934_v61  ;;  %vm2101_vm2 = vcmp.ge.f32.partialorder %v1872_v1, 0.0  ;;  %v3888_v61 = vld [vmem:[#allocation4 + $0x28] sm:$0xf0] }
 0x11b   :  { %v1845_v51 = vpop.f32.mrf.mxu1  ;;  %v4039_v43 = vor.u32 %v4495_v63, %v4038_v60  ;;  %v4472_v18 = vld [vmem:[#allocation4 + $0xa4] sm:$0xf]  ;;  %v4498_v63 = vld [vmem:[#allocation4 + $0x174] sm:$0xf]  ;;  %v4040_v3 = vld [vmem:[#allocation4 + $0x158] sm:$0xf0] }
 0x11c   :  { %v1846_v30 = vadd.f32 %v1845_v51, %v1832_v40  ;;  %v3904_v40 = vld [vmem:[#allocation4 + $0x48] sm:$0xf0]  ;;  %v4015_v51 = vor.u32 %v4489_v50, %v4014_v48  ;;  %v3955_v44 = vor.u32 %v4472_v18, %v3952_v58  ;;  %v4492_v29 = vld [vmem:[#allocation4 + $0x144] sm:$0xf]  ;;  %v4486_v41 = vld [vmem:[#allocation4 + $0x114] sm:$0xf] }
 0x11d   :  { %2521 = vmatpush.bf16.msra.mxu0 %v3903_v32  ;;  %v1859_v17 = vpop.f32.mrf.mxu2  ;;  %v2109_v32 = vmul.f32 0.01, %v1872_v1  ;;  %2548 = vmatpush.bf16.msra.mxu2 %v4039_v43  ;;  %v3907_v9 = vor.u32 %v4460_v37, %v3904_v40  ;;  %v3880_v43 = vld [vmem:[#allocation4 + $0x18] sm:$0xf0]  ;;  %v4032_v31 = vld [vmem:[#allocation4 + $0x148] sm:$0xf0] }
 0x11e   :  { %2535 = vmatpush.bf16.msra.mxu1 %v3967_v11  ;;  %v1860_v10 = vadd.f32 %v1859_v17, %v1846_v30  ;;  %v1873_v2 = vpop.f32.mrf.mxu3  ;;  %v3920_v11 = vld [vmem:[#allocation4 + $0x68] sm:$0xf0]  ;;  %v3998_v17 = vld [vmem:[#allocation4 + $0x100] sm:$0xf]  ;;  %v4024_v37 = vld [vmem:[#allocation4 + $0x138] sm:$0xf0] }
 0x11f   :  { %v3923_v22 = vor.u32 %v4464_v0, %v3920_v11  ;;  %v3999_v60 = vor.u32 %v4485_v39, %v3998_v17  ;;  %v326_v0 = vperm.slane %v4766_v20, 2  ;;  %v3883_v11 = vor.u32 %v4454_v4, %v3880_v43  ;;  %v4488_v48 = vld [vmem:[#allocation4 + $0x124] sm:$0xf]  ;;  %v4016_v50 = vld [vmem:[#allocation4 + $0x128] sm:$0xf0] }
 0x120   :  { %v1874_v47 = vadd.f32 %v1873_v2, %v1860_v10  ;;  %v4059_v2 = vor.u32 %v4498_v63, %v4056_v62  ;;  %v4008_v53 = vld [vmem:[#allocation4 + $0x118] sm:$0xf0] }
 0x121   :  { %2522 = vmatpush.bf16.msra.mxu0 %v3895_v28  ;;  %v4796_v28 = vpack.c.bf16 %v2120_v45, %v2116_v16  ;;  %2549 = vmatpush.bf16.msra.mxu2 %v4031_v8  ;;  %v3872_v16 = vld [vmem:[#allocation4 + $0x8] sm:$0xf0] }
 0x122   :  { %2536 = vmatpush.bf16.msra.mxu1 %v3959_v23  ;;  %vm2105_vm3 = vcmp.ge.f32.partialorder %v1874_v47, 0.0  ;;  %v2113_v19 = vmul.f32 0.01, %v1874_v47  ;;  %v2117_v23 = vsel %vm2101_vm2, %v1872_v1, %v2109_v32  ;;  %v3899_v1 = vor.u32 %v4458_v52, %v3896_v57  ;;  %v3944_v32 = vld [vmem:[#allocation4 + $0x98] sm:$0xf0] }
 0x124   :  { %v2121_v24 = vsel %vm2105_vm3, %v1874_v47, %v2113_v19  ;;  %v4468_v19 = vld [vmem:[#allocation4 + $0x84] sm:$0xf] }
 0x125   :  { %2523 = vmatpush.bf16.msra.mxu0 %v3887_v36  ;;  %v4798_v27 = vpack.c.bf16 %v2121_v24, %v2117_v23  ;;  %v3979_v36 = vor.u32 %v4478_v34, %v3976_v33  ;;  %2550 = vmatpush.bf16.msra.mxu2 %v4023_v35  ;;  %v3875_v24 = vor.u32 %v4452_v15, %v3872_v16 }
 0x126   :  { %2537 = vmatpush.bf16.msra.mxu1 %v3951_v42  ;;  %v4476_v42 = vld [vmem:[#allocation4 + $0xc4] sm:$0xf]  ;;  %v3939_v25 = vor.u32 %v4468_v19, %v3936_v21  ;;  %v4035_v35 = vor.u32 %v4492_v29, %v4032_v31  ;;  %v4086_v19 = vld [vmem:[#allocation4 + $0x1b0] sm:$0xf]  ;;  %v4507_v21 = vld [vmem:[#allocation4 + $0x1b4] sm:$0xf0] }
 0x127   :  { %v3971_v14 = vor.u32 %v4476_v42, %v3968_v46  ;;  %v4505_v29 = vld [vmem:[#allocation4 + $0x1a4] sm:$0xf0] }
 0x129   :  { %2524 = vmatpush.bf16.msra.mxu0 %v3879_v54  ;;  %v4474_v54 = vld [vmem:[#allocation4 + $0xb4] sm:$0xf]  ;;  %2551 = vmatpush.bf16.msra.mxu2 %v4015_v51 }
 0x12a   :  { %2538 = vmatpush.bf16.msra.mxu1 %v3943_v59  ;;  %v3963_v30 = vor.u32 %v4474_v54, %v3960_v55  ;;  %v4456_v59 = vld [vmem:[#allocation4 + $0x24] sm:$0xf]  ;;  %v4011_v55 = vor.u32 %v4486_v41, %v4008_v53  ;;  %v327_v53 = vperm.slane %v4766_v20, 3 }
 0x12b   :  { %v3891_v10 = vor.u32 %v4456_v59, %v3888_v61  ;;  %v4118_v59 = vld [vmem:[#allocation4 + $0x1f0] sm:$0xf]  ;;  %v4515_v61 = vld [vmem:[#allocation4 + $0x1f4] sm:$0xf0] }
 0x12c   :  { %v4119_v18 = vor.u32 %v4515_v61, %v4118_v59  ;;  %v4506_v59 = vld [vmem:[#allocation4 + $0x1b4] sm:$0xf]  ;;  %v4088_v61 = vld [vmem:[#allocation4 + $0x1b8] sm:$0xf0] }
 0x12d   :  { %2525 = vmatpush.bf16.msra.mxu0 %v3871_v5  ;;  %2552 = vmatpush.bf16.msra.mxu2 %v4007_v56  ;;  %v1885_v45 = vpop.f32.mrf.mxu0  ;;  %v4470_v5 = vld [vmem:[#allocation4 + $0x94] sm:$0xf]  ;;  %v4484_v56 = vld [vmem:[#allocation4 + $0x104] sm:$0xf] }
 0x12e   :  { %2539 = vmatpush.bf16.msra.mxu1 %v3935_v6  ;;  %v1899_v47 = vpop.f32.mrf.mxu1  ;;  %v4496_v6 = vld [vmem:[#allocation4 + $0x164] sm:$0xf]  ;;  %v3947_v13 = vor.u32 %v4470_v5, %v3944_v32  ;;  %v1886_v23 = vadd.f32 %v1885_v45, %v326_v0  ;;  %2560 = vmatpush.bf16.msra.mxu3 %v4119_v18  ;;  %v4102_v45 = vld [vmem:[#allocation4 + $0x1d0] sm:$0xf]  ;;  %v4511_v5 = vld [vmem:[#allocation4 + $0x1d4] sm:$0xf0]  ;;  %v4091_v18 = vor.u32 %v4506_v59, %v4088_v61 }
 0x12f   :  { %v4524_v59 = vld [vmem:[%s4871_s5 + $0x40] sm:$0xff] }
 0x130   :  { %2526 = vmatmul.bf16.vlgmr.msra.gmra.mxu0 %v4796_v28  ;;  %v1900_v34 = vadd.f32 %v1899_v47, %v1886_v23  ;;  %v4103_v47 = vor.u32 %v4511_v5, %v4102_v45  ;;  %v4072_v45 = vld [vmem:[#allocation4 + $0x198] sm:$0xf0] }
 0x131   :  { %2574 = vmatpush.bf16.msrb.mxu0 %v3931_v7  ;;  %2540 = vmatmul.bf16.vlgmr.msra.gmra.mxu1 %v4798_v27  ;;  %v4048_v7 = vld [vmem:[#allocation4 + $0x168] sm:$0xf0] }
 0x132   :  { %2588 = vmatpush.bf16.msrb.mxu1 %v3995_v12  ;;  %2553 = vmatpush.bf16.msra.mxu2 %v3999_v60  ;;  %v4051_v12 = vor.u32 %v4496_v6, %v4048_v7 }
 0x135   :  { %2575 = vmatpush.bf16.msrb.mxu0 %v3923_v22  ;;  %v4494_v22 = vld [vmem:[#allocation4 + $0x154] sm:$0xf]  ;;  %v1913_v26 = vpop.f32.mrf.mxu2  ;;  %v1887_v33 = vpop.f32.mrf.mxu0 }
 0x136   :  { %2589 = vmatpush.bf16.msrb.mxu1 %v3987_v49  ;;  %2602 = vmatpush.bf16.msrb.mxu2 %v4059_v2  ;;  %v4043_v8 = vor.u32 %v4494_v22, %v4040_v3  ;;  %v1927_v49 = vpop.f32.mrf.mxu3  ;;  %v1914_v40 = vadd.f32 %v1913_v26, %v1900_v34  ;;  %v1888_v42 = vadd.f32 %v1887_v33, %v326_v0  ;;  %v4513_v2 = vld [vmem:[#allocation4 + $0x1e4] sm:$0xf0]  ;;  %v4070_v34 = vld [vmem:[#allocation4 + $0x190] sm:$0xf]  ;;  %v4503_v33 = vld [vmem:[#allocation4 + $0x194] sm:$0xf0] }
 0x138   :  { %v1928_v52 = vadd.f32 %v1927_v49, %v1914_v40  ;;  %v4078_v49 = vld [vmem:[#allocation4 + $0x1a0] sm:$0xf]  ;;  %v4514_v40 = vld [vmem:[#allocation4 + $0x1f4] sm:$0xf] }
 0x139   :  { %2576 = vmatpush.bf16.msrb.mxu0 %v3915_v38  ;;  %v1901_v38 = vpop.f32.mrf.mxu1  ;;  %v4079_v31 = vor.u32 %v4505_v29, %v4078_v49 }
 0x13a   :  { %2590 = vmatpush.bf16.msrb.mxu1 %v3979_v36  ;;  %2603 = vmatpush.bf16.msrb.mxu2 %v4051_v12  ;;  %v4490_v36 = vld [vmem:[#allocation4 + $0x134] sm:$0xf]  ;;  %v4509_v12 = vld [vmem:[#allocation4 + $0x1c4] sm:$0xf0] }
 0x13b   :  { %v4027_v46 = vor.u32 %v4490_v36, %v4024_v37  ;;  %v4501_v36 = vld [vmem:[#allocation4 + $0x184] sm:$0xf0] }
 0x13d   :  { %2577 = vmatpush.bf16.msrb.mxu0 %v3907_v9  ;;  %v1915_v51 = vpop.f32.mrf.mxu2  ;;  %v4019_v9 = vor.u32 %v4488_v48, %v4016_v50  ;;  %v4512_v48 = vld [vmem:[#allocation4 + $0x1e4] sm:$0xf]  ;;  %v4112_v50 = vld [vmem:[#allocation4 + $0x1e8] sm:$0xf0] }
 0x13e   :  { %2591 = vmatpush.bf16.msrb.mxu1 %v3971_v14  ;;  %2604 = vmatpush.bf16.msrb.mxu2 %v4043_v8  ;;  %v1902_v14 = vadd.f32 %v1901_v38, %v1888_v42  ;;  %v1929_v57 = vpop.f32.mrf.mxu3  ;;  %v4062_v38 = vld [vmem:[#allocation4 + $0x180] sm:$0xf]  ;;  %v4120_v42 = vld [vmem:[#allocation4 + $0x1f8] sm:$0xf0] }
 0x13f   :  { %v4063_v37 = vor.u32 %v4501_v36, %v4062_v38  ;;  %v4523_v36 = vld [vmem:[%s4871_s5 + $0x38] sm:$0xff] }
 0x141   :  { %2578 = vmatpush.bf16.msrb.mxu0 %v3899_v1  ;;  %v1916_v1 = vadd.f32 %v1915_v51, %v1902_v14  ;;  %v4115_v51 = vor.u32 %v4512_v48, %v4112_v50  ;;  %v4104_v14 = vld [vmem:[#allocation4 + $0x1d8] sm:$0xf0]  ;;  %v4518_v50 = vld [vmem:[%s4871_s5 + $0x10] sm:$0xff] }
 0x142   :  { %2592 = vmatpush.bf16.msrb.mxu1 %v3963_v30  ;;  %2605 = vmatpush.bf16.msrb.mxu2 %v4035_v35  ;;  %v4071_v35 = vor.u32 %v4503_v33, %v4070_v34  ;;  %v4531_v48 = vld [vmem:[%s4871_s5 + $0x78] sm:$0xff] }
 0x143   :  { %v1930_v17 = vadd.f32 %v1929_v57, %v1916_v1 }
 0x145   :  { %2579 = vmatpush.bf16.msrb.mxu0 %v3891_v10  ;;  %v4110_v10 = vld [vmem:[#allocation4 + $0x1e0] sm:$0xf] }
 0x146   :  { %2593 = vmatpush.bf16.msrb.mxu1 %v3955_v44  ;;  %2606 = vmatpush.bf16.msrb.mxu2 %v4027_v46  ;;  %v4111_v43 = vor.u32 %v4513_v2, %v4110_v10  ;;  %v4123_v46 = vor.u32 %v4514_v40, %v4120_v42  ;;  %v4521_v40 = vld [vmem:[%s4871_s5 + $0x28] sm:$0xff]  ;;  %v4520_v42 = vld [vmem:[%s4871_s5 + $0x20] sm:$0xff] }
 0x148   :  { %2561 = vmatpush.bf16.msra.mxu3 %v4111_v43  ;;  %v4502_v43 = vld [vmem:[#allocation4 + $0x194] sm:$0xf] }
 0x149   :  { %2580 = vmatpush.bf16.msrb.mxu0 %v3883_v11  ;;  %v4094_v11 = vld [vmem:[#allocation4 + $0x1c0] sm:$0xf]  ;;  %v4075_v5 = vor.u32 %v4502_v43, %v4072_v45 }
 0x14a   :  { %2594 = vmatpush.bf16.msrb.mxu1 %v3947_v13  ;;  %2607 = vmatpush.bf16.msrb.mxu2 %v4019_v9  ;;  %v4095_v16 = vor.u32 %v4509_v12, %v4094_v11  ;;  %v4064_v11 = vld [vmem:[#allocation4 + $0x188] sm:$0xf0] }
 0x14c   :  { %2562 = vmatpush.bf16.msra.mxu3 %v4103_v47 }
 0x14d   :  { %2581 = vmatpush.bf16.msrb.mxu0 %v3875_v24  ;;  %v1941_v54 = vpop.f32.mrf.mxu0  ;;  %v4087_v24 = vor.u32 %v4507_v21, %v4086_v19 }
 0x14e   :  { %2595 = vmatpush.bf16.msrb.mxu1 %v3939_v25  ;;  %v1942_v30 = vadd.f32 %v1941_v54, %v1928_v52  ;;  %2608 = vmatpush.bf16.msrb.mxu2 %v4011_v55  ;;  %v4510_v52 = vld [vmem:[#allocation4 + $0x1d4] sm:$0xf]  ;;  %v4508_v54 = vld [vmem:[#allocation4 + $0x1c4] sm:$0xf] }
 0x14f   :  { %v4107_v41 = vor.u32 %v4510_v52, %v4104_v14  ;;  %v4529_v52 = vld [vmem:[%s4871_s5 + $0x68] sm:$0xff]  ;;  %v4516_v14 = vld [vmem:[%s4871_s5] sm:$0xff] }
 0x150   :  { %2582 = vmatmul.bf16.vlgmr.msrb.gmra.mxu0 %v4796_v28  ;;  %v1955_v28 = vpop.f32.mrf.mxu1  ;;  %2563 = vmatpush.bf16.msra.mxu3 %v4095_v16 }
 0x151   :  { %2596 = vmatmul.bf16.vlgmr.msrb.gmra.mxu1 %v4798_v27  ;;  %v4000_v27 = vld [vmem:[#allocation4 + $0x108] sm:$0xf0]  ;;  %v1956_v39 = vadd.f32 %v1955_v28, %v1942_v30  ;;  %2776 = vmatpush.bf16.msra.mxu0 %v4523_v36 }
 0x152   :  { %v4003_v58 = vor.u32 %v4484_v56, %v4000_v27  ;;  %v4096_v28 = vld [vmem:[#allocation4 + $0x1c8] sm:$0xf0]  ;;  %2790 = vmatpush.bf16.msra.mxu1 %v4531_v48 }
 0x153   :  { %v4099_v56 = vor.u32 %v4508_v54, %v4096_v28  ;;  %v4526_v54 = vld [vmem:[%s4871_s5 + $0x50] sm:$0xff] }
 0x154   :  { %2609 = vmatpush.bf16.msrb.mxu2 %v4003_v58  ;;  %2564 = vmatpush.bf16.msra.mxu3 %v4087_v24 }
 0x155   :  { %v1969_v60 = vpop.f32.mrf.mxu2  ;;  %v1943_v63 = vpop.f32.mrf.mxu0 }
 0x156   :  { %v1983_v62 = vpop.f32.mrf.mxu3  ;;  %v1970_v44 = vadd.f32 %v1969_v60, %v1956_v39  ;;  %v1944_v4 = vadd.f32 %v1943_v63, %v1930_v17  ;;  %v4504_v60 = vld [vmem:[#allocation4 + $0x1a4] sm:$0xf]  ;;  %v4080_v63 = vld [vmem:[#allocation4 + $0x1a8] sm:$0xf0] }
 0x158   :  { %v1957_v32 = vpop.f32.mrf.mxu1  ;;  %v1984_v6 = vadd.f32 %v1983_v62, %v1970_v44  ;;  %2565 = vmatpush.bf16.msra.mxu3 %v4079_v31  ;;  %v4083_v62 = vor.u32 %v4504_v60, %v4080_v63 }
 0x159   :  { %v1958_v7 = vadd.f32 %v1957_v32, %v1944_v4 }
 0x15a   :  { %v2110_v22 = vmul.f32 0.01, %v1984_v6  ;;  %vm2102_vm4 = vcmp.ge.f32.partialorder %v1984_v6, 0.0 }
 0x15c   :  { %v2118_v8 = vsel %vm2102_vm4, %v1984_v6, %v2110_v22  ;;  %2566 = vmatpush.bf16.msra.mxu3 %v4071_v35 }
 0x15d   :  { %v1971_v0 = vpop.f32.mrf.mxu2 }
 0x15e   :  { %v1972_v13 = vadd.f32 %v1971_v0, %v1958_v7  ;;  %v1985_v15 = vpop.f32.mrf.mxu3  ;;  %v4500_v0 = vld [vmem:[#allocation4 + $0x184] sm:$0xf] }
 0x15f   :  { %v4067_v12 = vor.u32 %v4500_v0, %v4064_v11 }
 0x160   :  { %v1986_v3 = vadd.f32 %v1985_v15, %v1972_v13  ;;  %2567 = vmatpush.bf16.msra.mxu3 %v4063_v37  ;;  %v4522_v37 = vld [vmem:[%s4871_s5 + $0x30] sm:$0xff] }
 0x161   :  { %2777 = vmatpush.bf16.msra.mxu0 %v4522_v37 }
 0x162   :  { %vm2106_vm5 = vcmp.ge.f32.partialorder %v1986_v3, 0.0  ;;  %v2114_v23 = vmul.f32 0.01, %v1986_v3 }
 0x164   :  { %v2122_v25 = vsel %vm2106_vm5, %v1986_v3, %v2114_v23  ;;  %2616 = vmatpush.bf16.msrb.mxu3 %v4123_v46  ;;  %v4519_v46 = vld [vmem:[%s4871_s5 + $0x18] sm:$0xff] }
 0x165   :  { %v2126_v26 = vpack.c.bf16 %v2122_v25, %v2118_v8  ;;  %2778 = vmatpush.bf16.msra.mxu0 %v4521_v40 }
 0x167   :  { %2554 = vmatmul.bf16.vlgmr.msra.gmra.mxu2 %v2126_v26 }
 0x168   :  { %2617 = vmatpush.bf16.msrb.mxu3 %v4115_v51  ;;  %v4530_v51 = vld [vmem:[%s4871_s5 + $0x70] sm:$0xff] }
 0x169   :  { %2779 = vmatpush.bf16.msra.mxu0 %v4520_v42  ;;  %2791 = vmatpush.bf16.msra.mxu1 %v4530_v51 }
 0x16c   :  { %2618 = vmatpush.bf16.msrb.mxu3 %v4107_v41  ;;  %v4527_v41 = vld [vmem:[%s4871_s5 + $0x58] sm:$0xff] }
 0x16d   :  { %v1997_v9 = vpop.f32.mrf.mxu0  ;;  %2780 = vmatpush.bf16.msra.mxu0 %v4519_v46  ;;  %2792 = vmatpush.bf16.msra.mxu1 %v4529_v52 }
 0x16e   :  { %v2011_v57 = vpop.f32.mrf.mxu1  ;;  %v1998_v1 = vadd.f32 %v1997_v9, %v327_v53  ;;  %v4517_v9 = vld [vmem:[%s4871_s5 + $0x8] sm:$0xff] }
 0x170   :  { %2619 = vmatpush.bf16.msrb.mxu3 %v4099_v56  ;;  %v2012_v58 = vadd.f32 %v2011_v57, %v1998_v1  ;;  %v4528_v57 = vld [vmem:[%s4871_s5 + $0x60] sm:$0xff]  ;;  %v4525_v1 = vld [vmem:[%s4871_s5 + $0x48] sm:$0xff] }
 0x171   :  { %2781 = vmatpush.bf16.msra.mxu0 %v4518_v50  ;;  %2793 = vmatpush.bf16.msra.mxu1 %v4528_v57 }
 0x174   :  { %2620 = vmatpush.bf16.msrb.mxu3 %v4091_v18 }
 0x175   :  { %v2025_v55 = vpop.f32.mrf.mxu2  ;;  %v1999_v27 = vpop.f32.mrf.mxu0  ;;  %2782 = vmatpush.bf16.msra.mxu0 %v4517_v9  ;;  %2794 = vmatpush.bf16.msra.mxu1 %v4527_v41 }
 0x176   :  { %v2039_v30 = vpop.f32.mrf.mxu3  ;;  %v2013_v17 = vpop.f32.mrf.mxu1  ;;  %v2000_v39 = vadd.f32 %v1999_v27, %v327_v53  ;;  %v2026_v20 = vadd.f32 %v2025_v55, %v2012_v58  ;;  %v2192_v55 = vld [vmem:[%s4870_s4] sm:$0x3] }
 0x177   :  { %2610 = vmatmul.bf16.vlgmr.msrb.gmra.mxu2 %v2126_v26 }
 0x178   :  { %2621 = vmatpush.bf16.msrb.mxu3 %v4083_v62  ;;  %v2014_v2 = vadd.f32 %v2013_v17, %v2000_v39  ;;  %v2040_v32 = vadd.f32 %v2039_v30, %v2026_v20  ;;  %v2194_v30 = vperm.slane %v2192_v55, 0 }
 0x179   :  { %2783 = vmatpush.bf16.msra.mxu0 %v4516_v14  ;;  %2795 = vmatpush.bf16.msra.mxu1 %v4526_v54 }
 0x17c   :  { %2622 = vmatpush.bf16.msrb.mxu3 %v4075_v5 }
 0x17d   :  { %v2027_v10 = vpop.f32.mrf.mxu2  ;;  %2796 = vmatpush.bf16.msra.mxu1 %v4525_v1 }
 0x17e   :  { %v2041_v44 = vpop.f32.mrf.mxu3  ;;  %v2028_v6 = vadd.f32 %v2027_v10, %v2014_v2 }
 0x180   :  { %2623 = vmatpush.bf16.msrb.mxu3 %v4067_v12  ;;  %v2042_v15 = vadd.f32 %v2041_v44, %v2028_v6 }
 0x181   :  { %2797 = vmatpush.bf16.msra.mxu1 %v4524_v59 }
 0x18d   :  { %v2053_v4 = vpop.f32.mrf.mxu0 }
 0x18e   :  { %v2067_v47 = vpop.f32.mrf.mxu1  ;;  %v2054_v7 = vadd.f32 %v2053_v4, %v2040_v32  ;;  %v2195_v4 = vperm.slane %v2192_v55, 1 }
 0x190   :  { %v2068_v16 = vadd.f32 %v2067_v47, %v2054_v7 }
 0x195   :  { %v2081_v13 = vpop.f32.mrf.mxu2  ;;  %v2055_v21 = vpop.f32.mrf.mxu0 }
 0x196   :  { %v2095_v19 = vpop.f32.mrf.mxu3  ;;  %v2082_v22 = vadd.f32 %v2081_v13, %v2068_v16  ;;  %v2056_v3 = vadd.f32 %v2055_v21, %v2042_v15  ;;  %v2069_v23 = vpop.f32.mrf.mxu1 }
 0x198   :  { %v2096_v24 = vadd.f32 %v2095_v19, %v2082_v22  ;;  %v2070_v8 = vadd.f32 %v2069_v23, %v2056_v3 }
 0x19a   :  { %v2111_v29 = vmul.f32 0.01, %v2096_v24  ;;  %vm2103_vm6 = vcmp.ge.f32.partialorder %v2096_v24, 0.0 }
 0x19c   :  { %v2119_v33 = vsel %vm2103_vm6, %v2096_v24, %v2111_v29 }
 0x19d   :  { %v2083_v25 = vpop.f32.mrf.mxu2 }
 0x19e   :  { %v2084_v26 = vadd.f32 %v2083_v25, %v2070_v8  ;;  %v2097_v49 = vpop.f32.mrf.mxu3 }
 0x1a0   :  { %v2098_v31 = vadd.f32 %v2097_v49, %v2084_v26 }
 0x1a2   :  { %vm2107_vm7 = vcmp.ge.f32.partialorder %v2098_v31, 0.0  ;;  %v2115_v34 = vmul.f32 0.01, %v2098_v31 }
 0x1a4   :  { %v2123_v35 = vsel %vm2107_vm7, %v2098_v31, %v2115_v34 }
 0x1a5   :  { %v2127_v38 = vpack.c.bf16 %v2123_v35, %v2119_v33  ;;  %v4538_v35 = vld [vmem:[%s4872_s6] ss:$0 sm:$0xff] }
 0x1a7   :  { %2568 = vmatmul.bf16.vlgmr.msra.gmra.mxu3 %v2127_v38 }
 0x1ad   :  { %v2527_v53 = vpop.f32.mrf.mxu0 }
 0x1ae   :  { %v2541_v56 = vpop.f32.mrf.mxu1  ;;  %v2528_v61 = vadd.f32 %v2527_v53, %v2194_v30 }
 0x1b0   :  { %v2542_v17 = vadd.f32 %v2541_v56, %v2528_v61 }
 0x1b5   :  { %v2529_v27 = vpop.f32.mrf.mxu0 }
 0x1b6   :  { %v2543_v39 = vpop.f32.mrf.mxu1  ;;  %v2530_v60 = vadd.f32 %v2529_v27, %v2194_v30 }
 0x1b7   :  { %2624 = vmatmul.bf16.vlgmr.msrb.gmra.mxu3 %v2127_v38 }
 0x1b8   :  { %v2544_v20 = vadd.f32 %v2543_v39, %v2530_v60 }
 0x1cd   :  { %v2583_v62 = vpop.f32.mrf.mxu0 }
 0x1ce   :  { %v2597_v5 = vpop.f32.mrf.mxu1  ;;  %v2584_v6 = vadd.f32 %v2583_v62, %v2195_v4 }
 0x1d0   :  { %v2598_v15 = vadd.f32 %v2597_v5, %v2584_v6 }
 0x1d5   :  { %v2585_v11 = vpop.f32.mrf.mxu0 }
 0x1d6   :  { %v2586_v16 = vadd.f32 %v2585_v11, %v2195_v4  ;;  %v2599_v21 = vpop.f32.mrf.mxu1 }
 0x1d8   :  { %v2600_v3 = vadd.f32 %v2599_v21, %v2586_v16 }
 0x1ea   :  { %v2555_v28 = vpop.f32.mrf.mxu2 }
 0x1eb   :  { %v2556_v63 = vadd.f32 %v2555_v28, %v2542_v17 }
 0x1f2   :  { %v2557_v18 = vpop.f32.mrf.mxu2 }
 0x1f3   :  { %v2558_v2 = vadd.f32 %v2557_v18, %v2544_v20 }
 0x1fa   :  { %v2611_v32 = vpop.f32.mrf.mxu2 }
 0x1fb   :  { %v2612_v19 = vadd.f32 %v2611_v32, %v2598_v15 }
 0x202   :  { %v2613_v22 = vpop.f32.mrf.mxu2 }
 0x203   :  { %v2614_v24 = vadd.f32 %v2613_v22, %v2600_v3 }
 0x22a   :  { %v2569_v58 = vpop.f32.mrf.mxu3 }
 0x22b   :  { %v2570_v10 = vadd.f32 %v2569_v58, %v2556_v63 }
 0x22d   :  { %v2634_v43 = vmul.f32 0.01, %v2570_v10  ;;  %vm2630_vm8 = vcmp.ge.f32.partialorder %v2570_v10, 0.0 }
 0x22f   :  { %v2638_v7 = vsel %vm2630_vm8, %v2570_v10, %v2634_v43 }
 0x232   :  { %v2571_v44 = vpop.f32.mrf.mxu3 }
 0x233   :  { %v2572_v45 = vadd.f32 %v2571_v44, %v2558_v2 }
 0x235   :  { %vm2632_vm9 = vcmp.ge.f32.partialorder %v2572_v45, 0.0  ;;  %v2636_v47 = vmul.f32 0.01, %v2572_v45 }
 0x237   :  { %v2640_v0 = vsel %vm2632_vm9, %v2572_v45, %v2636_v47 }
 0x238   :  { %v2642_v12 = vpack.c.bf16 %v2640_v0, %v2638_v7 }
 0x23a   :  { %v2625_v13 = vpop.f32.mrf.mxu3  ;;  %2784 = vmatmul.bf16.vlgmr.msra.gmra.mxu0 %v2642_v12 }
 0x23b   :  { %v2626_v23 = vadd.f32 %v2625_v13, %v2612_v19 }
 0x23d   :  { %v2635_v25 = vmul.f32 0.01, %v2626_v23  ;;  %vm2631_vm10 = vcmp.ge.f32.partialorder %v2626_v23, 0.0 }
 0x23f   :  { %v2639_v29 = vsel %vm2631_vm10, %v2626_v23, %v2635_v25 }
 0x242   :  { %v2627_v8 = vpop.f32.mrf.mxu3 }
 0x243   :  { %v2628_v26 = vadd.f32 %v2627_v8, %v2614_v24 }
 0x245   :  { %vm2633_vm11 = vcmp.ge.f32.partialorder %v2628_v26, 0.0  ;;  %v2637_v49 = vmul.f32 0.01, %v2628_v26 }
 0x247   :  { %v2641_v31 = vsel %vm2633_vm11, %v2628_v26, %v2637_v49 }
 0x248   :  { %v2643_v34 = vpack.c.bf16 %v2641_v31, %v2639_v29 }
 0x24a   :  { %2798 = vmatmul.bf16.vlgmr.msra.gmra.mxu1 %v2643_v34 }
 0x2b7   :  { %v2785_v33 = vpop.f32.mrf.mxu0 }
 0x2b8   :  { %v2786_v38 = vadd.f32 %v4538_v35, %v2785_v33 }
 0x2bf   :  { %v2787_v40 = vpop.f32.mrf.mxu0 }
 0x2c0   :  { %v2788_v42 = vadd.f32 %v4538_v35, %v2787_v40 }
 0x2c7   :  { %v2799_v36 = vpop.f32.mrf.mxu1 }
 0x2c8   :  { %v2800_v37 = vadd.f32 %v2799_v36, %v2786_v38 }
 0x2ca   :  { %2804 = vst [vmem:[%s4873_s7] sm:$0xff] %v2800_v37 }
 0x2cf   :  { %v2801_v46 = vpop.f32.mrf.mxu1 }
 0x2d0   :  { %v2802_v48 = vadd.f32 %v2801_v46, %v2788_v42 }
 0x2d2   :  { %2805 = vst [vmem:[%s4873_s7 + $0x8] sm:$0xff] %v2802_v48 }
 0x2d3   :  { %2810 = vsyncpa [#allocation3], 1 }
 0x2d4   :  { %2811 = vsyncpa [#allocation5], 1 }

// kernel: discriminator_forward.1
= control target key start
LH: loop header
LB: loop body
LE: loop exit
PB: predicated region body
PF: predicated region fallthrough
CT: control target
= control target key end

     0   :  { %12 = vsyncpa [#allocation3], 0  ;;  %s4866_s0 = inlined_call_operand.vmem [shape: bf16[16,1024], index: 0, kind: input, shape index: {}]   ;;  %s4867_s1 = inlined_call_operand.hbm [shape: bf16[1024,512], index: 1, kind: input, shape index: {}]   ;;  %s4868_s2 = inlined_call_operand.vmem [shape: f32[1,512], index: 2, kind: input, shape index: {}]   ;;  %s4869_s3 = inlined_call_operand.hbm [shape: bf16[512,256], index: 3, kind: input, shape index: {}]   ;;  %s4870_s4 = inlined_call_operand.vmem [shape: f32[1,256], index: 4, kind: input, shape index: {}]   ;;  %s4871_s5 = inlined_call_operand.vmem [shape: bf16[256,128], index: 5, kind: input, shape index: {}]   ;;  %s4872_s6 = inlined_call_operand.vmem [shape: f32[1,128], index: 6, kind: input, shape index: {}]   ;;  %s4873_s7 = inlined_call_operand.vmem [shape: f32[16,128], index: 7, kind: output, shape index: {}]  }
   0x1   :  { %s20_s26 = sshll.u32 %s4867_s1, 4  ;;  %s21_s26 = int_to_ptr.hbm [resolvable:$true] %s20_s26 }
   0x2   :  { %13 = vsyncpa [#allocation5], 0  ;;  %s4591_s27 = smov [#allocation2]   ;;  %s35_s8 = sshll.u32 %s4869_s3, 4  ;;  %s36_s8 = int_to_ptr.hbm [resolvable:$true] %s35_s8 }
   0x3   :  { %s22_s28 = sshll.u32 %s4591_s27, 4  ;;  %s4592_s9 = smov 256   ;;  %s23_s28 = int_to_ptr.vmem [resolvable:$true] %s22_s28 }
   0x4   :  { %s4593_s10 = smov 16   ;;  %s4594_s11 = smov [#allocation4]  }
   0x5   :  { %28 = dma.hbm_to_vmem [thread:$0]  %s21_s26, 32768, %s23_s28, [#allocation3], %s4592_s9, %s4592_s9, %s4593_s10  }
   0x6   :  { %s37_s12 = sshll.u32 %s4594_s11, 4  ;;  %s4595_s13 = smov 128   ;;  %s38_s12 = int_to_ptr.vmem [resolvable:$true] %s37_s12 }
   0x7   :  { %s4596_s14 = smov 8  }
   0x8   :  { %43 = dma.hbm_to_vmem [thread:$0]  %s36_s8, 8192, %s38_s12, [#allocation5], %s4595_s13, %s4595_s13, %s4596_s14  }
   0x9   :  { %4587 = dma.done.wait [#allocation3], 32768  }
   0xa   :  { %4588 = vsyncadd [#allocation3], 4294934528 }
   0xb   :  { %4589 = dma.done.wait [#allocation5], 8192  }
   0xc   :  { %4590 = vsyncadd [#allocation5], 4294959104  ;;  %v2958_v0 = vld [vmem:[#allocation2 + $0xe0] sm:$0xf]  ;;  %v4226_v1 = vld [vmem:[#allocation2 + $0xec] sm:$0xf0] }
   0xd   :  { %v3086_v2 = vld [vmem:[#allocation2 + $0x1e0] sm:$0xf]  ;;  %v2959_v3 = vor.u32 %v4226_v1, %v2958_v0  ;;  %v4258_v4 = vld [vmem:[#allocation2 + $0x1ec] sm:$0xf0] }
   0xe   :  { %v3214_v5 = vld [vmem:[#allocation2 + $0x2e0] sm:$0xf]  ;;  %v4290_v6 = vld [vmem:[#allocation2 + $0x2ec] sm:$0xf0]  ;;  %v3087_v7 = vor.u32 %v4258_v4, %v3086_v2 }
   0xf   :  { %v3215_v8 = vor.u32 %v4290_v6, %v3214_v5  ;;  %v3342_v9 = vld [vmem:[#allocation2 + $0x3e0] sm:$0xf]  ;;  %v4322_v10 = vld [vmem:[#allocation2 + $0x3ec] sm:$0xf0]  ;;  %1652 = vmatpush.bf16.msra.mxu0 %v2959_v3 }
  0x10   :  { %v2942_v11 = vld [vmem:[#allocation2 + $0xc0] sm:$0xf]  ;;  %v3343_v12 = vor.u32 %v4322_v10, %v3342_v9  ;;  %v4222_v13 = vld [vmem:[#allocation2 + $0xcc] sm:$0xf0]  ;;  %1666 = vmatpush.bf16.msra.mxu1 %v3087_v7 }
  0x11   :  { %v3070_v14 = vld [vmem:[#allocation2 + $0x1c0] sm:$0xf]  ;;  %v4254_v15 = vld [vmem:[#allocation2 + $0x1cc] sm:$0xf0]  ;;  %1680 = vmatpush.bf16.msra.mxu2 %v3215_v8  ;;  %v2943_v16 = vor.u32 %v4222_v13, %v2942_v11 }
  0x12   :  { %v3071_v17 = vor.u32 %v4254_v15, %v3070_v14  ;;  %v3198_v18 = vld [vmem:[#allocation2 + $0x2c0] sm:$0xf]  ;;  %v4286_v19 = vld [vmem:[#allocation2 + $0x2cc] sm:$0xf0]  ;;  %1694 = vmatpush.bf16.msra.mxu3 %v3343_v12 }
  0x13   :  { %v3326_v20 = vld [vmem:[#allocation2 + $0x3c0] sm:$0xf]  ;;  %v3199_v21 = vor.u32 %v4286_v19, %v3198_v18  ;;  %v4318_v22 = vld [vmem:[#allocation2 + $0x3cc] sm:$0xf0]  ;;  %1653 = vmatpush.bf16.msra.mxu0 %v2943_v16 }
  0x14   :  { %v2926_v23 = vld [vmem:[#allocation2 + $0xa0] sm:$0xf]  ;;  %v4218_v24 = vld [vmem:[#allocation2 + $0xac] sm:$0xf0]  ;;  %v3327_v25 = vor.u32 %v4318_v22, %v3326_v20  ;;  %1667 = vmatpush.bf16.msra.mxu1 %v3071_v17 }
  0x15   :  { %v3054_v26 = vld [vmem:[#allocation2 + $0x1a0] sm:$0xf]  ;;  %v4250_v27 = vld [vmem:[#allocation2 + $0x1ac] sm:$0xf0]  ;;  %v2927_v29 = vor.u32 %v4218_v24, %v2926_v23  ;;  %1681 = vmatpush.bf16.msra.mxu2 %v3199_v21 }
  0x16   :  { %v3182_v28 = vld [vmem:[#allocation2 + $0x2a0] sm:$0xf]  ;;  %v4282_v30 = vld [vmem:[#allocation2 + $0x2ac] sm:$0xf0]  ;;  %v3055_v33 = vor.u32 %v4250_v27, %v3054_v26  ;;  %1695 = vmatpush.bf16.msra.mxu3 %v3327_v25 }
  0x17   :  { %v3310_v31 = vld [vmem:[#allocation2 + $0x3a0] sm:$0xf]  ;;  %v4314_v32 = vld [vmem:[#allocation2 + $0x3ac] sm:$0xf0]  ;;  %v3183_v34 = vor.u32 %v4282_v30, %v3182_v28  ;;  %1654 = vmatpush.bf16.msra.mxu0 %v2927_v29 }
  0x18   :  { %v2910_v35 = vld [vmem:[#allocation2 + $0x80] sm:$0xf]  ;;  %v4214_v36 = vld [vmem:[#allocation2 + $0x8c] sm:$0xf0]  ;;  %v3311_v38 = vor.u32 %v4314_v32, %v3310_v31  ;;  %1668 = vmatpush.bf16.msra.mxu1 %v3055_v33 }
  0x19   :  { %v3038_v37 = vld [vmem:[#allocation2 + $0x180] sm:$0xf]  ;;  %v4246_v39 = vld [vmem:[#allocation2 + $0x18c] sm:$0xf0]  ;;  %v2911_v44 = vor.u32 %v4214_v36, %v2910_v35  ;;  %1682 = vmatpush.bf16.msra.mxu2 %v3183_v34 }
  0x1a   :  { %v3166_v40 = vld [vmem:[#allocation2 + $0x280] sm:$0xf]  ;;  %v4278_v41 = vld [vmem:[#allocation2 + $0x28c] sm:$0xf0]  ;;  %v3039_v45 = vor.u32 %v4246_v39, %v3038_v37  ;;  %1696 = vmatpush.bf16.msra.mxu3 %v3311_v38 }
  0x1b   :  { %v3294_v42 = vld [vmem:[#allocation2 + $0x380] sm:$0xf]  ;;  %v4310_v43 = vld [vmem:[#allocation2 + $0x38c] sm:$0xf0]  ;;  %v3167_v46 = vor.u32 %v4278_v41, %v3166_v40  ;;  %1655 = vmatpush.bf16.msra.mxu0 %v2911_v44 }
  0x1c   :  { %v2894_v47 = vld [vmem:[#allocation2 + $0x60] sm:$0xf]  ;;  %v4210_v48 = vld [vmem:[#allocation2 + $0x6c] sm:$0xf0]  ;;  %v3295_v50 = vor.u32 %v4310_v43, %v3294_v42  ;;  %1669 = vmatpush.bf16.msra.mxu1 %v3039_v45 }
  0x1d   :  { %v3022_v49 = vld [vmem:[#allocation2 + $0x160] sm:$0xf]  ;;  %v4242_v51 = vld [vmem:[#allocation2 + $0x16c] sm:$0xf0]  ;;  %v2895_v56 = vor.u32 %v4210_v48, %v2894_v47  ;;  %1683 = vmatpush.bf16.msra.mxu2 %v3167_v46 }
  0x1e   :  { %v3150_v52 = vld [vmem:[#allocation2 + $0x260] sm:$0xf]  ;;  %v4274_v53 = vld [vmem:[#allocation2 + $0x26c] sm:$0xf0]  ;;  %v3023_v57 = vor.u32 %v4242_v51, %v3022_v49  ;;  %1697 = vmatpush.bf16.msra.mxu3 %v3295_v50 }
  0x1f   :  { %v3278_v54 = vld [vmem:[#allocation2 + $0x360] sm:$0xf]  ;;  %v4306_v55 = vld [vmem:[#allocation2 + $0x36c] sm:$0xf0]  ;;  %v3151_v58 = vor.u32 %v4274_v53, %v3150_v52  ;;  %1656 = vmatpush.bf16.msra.mxu0 %v2895_v56 }
  0x20   :  { %v2878_v59 = vld [vmem:[#allocation2 + $0x40] sm:$0xf]  ;;  %v4206_v60 = vld [vmem:[#allocation2 + $0x4c] sm:$0xf0]  ;;  %v3279_v62 = vor.u32 %v4306_v55, %v3278_v54  ;;  %1670 = vmatpush.bf16.msra.mxu1 %v3023_v57  ;;  %v2822_v54 = vld [vmem:[%s4866_s0 + $0x8] sm:$0xf] }
  0x21   :  { %v3006_v61 = vld [vmem:[#allocation2 + $0x140] sm:$0xf]  ;;  %v4238_v63 = vld [vmem:[#allocation2 + $0x14c] sm:$0xf0]  ;;  %v2879_v4 = vor.u32 %v4206_v60, %v2878_v59  ;;  %1684 = vmatpush.bf16.msra.mxu2 %v3151_v58  ;;  %v4193_v59 = vld [vmem:[%s4866_s0 + $0x24] sm:$0xf0] }
  0x22   :  { %v3134_v0 = vld [vmem:[#allocation2 + $0x240] sm:$0xf]  ;;  %v4270_v1 = vld [vmem:[#allocation2 + $0x24c] sm:$0xf0]  ;;  %v3007_v5 = vor.u32 %v4238_v63, %v3006_v61  ;;  %1698 = vmatpush.bf16.msra.mxu3 %v3279_v62 }
  0x23   :  { %v3262_v2 = vld [vmem:[#allocation2 + $0x340] sm:$0xf]  ;;  %v4302_v3 = vld [vmem:[#allocation2 + $0x34c] sm:$0xf0]  ;;  %v3135_v6 = vor.u32 %v4270_v1, %v3134_v0  ;;  %1657 = vmatpush.bf16.msra.mxu0 %v2879_v4  ;;  %v4657_v1 = vor.u32 %v4193_v59, %v2822_v54 }
  0x24   :  { %v2862_v7 = vld [vmem:[#allocation2 + $0x20] sm:$0xf]  ;;  %v4202_v8 = vld [vmem:[#allocation2 + $0x2c] sm:$0xf0]  ;;  %v3263_v10 = vor.u32 %v4302_v3, %v3262_v2  ;;  %1671 = vmatpush.bf16.msra.mxu1 %v3007_v5 }
  0x25   :  { %v2990_v9 = vld [vmem:[#allocation2 + $0x120] sm:$0xf]  ;;  %v4234_v11 = vld [vmem:[#allocation2 + $0x12c] sm:$0xf0]  ;;  %v2863_v16 = vor.u32 %v4202_v8, %v2862_v7  ;;  %1685 = vmatpush.bf16.msra.mxu2 %v3135_v6  ;;  %v4188_v6 = vld [vmem:[%s4866_s0 + $0x4] sm:$0xf] }
  0x26   :  { %v3118_v12 = vld [vmem:[#allocation2 + $0x220] sm:$0xf]  ;;  %v4266_v13 = vld [vmem:[#allocation2 + $0x22c] sm:$0xf0]  ;;  %v2991_v19 = vor.u32 %v4234_v11, %v2990_v9  ;;  %1699 = vmatpush.bf16.msra.mxu3 %v3263_v10  ;;  %v2816_v7 = vld [vmem:[%s4866_s0 + $0x20] sm:$0xf0] }
  0x27   :  { %v3246_v14 = vld [vmem:[#allocation2 + $0x320] sm:$0xf]  ;;  %v4298_v15 = vld [vmem:[#allocation2 + $0x32c] sm:$0xf0]  ;;  %v3119_v20 = vor.u32 %v4266_v13, %v3118_v12  ;;  %1658 = vmatpush.bf16.msra.mxu0 %v2863_v16  ;;  %v4189_v8 = vld [vmem:[%s4866_s0 + $0xc] sm:$0xf]  ;;  %v4670_v10 = vor.u32 %v4188_v6, %v2816_v7 }
  0x28   :  { %v2846_v17 = vld [vmem:[#allocation2] sm:$0xf]  ;;  %v4198_v18 = vld [vmem:[#allocation2 + $0xc] sm:$0xf0]  ;;  %v3247_v24 = vor.u32 %v4298_v15, %v3246_v14  ;;  %1672 = vmatpush.bf16.msra.mxu1 %v2991_v19  ;;  %v2824_v11 = vld [vmem:[%s4866_s0 + $0x28] sm:$0xf0] }
  0x29   :  { %v2974_v21 = vld [vmem:[#allocation2 + $0x100] sm:$0xf]  ;;  %v4230_v22 = vld [vmem:[#allocation2 + $0x10c] sm:$0xf0]  ;;  %v2847_v31 = vor.u32 %v4198_v18, %v2846_v17  ;;  %1686 = vmatpush.bf16.msra.mxu2 %v3119_v20  ;;  %v4675_v17 = vor.u32 %v4189_v8, %v2824_v11 }
  0x2a   :  { %v3102_v23 = vld [vmem:[#allocation2 + $0x200] sm:$0xf]  ;;  %v4262_v25 = vld [vmem:[#allocation2 + $0x20c] sm:$0xf0]  ;;  %v2975_v35 = vor.u32 %v4230_v22, %v2974_v21  ;;  %1700 = vmatpush.bf16.msra.mxu3 %v3247_v24 }
  0x2b   :  { %v3230_v26 = vld [vmem:[#allocation2 + $0x300] sm:$0xf]  ;;  %v4294_v27 = vld [vmem:[#allocation2 + $0x30c] sm:$0xf0]  ;;  %v3103_v36 = vor.u32 %v4262_v25, %v3102_v23  ;;  %1659 = vmatpush.bf16.msra.mxu0 %v2847_v31 }
  0x2c   :  { %v3470_v28 = vld [vmem:[#allocation2 + $0x4e0] sm:$0xf]  ;;  %v4354_v29 = vld [vmem:[#allocation2 + $0x4ec] sm:$0xf0]  ;;  %v3231_v39 = vor.u32 %v4294_v27, %v3230_v26  ;;  %1673 = vmatpush.bf16.msra.mxu1 %v2975_v35 }
  0x2d   :  { %v3598_v30 = vld [vmem:[#allocation2 + $0x5e0] sm:$0xf]  ;;  %v4386_v32 = vld [vmem:[#allocation2 + $0x5ec] sm:$0xf0]  ;;  %v3471_v40 = vor.u32 %v4354_v29, %v3470_v28  ;;  %1687 = vmatpush.bf16.msra.mxu2 %v3103_v36 }
  0x2e   :  { %v3726_v33 = vld [vmem:[#allocation2 + $0x6e0] sm:$0xf]  ;;  %v4418_v34 = vld [vmem:[#allocation2 + $0x6ec] sm:$0xf0]  ;;  %v3599_v43 = vor.u32 %v4386_v32, %v3598_v30  ;;  %1701 = vmatpush.bf16.msra.mxu3 %v3231_v39 }
  0x2f   :  { %v3854_v37 = vld [vmem:[#allocation2 + $0x7e0] sm:$0xf]  ;;  %v4450_v38 = vld [vmem:[#allocation2 + $0x7ec] sm:$0xf0]  ;;  %v3727_v44 = vor.u32 %v4418_v34, %v3726_v33  ;;  %1708 = vmatpush.bf16.msrb.mxu0 %v3471_v40  ;;  %1674 = vmatmul.bf16.vlgmr.msra.gmra.mxu1 %v4670_v10 }
  0x30   :  { %v3454_v41 = vld [vmem:[#allocation2 + $0x4c0] sm:$0xf]  ;;  %v4350_v42 = vld [vmem:[#allocation2 + $0x4cc] sm:$0xf0]  ;;  %v3855_v48 = vor.u32 %v4450_v38, %v3854_v37  ;;  %1722 = vmatpush.bf16.msrb.mxu1 %v3599_v43  ;;  %1688 = vmatmul.bf16.vlgmr.msra.gmra.mxu2 %v4657_v1 }
  0x31   :  { %v3582_v45 = vld [vmem:[#allocation2 + $0x5c0] sm:$0xf]  ;;  %v4382_v46 = vld [vmem:[#allocation2 + $0x5cc] sm:$0xf0]  ;;  %v3455_v55 = vor.u32 %v4350_v42, %v3454_v41  ;;  %1736 = vmatpush.bf16.msrb.mxu2 %v3727_v44  ;;  %1702 = vmatmul.bf16.vlgmr.msra.gmra.mxu3 %v4675_v17 }
  0x32   :  { %v3710_v47 = vld [vmem:[#allocation2 + $0x6c0] sm:$0xf]  ;;  %v4414_v49 = vld [vmem:[#allocation2 + $0x6cc] sm:$0xf0]  ;;  %v3583_v60 = vor.u32 %v4382_v46, %v3582_v45  ;;  %1750 = vmatpush.bf16.msrb.mxu3 %v3855_v48 }
  0x33   :  { %v3838_v50 = vld [vmem:[#allocation2 + $0x7c0] sm:$0xf]  ;;  %v4446_v51 = vld [vmem:[#allocation2 + $0x7cc] sm:$0xf0]  ;;  %v3711_v61 = vor.u32 %v4414_v49, %v3710_v47  ;;  %1709 = vmatpush.bf16.msrb.mxu0 %v3455_v55 }
  0x34   :  { %v2814_v52 = vld [vmem:[%s4866_s0] sm:$0xf]  ;;  %v4346_v57 = vld [vmem:[#allocation2 + $0x4ac] sm:$0xf0]  ;;  %v3839_v2 = vor.u32 %v4446_v51, %v3838_v50  ;;  %1723 = vmatpush.bf16.msrb.mxu1 %v3583_v60 }
  0x35   :  { %v4192_v53 = vld [vmem:[%s4866_s0 + $0x1c] sm:$0xf0]  ;;  %v4378_v63 = vld [vmem:[#allocation2 + $0x5ac] sm:$0xf0]  ;;  %1737 = vmatpush.bf16.msrb.mxu2 %v3711_v61 }
  0x36   :  { %v3438_v56 = vld [vmem:[#allocation2 + $0x4a0] sm:$0xf]  ;;  %v4652_v58 = vor.u32 %v4192_v53, %v2814_v52  ;;  %v4410_v3 = vld [vmem:[#allocation2 + $0x6ac] sm:$0xf0]  ;;  %1751 = vmatpush.bf16.msrb.mxu3 %v3839_v2 }
  0x37   :  { %v3566_v62 = vld [vmem:[#allocation2 + $0x5a0] sm:$0xf]  ;;  %v4442_v5 = vld [vmem:[#allocation2 + $0x7ac] sm:$0xf0]  ;;  %v3439_v9 = vor.u32 %v4346_v57, %v3438_v56 }
  0x38   :  { %v3694_v0 = vld [vmem:[#allocation2 + $0x6a0] sm:$0xf]  ;;  %1660 = vmatmul.bf16.vlgmr.msra.gmra.mxu0 %v4652_v58  ;;  %v3567_v12 = vor.u32 %v4378_v63, %v3566_v62  ;;  %v4342_v15 = vld [vmem:[#allocation2 + $0x48c] sm:$0xf0] }
  0x39   :  { %v3822_v4 = vld [vmem:[#allocation2 + $0x7a0] sm:$0xf]  ;;  %v3695_v13 = vor.u32 %v4410_v3, %v3694_v0  ;;  %v4374_v19 = vld [vmem:[#allocation2 + $0x58c] sm:$0xf0]  ;;  %1710 = vmatpush.bf16.msrb.mxu0 %v3439_v9  ;;  %v4224_v9 = vld [vmem:[#allocation2 + $0xe4] sm:$0xf] }
  0x3a   :  { %v3422_v14 = vld [vmem:[#allocation2 + $0x480] sm:$0xf]  ;;  %v3823_v18 = vor.u32 %v4442_v5, %v3822_v4  ;;  %v4406_v21 = vld [vmem:[#allocation2 + $0x68c] sm:$0xf0]  ;;  %1724 = vmatpush.bf16.msrb.mxu1 %v3567_v12  ;;  %v2960_v12 = vld [vmem:[#allocation2 + $0xf0] sm:$0xf0] }
  0x3b   :  { %v3550_v16 = vld [vmem:[#allocation2 + $0x580] sm:$0xf]  ;;  %v4438_v23 = vld [vmem:[#allocation2 + $0x78c] sm:$0xf0]  ;;  %v3423_v24 = vor.u32 %v4342_v15, %v3422_v14  ;;  %1738 = vmatpush.bf16.msrb.mxu2 %v3695_v13  ;;  %v4256_v13 = vld [vmem:[#allocation2 + $0x1e4] sm:$0xf] }
  0x3c   :  { %v3678_v20 = vld [vmem:[#allocation2 + $0x680] sm:$0xf]  ;;  %v3551_v25 = vor.u32 %v4374_v19, %v3550_v16  ;;  %v4338_v28 = vld [vmem:[#allocation2 + $0x46c] sm:$0xf0]  ;;  %1752 = vmatpush.bf16.msrb.mxu3 %v3823_v18  ;;  %v3088_v14 = vld [vmem:[#allocation2 + $0x1f0] sm:$0xf0] }
  0x3d   :  { %v3806_v22 = vld [vmem:[#allocation2 + $0x780] sm:$0xf]  ;;  %v3679_v26 = vor.u32 %v4406_v21, %v3678_v20  ;;  %v4370_v31 = vld [vmem:[#allocation2 + $0x56c] sm:$0xf0]  ;;  %1711 = vmatpush.bf16.msrb.mxu0 %v3423_v24  ;;  %v4288_v15 = vld [vmem:[#allocation2 + $0x2e4] sm:$0xf] }
  0x3e   :  { %v3406_v27 = vld [vmem:[#allocation2 + $0x460] sm:$0xf]  ;;  %v3807_v30 = vor.u32 %v4438_v23, %v3806_v22  ;;  %v4402_v33 = vld [vmem:[#allocation2 + $0x66c] sm:$0xf0]  ;;  %1725 = vmatpush.bf16.msrb.mxu1 %v3551_v25  ;;  %v3216_v16 = vld [vmem:[#allocation2 + $0x2f0] sm:$0xf0] }
  0x3f   :  { %v3534_v29 = vld [vmem:[#allocation2 + $0x560] sm:$0xf]  ;;  %v4434_v35 = vld [vmem:[#allocation2 + $0x76c] sm:$0xf0]  ;;  %v3407_v36 = vor.u32 %v4338_v28, %v3406_v27  ;;  %1739 = vmatpush.bf16.msrb.mxu2 %v3679_v26  ;;  %v4320_v18 = vld [vmem:[#allocation2 + $0x3e4] sm:$0xf] }
  0x40   :  { %v3662_v32 = vld [vmem:[#allocation2 + $0x660] sm:$0xf]  ;;  %v3535_v37 = vor.u32 %v4370_v31, %v3534_v29  ;;  %v4334_v40 = vld [vmem:[#allocation2 + $0x44c] sm:$0xf0]  ;;  %1753 = vmatpush.bf16.msrb.mxu3 %v3807_v30  ;;  %v3344_v20 = vld [vmem:[#allocation2 + $0x3f0] sm:$0xf0]  ;;  %v2963_v29 = vor.u32 %v4224_v9, %v2960_v12 }
  0x41   :  { %v3790_v34 = vld [vmem:[#allocation2 + $0x760] sm:$0xf]  ;;  %v3663_v38 = vor.u32 %v4402_v33, %v3662_v32  ;;  %v4366_v43 = vld [vmem:[#allocation2 + $0x54c] sm:$0xf0]  ;;  %1712 = vmatpush.bf16.msrb.mxu0 %v3407_v36  ;;  %v2838_v25 = vld [vmem:[%s4866_s0 + $0x18] sm:$0xf]  ;;  %v3091_v33 = vor.u32 %v4256_v13, %v3088_v14 }
  0x42   :  { %v3390_v39 = vld [vmem:[#allocation2 + $0x440] sm:$0xf]  ;;  %v3791_v42 = vor.u32 %v4434_v35, %v3790_v34  ;;  %v4398_v45 = vld [vmem:[#allocation2 + $0x64c] sm:$0xf0]  ;;  %1726 = vmatpush.bf16.msrb.mxu1 %v3535_v37  ;;  %v4195_v26 = vld [vmem:[%s4866_s0 + $0x34] sm:$0xf0]  ;;  %v3219_v34 = vor.u32 %v4288_v15, %v3216_v16 }
  0x43   :  { %v3518_v41 = vld [vmem:[#allocation2 + $0x540] sm:$0xf]  ;;  %v4430_v47 = vld [vmem:[#allocation2 + $0x74c] sm:$0xf0]  ;;  %v3391_v48 = vor.u32 %v4334_v40, %v3390_v39  ;;  %1740 = vmatpush.bf16.msrb.mxu2 %v3663_v38  ;;  %v4190_v27 = vld [vmem:[%s4866_s0 + $0x14] sm:$0xf]  ;;  %v3347_v38 = vor.u32 %v4320_v18, %v3344_v20 }
  0x44   :  { %v3646_v44 = vld [vmem:[#allocation2 + $0x640] sm:$0xf]  ;;  %v3519_v50 = vor.u32 %v4366_v43, %v3518_v41  ;;  %v4330_v52 = vld [vmem:[#allocation2 + $0x42c] sm:$0xf0]  ;;  %1754 = vmatpush.bf16.msrb.mxu3 %v3791_v42  ;;  %v2832_v30 = vld [vmem:[%s4866_s0 + $0x30] sm:$0xf0]  ;;  %v4705_v43 = vor.u32 %v4195_v26, %v2838_v25 }
  0x45   :  { %v3774_v46 = vld [vmem:[#allocation2 + $0x740] sm:$0xf]  ;;  %v3647_v51 = vor.u32 %v4398_v45, %v3646_v44  ;;  %v4362_v54 = vld [vmem:[#allocation2 + $0x52c] sm:$0xf0]  ;;  %1713 = vmatpush.bf16.msrb.mxu0 %v3391_v48  ;;  %v4191_v31 = vld [vmem:[%s4866_s0 + $0x1c] sm:$0xf]  ;;  %v4707_v44 = vor.u32 %v4190_v27, %v2832_v30 }
  0x46   :  { %v3374_v49 = vld [vmem:[#allocation2 + $0x420] sm:$0xf]  ;;  %v3775_v55 = vor.u32 %v4430_v47, %v3774_v46  ;;  %v4394_v57 = vld [vmem:[#allocation2 + $0x62c] sm:$0xf0]  ;;  %1727 = vmatpush.bf16.msrb.mxu1 %v3519_v50  ;;  %v2840_v32 = vld [vmem:[%s4866_s0 + $0x38] sm:$0xf0] }
  0x47   :  { %v3502_v53 = vld [vmem:[#allocation2 + $0x520] sm:$0xf]  ;;  %v4426_v60 = vld [vmem:[#allocation2 + $0x72c] sm:$0xf0]  ;;  %v3375_v63 = vor.u32 %v4330_v52, %v3374_v49  ;;  %1741 = vmatpush.bf16.msrb.mxu2 %v3647_v51  ;;  %v4220_v35 = vld [vmem:[#allocation2 + $0xc4] sm:$0xf]  ;;  %v4709_v47 = vor.u32 %v4191_v31, %v2840_v32 }
  0x48   :  { %v3630_v56 = vld [vmem:[#allocation2 + $0x620] sm:$0xf]  ;;  %v4326_v62 = vld [vmem:[#allocation2 + $0x40c] sm:$0xf0]  ;;  %v3503_v5 = vor.u32 %v4362_v54, %v3502_v53  ;;  %1755 = vmatpush.bf16.msrb.mxu3 %v3775_v55  ;;  %v2944_v36 = vld [vmem:[#allocation2 + $0xd0] sm:$0xf0] }
  0x49   :  { %v3758_v59 = vld [vmem:[#allocation2 + $0x720] sm:$0xf]  ;;  %v4358_v2 = vld [vmem:[#allocation2 + $0x50c] sm:$0xf0]  ;;  %v3631_v6 = vor.u32 %v4394_v57, %v3630_v56  ;;  %1714 = vmatpush.bf16.msrb.mxu0 %v3375_v63  ;;  %v4252_v37 = vld [vmem:[#allocation2 + $0x1c4] sm:$0xf]  ;;  %v2947_v48 = vor.u32 %v4220_v35, %v2944_v36 }
  0x4a   :  { %v3358_v61 = vld [vmem:[#allocation2 + $0x400] sm:$0xf]  ;;  %v4390_v4 = vld [vmem:[#allocation2 + $0x60c] sm:$0xf0]  ;;  %v3759_v11 = vor.u32 %v4426_v60, %v3758_v59  ;;  %1728 = vmatpush.bf16.msrb.mxu1 %v3503_v5  ;;  %v3072_v40 = vld [vmem:[#allocation2 + $0x1d0] sm:$0xf0] }
  0x4b   :  { %v3486_v0 = vld [vmem:[#allocation2 + $0x500] sm:$0xf]  ;;  %v4422_v8 = vld [vmem:[#allocation2 + $0x70c] sm:$0xf0]  ;;  %v3359_v19 = vor.u32 %v4326_v62, %v3358_v61  ;;  %1742 = vmatpush.bf16.msrb.mxu2 %v3631_v6  ;;  %v4284_v41 = vld [vmem:[#allocation2 + $0x2c4] sm:$0xf]  ;;  %v3075_v49 = vor.u32 %v4252_v37, %v3072_v40 }
  0x4c   :  { %v3614_v3 = vld [vmem:[#allocation2 + $0x600] sm:$0xf]  ;;  %v2830_v21 = vld [vmem:[%s4866_s0 + $0x10] sm:$0xf]  ;;  %v3487_v23 = vor.u32 %v4358_v2, %v3486_v0  ;;  %1756 = vmatpush.bf16.msrb.mxu3 %v3759_v11  ;;  %v3200_v42 = vld [vmem:[#allocation2 + $0x2d0] sm:$0xf0] }
  0x4d   :  { %v3742_v7 = vld [vmem:[#allocation2 + $0x700] sm:$0xf]  ;;  %v4194_v22 = vld [vmem:[%s4866_s0 + $0x2c] sm:$0xf0]  ;;  %v3615_v24 = vor.u32 %v4390_v4, %v3614_v3  ;;  %1715 = vmatpush.bf16.msrb.mxu0 %v3359_v19  ;;  %v4316_v45 = vld [vmem:[#allocation2 + $0x3c4] sm:$0xf]  ;;  %v3203_v50 = vor.u32 %v4284_v41, %v3200_v42 }
  0x4e   :  { %v3743_v28 = vor.u32 %v4422_v8, %v3742_v7  ;;  %v4703_v39 = vor.u32 %v4194_v22, %v2830_v21  ;;  %1729 = vmatpush.bf16.msrb.mxu1 %v3487_v23  ;;  %v3328_v46 = vld [vmem:[#allocation2 + $0x3d0] sm:$0xf0]  ;;  %v4216_v51 = vld [vmem:[#allocation2 + $0xa4] sm:$0xf] }
  0x4f   :  { %1743 = vmatpush.bf16.msrb.mxu2 %v3615_v24  ;;  %v2928_v52 = vld [vmem:[#allocation2 + $0xb0] sm:$0xf0]  ;;  %v4248_v53 = vld [vmem:[#allocation2 + $0x1a4] sm:$0xf]  ;;  %v3331_v54 = vor.u32 %v4316_v45, %v3328_v46 }
  0x50   :  { %1757 = vmatpush.bf16.msrb.mxu3 %v3743_v28  ;;  %1716 = vmatmul.bf16.vlgmr.msrb.gmra.mxu0 %v4703_v39  ;;  %v3056_v55 = vld [vmem:[#allocation2 + $0x1b0] sm:$0xf0]  ;;  %v4280_v56 = vld [vmem:[#allocation2 + $0x2a4] sm:$0xf]  ;;  %v2931_v61 = vor.u32 %v4216_v51, %v2928_v52 }
  0x51   :  { %1764 = vmatpush.bf16.msra.mxu0 %v2963_v29  ;;  %v3184_v57 = vld [vmem:[#allocation2 + $0x2b0] sm:$0xf0]  ;;  %1730 = vmatmul.bf16.vlgmr.msrb.gmra.mxu1 %v4707_v44  ;;  %v4312_v59 = vld [vmem:[#allocation2 + $0x3a4] sm:$0xf]  ;;  %v3059_v62 = vor.u32 %v4248_v53, %v3056_v55 }
  0x52   :  { %1778 = vmatpush.bf16.msra.mxu1 %v3091_v33  ;;  %1744 = vmatmul.bf16.vlgmr.msrb.gmra.mxu2 %v4705_v43  ;;  %v3312_v60 = vld [vmem:[#allocation2 + $0x3b0] sm:$0xf0]  ;;  %v3187_v63 = vor.u32 %v4280_v56, %v3184_v57  ;;  %v4212_v0 = vld [vmem:[#allocation2 + $0x84] sm:$0xf] }
  0x53   :  { %1792 = vmatpush.bf16.msra.mxu2 %v3219_v34  ;;  %1758 = vmatmul.bf16.vlgmr.msrb.gmra.mxu3 %v4709_v47  ;;  %v2912_v2 = vld [vmem:[#allocation2 + $0x90] sm:$0xf0]  ;;  %v4244_v3 = vld [vmem:[#allocation2 + $0x184] sm:$0xf]  ;;  %v3315_v4 = vor.u32 %v4312_v59, %v3312_v60 }
  0x54   :  { %1806 = vmatpush.bf16.msra.mxu3 %v3347_v38  ;;  %v3040_v5 = vld [vmem:[#allocation2 + $0x190] sm:$0xf0]  ;;  %v4276_v6 = vld [vmem:[#allocation2 + $0x284] sm:$0xf]  ;;  %v2915_v11 = vor.u32 %v4212_v0, %v2912_v2 }
  0x55   :  { %1765 = vmatpush.bf16.msra.mxu0 %v2947_v48  ;;  %v3168_v7 = vld [vmem:[#allocation2 + $0x290] sm:$0xf0]  ;;  %v4308_v8 = vld [vmem:[#allocation2 + $0x384] sm:$0xf]  ;;  %v3043_v12 = vor.u32 %v4244_v3, %v3040_v5 }
  0x56   :  { %1779 = vmatpush.bf16.msra.mxu1 %v3075_v49  ;;  %v3296_v9 = vld [vmem:[#allocation2 + $0x390] sm:$0xf0]  ;;  %v3171_v13 = vor.u32 %v4276_v6, %v3168_v7  ;;  %v4208_v14 = vld [vmem:[#allocation2 + $0x64] sm:$0xf] }
  0x57   :  { %1793 = vmatpush.bf16.msra.mxu2 %v3203_v50  ;;  %v2896_v15 = vld [vmem:[#allocation2 + $0x70] sm:$0xf0]  ;;  %v4240_v16 = vld [vmem:[#allocation2 + $0x164] sm:$0xf]  ;;  %v3299_v18 = vor.u32 %v4308_v8, %v3296_v9 }
  0x58   :  { %1807 = vmatpush.bf16.msra.mxu3 %v3331_v54  ;;  %v3024_v19 = vld [vmem:[#allocation2 + $0x170] sm:$0xf0]  ;;  %v4272_v20 = vld [vmem:[#allocation2 + $0x264] sm:$0xf]  ;;  %v2899_v24 = vor.u32 %v4208_v14, %v2896_v15 }
  0x59   :  { %1766 = vmatpush.bf16.msra.mxu0 %v2931_v61  ;;  %v3152_v21 = vld [vmem:[#allocation2 + $0x270] sm:$0xf0]  ;;  %v4304_v22 = vld [vmem:[#allocation2 + $0x364] sm:$0xf]  ;;  %v3027_v25 = vor.u32 %v4240_v16, %v3024_v19 }
  0x5a   :  { %1780 = vmatpush.bf16.msra.mxu1 %v3059_v62  ;;  %v3280_v23 = vld [vmem:[#allocation2 + $0x370] sm:$0xf0]  ;;  %v3155_v26 = vor.u32 %v4272_v20, %v3152_v21  ;;  %v4204_v27 = vld [vmem:[#allocation2 + $0x44] sm:$0xf] }
  0x5b   :  { %1794 = vmatpush.bf16.msra.mxu2 %v3187_v63  ;;  %v2880_v28 = vld [vmem:[#allocation2 + $0x50] sm:$0xf0]  ;;  %v4236_v29 = vld [vmem:[#allocation2 + $0x144] sm:$0xf]  ;;  %v3283_v30 = vor.u32 %v4304_v22, %v3280_v23 }
  0x5c   :  { %1808 = vmatpush.bf16.msra.mxu3 %v3315_v4  ;;  %v3008_v31 = vld [vmem:[#allocation2 + $0x150] sm:$0xf0]  ;;  %v4268_v32 = vld [vmem:[#allocation2 + $0x244] sm:$0xf]  ;;  %v2883_v36 = vor.u32 %v4204_v27, %v2880_v28 }
  0x5d   :  { %1767 = vmatpush.bf16.msra.mxu0 %v2915_v11  ;;  %v3136_v33 = vld [vmem:[#allocation2 + $0x250] sm:$0xf0]  ;;  %v4300_v34 = vld [vmem:[#allocation2 + $0x344] sm:$0xf]  ;;  %v3011_v37 = vor.u32 %v4236_v29, %v3008_v31 }
  0x5e   :  { %1781 = vmatpush.bf16.msra.mxu1 %v3043_v12  ;;  %v3264_v35 = vld [vmem:[#allocation2 + $0x350] sm:$0xf0]  ;;  %v3139_v38 = vor.u32 %v4268_v32, %v3136_v33  ;;  %v4200_v40 = vld [vmem:[#allocation2 + $0x24] sm:$0xf] }
  0x5f   :  { %1795 = vmatpush.bf16.msra.mxu2 %v3171_v13  ;;  %v2864_v41 = vld [vmem:[#allocation2 + $0x30] sm:$0xf0]  ;;  %v4232_v42 = vld [vmem:[#allocation2 + $0x124] sm:$0xf]  ;;  %v3267_v45 = vor.u32 %v4300_v34, %v3264_v35 }
  0x60   :  { %1809 = vmatpush.bf16.msra.mxu3 %v3299_v18  ;;  %v2992_v46 = vld [vmem:[#allocation2 + $0x130] sm:$0xf0]  ;;  %v4264_v48 = vld [vmem:[#allocation2 + $0x224] sm:$0xf]  ;;  %v2867_v52 = vor.u32 %v4200_v40, %v2864_v41 }
  0x61   :  { %1768 = vmatpush.bf16.msra.mxu0 %v2899_v24  ;;  %v3120_v49 = vld [vmem:[#allocation2 + $0x230] sm:$0xf0]  ;;  %v4296_v50 = vld [vmem:[#allocation2 + $0x324] sm:$0xf]  ;;  %v2995_v55 = vor.u32 %v4232_v42, %v2992_v46 }
  0x62   :  { %1782 = vmatpush.bf16.msra.mxu1 %v3027_v25  ;;  %v3248_v51 = vld [vmem:[#allocation2 + $0x330] sm:$0xf0]  ;;  %v4196_v53 = vld [vmem:[#allocation2 + $0x4] sm:$0xf]  ;;  %v3123_v56 = vor.u32 %v4264_v48, %v3120_v49 }
  0x63   :  { %1796 = vmatpush.bf16.msra.mxu2 %v3155_v26  ;;  %v2848_v54 = vld [vmem:[#allocation2 + $0x10] sm:$0xf0]  ;;  %v4228_v57 = vld [vmem:[#allocation2 + $0x104] sm:$0xf]  ;;  %v3251_v61 = vor.u32 %v4296_v50, %v3248_v51 }
  0x64   :  { %1810 = vmatpush.bf16.msra.mxu3 %v3283_v30  ;;  %v2976_v59 = vld [vmem:[#allocation2 + $0x110] sm:$0xf0]  ;;  %v4260_v60 = vld [vmem:[#allocation2 + $0x204] sm:$0xf]  ;;  %v2851_v5 = vor.u32 %v4196_v53, %v2848_v54 }
  0x65   :  { %1769 = vmatpush.bf16.msra.mxu0 %v2883_v36  ;;  %v3104_v62 = vld [vmem:[#allocation2 + $0x210] sm:$0xf0]  ;;  %v4292_v63 = vld [vmem:[#allocation2 + $0x304] sm:$0xf]  ;;  %v2979_v9 = vor.u32 %v4228_v57, %v2976_v59 }
  0x66   :  { %1783 = vmatpush.bf16.msra.mxu1 %v3011_v37  ;;  %v3232_v0 = vld [vmem:[#allocation2 + $0x310] sm:$0xf0]  ;;  %v4352_v2 = vld [vmem:[#allocation2 + $0x4e4] sm:$0xf]  ;;  %v3107_v11 = vor.u32 %v4260_v60, %v3104_v62 }
  0x67   :  { %1797 = vmatpush.bf16.msra.mxu2 %v3139_v38  ;;  %v3472_v3 = vld [vmem:[#allocation2 + $0x4f0] sm:$0xf0]  ;;  %v4384_v4 = vld [vmem:[#allocation2 + $0x5e4] sm:$0xf]  ;;  %v3235_v14 = vor.u32 %v4292_v63, %v3232_v0 }
  0x68   :  { %1811 = vmatpush.bf16.msra.mxu3 %v3267_v45  ;;  %v3600_v6 = vld [vmem:[#allocation2 + $0x5f0] sm:$0xf0]  ;;  %v4416_v7 = vld [vmem:[#allocation2 + $0x6e4] sm:$0xf]  ;;  %v3475_v15 = vor.u32 %v4352_v2, %v3472_v3 }
  0x69   :  { %1770 = vmatpush.bf16.msra.mxu0 %v2867_v52  ;;  %v3728_v8 = vld [vmem:[#allocation2 + $0x6f0] sm:$0xf0]  ;;  %v4448_v12 = vld [vmem:[#allocation2 + $0x7e4] sm:$0xf]  ;;  %v3603_v16 = vor.u32 %v4384_v4, %v3600_v6 }
  0x6a   :  { %1784 = vmatpush.bf16.msra.mxu1 %v2995_v55  ;;  %v3856_v13 = vld [vmem:[#allocation2 + $0x7f0] sm:$0xf0]  ;;  %v3731_v18 = vor.u32 %v4416_v7, %v3728_v8  ;;  %v4348_v19 = vld [vmem:[#allocation2 + $0x4c4] sm:$0xf] }
  0x6b   :  { %1798 = vmatpush.bf16.msra.mxu2 %v3123_v56  ;;  %v3456_v20 = vld [vmem:[#allocation2 + $0x4d0] sm:$0xf0]  ;;  %v4380_v21 = vld [vmem:[#allocation2 + $0x5c4] sm:$0xf]  ;;  %v3859_v22 = vor.u32 %v4448_v12, %v3856_v13 }
  0x6c   :  { %1812 = vmatpush.bf16.msra.mxu3 %v3251_v61  ;;  %v3584_v23 = vld [vmem:[#allocation2 + $0x5d0] sm:$0xf0]  ;;  %v4412_v24 = vld [vmem:[#allocation2 + $0x6c4] sm:$0xf]  ;;  %v3459_v28 = vor.u32 %v4348_v19, %v3456_v20 }
  0x6d   :  { %1771 = vmatpush.bf16.msra.mxu0 %v2851_v5  ;;  %v3712_v25 = vld [vmem:[#allocation2 + $0x6d0] sm:$0xf0]  ;;  %v4444_v26 = vld [vmem:[#allocation2 + $0x7c4] sm:$0xf]  ;;  %v3587_v29 = vor.u32 %v4380_v21, %v3584_v23 }
  0x6e   :  { %1785 = vmatpush.bf16.msra.mxu1 %v2979_v9  ;;  %v3840_v27 = vld [vmem:[#allocation2 + $0x7d0] sm:$0xf0]  ;;  %v3715_v30 = vor.u32 %v4412_v24, %v3712_v25  ;;  %v4344_v31 = vld [vmem:[#allocation2 + $0x4a4] sm:$0xf] }
  0x6f   :  { %1799 = vmatpush.bf16.msra.mxu2 %v3107_v11  ;;  %v3440_v32 = vld [vmem:[#allocation2 + $0x4b0] sm:$0xf0]  ;;  %v4376_v33 = vld [vmem:[#allocation2 + $0x5a4] sm:$0xf]  ;;  %v3843_v34 = vor.u32 %v4444_v26, %v3840_v27 }
  0x70   :  { %1813 = vmatpush.bf16.msra.mxu3 %v3235_v14  ;;  %v3568_v35 = vld [vmem:[#allocation2 + $0x5b0] sm:$0xf0]  ;;  %v4408_v36 = vld [vmem:[#allocation2 + $0x6a4] sm:$0xf]  ;;  %1772 = vmatmul.bf16.vlgmr.msra.gmra.mxu0 %v4652_v58  ;;  %v3443_v41 = vor.u32 %v4344_v31, %v3440_v32 }
  0x71   :  { %1820 = vmatpush.bf16.msrb.mxu0 %v3475_v15  ;;  %v3696_v37 = vld [vmem:[#allocation2 + $0x6b0] sm:$0xf0]  ;;  %v4440_v38 = vld [vmem:[#allocation2 + $0x7a4] sm:$0xf]  ;;  %1786 = vmatmul.bf16.vlgmr.msra.gmra.mxu1 %v4670_v10  ;;  %v3571_v42 = vor.u32 %v4376_v33, %v3568_v35 }
  0x72   :  { %1834 = vmatpush.bf16.msrb.mxu1 %v3603_v16  ;;  %v3824_v40 = vld [vmem:[#allocation2 + $0x7b0] sm:$0xf0]  ;;  %1800 = vmatmul.bf16.vlgmr.msra.gmra.mxu2 %v4657_v1  ;;  %v3699_v45 = vor.u32 %v4408_v36, %v3696_v37  ;;  %v4340_v46 = vld [vmem:[#allocation2 + $0x484] sm:$0xf] }
  0x73   :  { %1848 = vmatpush.bf16.msrb.mxu2 %v3731_v18  ;;  %1814 = vmatmul.bf16.vlgmr.msra.gmra.mxu3 %v4675_v17  ;;  %v3424_v48 = vld [vmem:[#allocation2 + $0x490] sm:$0xf0]  ;;  %v4372_v49 = vld [vmem:[#allocation2 + $0x584] sm:$0xf]  ;;  %v3827_v50 = vor.u32 %v4440_v38, %v3824_v40 }
  0x74   :  { %1862 = vmatpush.bf16.msrb.mxu3 %v3859_v22  ;;  %v3552_v51 = vld [vmem:[#allocation2 + $0x590] sm:$0xf0]  ;;  %v4404_v52 = vld [vmem:[#allocation2 + $0x684] sm:$0xf]  ;;  %v3427_v56 = vor.u32 %v4340_v46, %v3424_v48  ;;  %v2966_v48 = vld [vmem:[#allocation2 + $0xe8] sm:$0xf] }
  0x75   :  { %1821 = vmatpush.bf16.msrb.mxu0 %v3459_v28  ;;  %v3680_v53 = vld [vmem:[#allocation2 + $0x690] sm:$0xf0]  ;;  %v4436_v54 = vld [vmem:[#allocation2 + $0x784] sm:$0xf]  ;;  %v3555_v57 = vor.u32 %v4372_v49, %v3552_v51  ;;  %v4227_v49 = vld [vmem:[#allocation2 + $0xf4] sm:$0xf0] }
  0x76   :  { %1835 = vmatpush.bf16.msrb.mxu1 %v3587_v29  ;;  %v3808_v55 = vld [vmem:[#allocation2 + $0x790] sm:$0xf0]  ;;  %v3683_v59 = vor.u32 %v4404_v52, %v3680_v53  ;;  %v4336_v60 = vld [vmem:[#allocation2 + $0x464] sm:$0xf]  ;;  %v4259_v52 = vld [vmem:[#allocation2 + $0x1f4] sm:$0xf0] }
  0x77   :  { %1849 = vmatpush.bf16.msrb.mxu2 %v3715_v30  ;;  %v3408_v61 = vld [vmem:[#allocation2 + $0x470] sm:$0xf0]  ;;  %v4368_v62 = vld [vmem:[#allocation2 + $0x564] sm:$0xf]  ;;  %v3811_v63 = vor.u32 %v4436_v54, %v3808_v55  ;;  %v3222_v53 = vld [vmem:[#allocation2 + $0x2e8] sm:$0xf] }
  0x78   :  { %1863 = vmatpush.bf16.msrb.mxu3 %v3843_v34  ;;  %v3536_v0 = vld [vmem:[#allocation2 + $0x570] sm:$0xf0]  ;;  %v4400_v2 = vld [vmem:[#allocation2 + $0x664] sm:$0xf]  ;;  %v3411_v6 = vor.u32 %v4336_v60, %v3408_v61  ;;  %v4291_v54 = vld [vmem:[#allocation2 + $0x2f4] sm:$0xf0]  ;;  %v2967_v61 = vor.u32 %v4227_v49, %v2966_v48 }
  0x79   :  { %1822 = vmatpush.bf16.msrb.mxu0 %v3443_v41  ;;  %v3664_v3 = vld [vmem:[#allocation2 + $0x670] sm:$0xf0]  ;;  %v4432_v4 = vld [vmem:[#allocation2 + $0x764] sm:$0xf]  ;;  %v3539_v7 = vor.u32 %v4368_v62, %v3536_v0  ;;  %v2950_v0 = vld [vmem:[#allocation2 + $0xc8] sm:$0xf] }
  0x7a   :  { %1836 = vmatpush.bf16.msrb.mxu1 %v3571_v42  ;;  %v3792_v5 = vld [vmem:[#allocation2 + $0x770] sm:$0xf0]  ;;  %v3667_v8 = vor.u32 %v4400_v2, %v3664_v3  ;;  %v4332_v9 = vld [vmem:[#allocation2 + $0x444] sm:$0xf]  ;;  %v4223_v2 = vld [vmem:[#allocation2 + $0xd4] sm:$0xf0] }
  0x7b   :  { %1850 = vmatpush.bf16.msrb.mxu2 %v3699_v45  ;;  %v3392_v11 = vld [vmem:[#allocation2 + $0x450] sm:$0xf0]  ;;  %v4364_v12 = vld [vmem:[#allocation2 + $0x544] sm:$0xf]  ;;  %v3795_v13 = vor.u32 %v4432_v4, %v3792_v5  ;;  %v3078_v3 = vld [vmem:[#allocation2 + $0x1c8] sm:$0xf] }
  0x7c   :  { %1864 = vmatpush.bf16.msrb.mxu3 %v3827_v50  ;;  %v3520_v14 = vld [vmem:[#allocation2 + $0x550] sm:$0xf0]  ;;  %v4396_v15 = vld [vmem:[#allocation2 + $0x644] sm:$0xf]  ;;  %v3395_v20 = vor.u32 %v4332_v9, %v3392_v11  ;;  %v3094_v50 = vld [vmem:[#allocation2 + $0x1e8] sm:$0xf]  ;;  %v2951_v11 = vor.u32 %v4223_v2, %v2950_v0 }
  0x7d   :  { %1823 = vmatpush.bf16.msrb.mxu0 %v3427_v56  ;;  %v3648_v16 = vld [vmem:[#allocation2 + $0x650] sm:$0xf0]  ;;  %v4428_v18 = vld [vmem:[#allocation2 + $0x744] sm:$0xf]  ;;  %v3523_v21 = vor.u32 %v4364_v12, %v3520_v14  ;;  %v3095_v62 = vor.u32 %v4259_v52, %v3094_v50  ;;  %v4255_v5 = vld [vmem:[#allocation2 + $0x1d4] sm:$0xf0] }
  0x7e   :  { %1837 = vmatpush.bf16.msrb.mxu1 %v3555_v57  ;;  %v3776_v19 = vld [vmem:[#allocation2 + $0x750] sm:$0xf0]  ;;  %v3651_v22 = vor.u32 %v4396_v15, %v3648_v16  ;;  %v4328_v23 = vld [vmem:[#allocation2 + $0x424] sm:$0xf]  ;;  %v3350_v57 = vld [vmem:[#allocation2 + $0x3e8] sm:$0xf]  ;;  %v3079_v12 = vor.u32 %v4255_v5, %v3078_v3 }
  0x7f   :  { %1851 = vmatpush.bf16.msrb.mxu2 %v3683_v59  ;;  %v3376_v24 = vld [vmem:[#allocation2 + $0x430] sm:$0xf0]  ;;  %v4360_v25 = vld [vmem:[#allocation2 + $0x524] sm:$0xf]  ;;  %v3779_v26 = vor.u32 %v4428_v18, %v3776_v19  ;;  %v4323_v59 = vld [vmem:[#allocation2 + $0x3f4] sm:$0xf0] }
  0x80   :  { %1865 = vmatpush.bf16.msrb.mxu3 %v3811_v63  ;;  %v3504_v27 = vld [vmem:[#allocation2 + $0x530] sm:$0xf0]  ;;  %v4392_v28 = vld [vmem:[#allocation2 + $0x624] sm:$0xf]  ;;  %v3379_v32 = vor.u32 %v4328_v23, %v3376_v24  ;;  %v3223_v63 = vor.u32 %v4291_v54, %v3222_v53  ;;  %v3351_v4 = vor.u32 %v4323_v59, %v3350_v57  ;;  %v4319_v9 = vld [vmem:[#allocation2 + $0x3d4] sm:$0xf0] }
  0x81   :  { %1824 = vmatpush.bf16.msrb.mxu0 %v3411_v6  ;;  %v3632_v29 = vld [vmem:[#allocation2 + $0x630] sm:$0xf0]  ;;  %v4424_v30 = vld [vmem:[#allocation2 + $0x724] sm:$0xf]  ;;  %v3507_v35 = vor.u32 %v4360_v25, %v3504_v27  ;;  %v3206_v6 = vld [vmem:[#allocation2 + $0x2c8] sm:$0xf] }
  0x82   :  { %1838 = vmatpush.bf16.msrb.mxu1 %v3539_v7  ;;  %v3760_v31 = vld [vmem:[#allocation2 + $0x730] sm:$0xf0]  ;;  %v4324_v33 = vld [vmem:[#allocation2 + $0x404] sm:$0xf]  ;;  %v3635_v36 = vor.u32 %v4392_v28, %v3632_v29  ;;  %v4287_v7 = vld [vmem:[#allocation2 + $0x2d4] sm:$0xf0] }
  0x83   :  { %1852 = vmatpush.bf16.msrb.mxu2 %v3667_v8  ;;  %v3360_v34 = vld [vmem:[#allocation2 + $0x410] sm:$0xf0]  ;;  %v4356_v37 = vld [vmem:[#allocation2 + $0x504] sm:$0xf]  ;;  %v3763_v41 = vor.u32 %v4424_v30, %v3760_v31  ;;  %v3334_v8 = vld [vmem:[#allocation2 + $0x3c8] sm:$0xf] }
  0x84   :  { %1866 = vmatpush.bf16.msrb.mxu3 %v3795_v13  ;;  %v3488_v38 = vld [vmem:[#allocation2 + $0x510] sm:$0xf0]  ;;  %v4388_v40 = vld [vmem:[#allocation2 + $0x604] sm:$0xf]  ;;  %v3363_v51 = vor.u32 %v4324_v33, %v3360_v34  ;;  %v3207_v13 = vor.u32 %v4287_v7, %v3206_v6  ;;  %v2934_v14 = vld [vmem:[#allocation2 + $0xa8] sm:$0xf]  ;;  %v3335_v18 = vor.u32 %v4319_v9, %v3334_v8 }
  0x85   :  { %1825 = vmatpush.bf16.msrb.mxu0 %v3395_v20  ;;  %v3616_v42 = vld [vmem:[#allocation2 + $0x610] sm:$0xf0]  ;;  %v4420_v45 = vld [vmem:[#allocation2 + $0x704] sm:$0xf]  ;;  %v3491_v55 = vor.u32 %v4356_v37, %v3488_v38  ;;  %v4219_v15 = vld [vmem:[#allocation2 + $0xb4] sm:$0xf0] }
  0x86   :  { %1839 = vmatpush.bf16.msrb.mxu1 %v3523_v21  ;;  %v3744_v46 = vld [vmem:[#allocation2 + $0x710] sm:$0xf0]  ;;  %v3619_v56 = vor.u32 %v4388_v40, %v3616_v42  ;;  %v3062_v16 = vld [vmem:[#allocation2 + $0x1a8] sm:$0xf]  ;;  %v4251_v19 = vld [vmem:[#allocation2 + $0x1b4] sm:$0xf0]  ;;  %v2935_v24 = vor.u32 %v4219_v15, %v2934_v14 }
  0x87   :  { %1853 = vmatpush.bf16.msrb.mxu2 %v3651_v22  ;;  %v3747_v60 = vor.u32 %v4420_v45, %v3744_v46  ;;  %v3190_v20 = vld [vmem:[#allocation2 + $0x2a8] sm:$0xf]  ;;  %v4283_v21 = vld [vmem:[#allocation2 + $0x2b4] sm:$0xf0]  ;;  %v3063_v25 = vor.u32 %v4251_v19, %v3062_v16 }
  0x88   :  { %1867 = vmatpush.bf16.msrb.mxu3 %v3779_v26  ;;  %v3318_v22 = vld [vmem:[#allocation2 + $0x3a8] sm:$0xf]  ;;  %v4315_v23 = vld [vmem:[#allocation2 + $0x3b4] sm:$0xf0]  ;;  %v3191_v26 = vor.u32 %v4283_v21, %v3190_v20 }
  0x89   :  { %1826 = vmatpush.bf16.msrb.mxu0 %v3379_v32  ;;  %v2918_v27 = vld [vmem:[#allocation2 + $0x88] sm:$0xf]  ;;  %v4215_v28 = vld [vmem:[#allocation2 + $0x94] sm:$0xf0]  ;;  %v3319_v30 = vor.u32 %v4315_v23, %v3318_v22 }
  0x8a   :  { %1840 = vmatpush.bf16.msrb.mxu1 %v3507_v35  ;;  %v3046_v29 = vld [vmem:[#allocation2 + $0x188] sm:$0xf]  ;;  %v4247_v31 = vld [vmem:[#allocation2 + $0x194] sm:$0xf0] }
  0x8b   :  { %1854 = vmatpush.bf16.msrb.mxu2 %v3635_v36  ;;  %v3174_v32 = vld [vmem:[#allocation2 + $0x288] sm:$0xf]  ;;  %v4279_v33 = vld [vmem:[#allocation2 + $0x294] sm:$0xf0]  ;;  %v2919_v36 = vor.u32 %v4215_v28, %v2918_v27  ;;  %v3047_v37 = vor.u32 %v4247_v31, %v3046_v29 }
  0x8c   :  { %1868 = vmatpush.bf16.msrb.mxu3 %v3763_v41  ;;  %v3302_v34 = vld [vmem:[#allocation2 + $0x388] sm:$0xf]  ;;  %v4311_v35 = vld [vmem:[#allocation2 + $0x394] sm:$0xf0]  ;;  %v3175_v38 = vor.u32 %v4279_v33, %v3174_v32 }
  0x8d   :  { %1827 = vmatpush.bf16.msrb.mxu0 %v3363_v51  ;;  %v2902_v40 = vld [vmem:[#allocation2 + $0x68] sm:$0xf]  ;;  %v4211_v41 = vld [vmem:[#allocation2 + $0x74] sm:$0xf0]  ;;  %v3303_v45 = vor.u32 %v4311_v35, %v3302_v34 }
  0x8e   :  { %1841 = vmatpush.bf16.msrb.mxu1 %v3491_v55  ;;  %v3030_v42 = vld [vmem:[#allocation2 + $0x168] sm:$0xf]  ;;  %v4243_v46 = vld [vmem:[#allocation2 + $0x174] sm:$0xf0]  ;;  %v2903_v52 = vor.u32 %v4211_v41, %v2902_v40 }
  0x8f   :  { %1855 = vmatpush.bf16.msrb.mxu2 %v3619_v56  ;;  %v3158_v48 = vld [vmem:[#allocation2 + $0x268] sm:$0xf]  ;;  %v4275_v49 = vld [vmem:[#allocation2 + $0x274] sm:$0xf0]  ;;  %v3031_v53 = vor.u32 %v4243_v46, %v3030_v42 }
  0x90   :  { %1869 = vmatpush.bf16.msrb.mxu3 %v3747_v60  ;;  %1828 = vmatmul.bf16.vlgmr.msrb.gmra.mxu0 %v4703_v39  ;;  %v3286_v50 = vld [vmem:[#allocation2 + $0x368] sm:$0xf]  ;;  %v4307_v51 = vld [vmem:[#allocation2 + $0x374] sm:$0xf0]  ;;  %v3159_v54 = vor.u32 %v4275_v49, %v3158_v48 }
  0x91   :  { %1876 = vmatpush.bf16.msra.mxu0 %v2967_v61  ;;  %1842 = vmatmul.bf16.vlgmr.msrb.gmra.mxu1 %v4707_v44  ;;  %v2886_v55 = vld [vmem:[#allocation2 + $0x48] sm:$0xf]  ;;  %v4207_v56 = vld [vmem:[#allocation2 + $0x54] sm:$0xf0]  ;;  %v3287_v59 = vor.u32 %v4307_v51, %v3286_v50 }
  0x92   :  { %1890 = vmatpush.bf16.msra.mxu1 %v3095_v62  ;;  %1856 = vmatmul.bf16.vlgmr.msrb.gmra.mxu2 %v4705_v43  ;;  %v3014_v57 = vld [vmem:[#allocation2 + $0x148] sm:$0xf]  ;;  %v4239_v60 = vld [vmem:[#allocation2 + $0x154] sm:$0xf0]  ;;  %v2887_v2 = vor.u32 %v4207_v56, %v2886_v55 }
  0x93   :  { %1904 = vmatpush.bf16.msra.mxu2 %v3223_v63  ;;  %1870 = vmatmul.bf16.vlgmr.msrb.gmra.mxu3 %v4709_v47  ;;  %v3142_v61 = vld [vmem:[#allocation2 + $0x248] sm:$0xf]  ;;  %v4271_v62 = vld [vmem:[#allocation2 + $0x254] sm:$0xf0]  ;;  %v3015_v3 = vor.u32 %v4239_v60, %v3014_v57 }
  0x94   :  { %1918 = vmatpush.bf16.msra.mxu3 %v3351_v4  ;;  %v3270_v63 = vld [vmem:[#allocation2 + $0x348] sm:$0xf]  ;;  %v4303_v0 = vld [vmem:[#allocation2 + $0x354] sm:$0xf0]  ;;  %v3143_v4 = vor.u32 %v4271_v62, %v3142_v61 }
  0x95   :  { %1877 = vmatpush.bf16.msra.mxu0 %v2951_v11  ;;  %v2870_v5 = vld [vmem:[#allocation2 + $0x28] sm:$0xf]  ;;  %v4203_v6 = vld [vmem:[#allocation2 + $0x34] sm:$0xf0]  ;;  %v3271_v8 = vor.u32 %v4303_v0, %v3270_v63 }
  0x96   :  { %1891 = vmatpush.bf16.msra.mxu1 %v3079_v12  ;;  %v2998_v7 = vld [vmem:[#allocation2 + $0x128] sm:$0xf]  ;;  %v4235_v9 = vld [vmem:[#allocation2 + $0x134] sm:$0xf0]  ;;  %v2871_v15 = vor.u32 %v4203_v6, %v2870_v5 }
  0x97   :  { %1905 = vmatpush.bf16.msra.mxu2 %v3207_v13  ;;  %v3126_v11 = vld [vmem:[#allocation2 + $0x228] sm:$0xf]  ;;  %v4267_v12 = vld [vmem:[#allocation2 + $0x234] sm:$0xf0]  ;;  %v2999_v19 = vor.u32 %v4235_v9, %v2998_v7 }
  0x98   :  { %1919 = vmatpush.bf16.msra.mxu3 %v3335_v18  ;;  %v3254_v13 = vld [vmem:[#allocation2 + $0x328] sm:$0xf]  ;;  %v4299_v14 = vld [vmem:[#allocation2 + $0x334] sm:$0xf0]  ;;  %v3127_v20 = vor.u32 %v4267_v12, %v3126_v11 }
  0x99   :  { %1878 = vmatpush.bf16.msra.mxu0 %v2935_v24  ;;  %v2854_v16 = vld [vmem:[#allocation2 + $0x8] sm:$0xf]  ;;  %v4199_v18 = vld [vmem:[#allocation2 + $0x14] sm:$0xf0]  ;;  %v3255_v24 = vor.u32 %v4299_v14, %v3254_v13 }
  0x9a   :  { %1892 = vmatpush.bf16.msra.mxu1 %v3063_v25  ;;  %v2982_v21 = vld [vmem:[#allocation2 + $0x108] sm:$0xf]  ;;  %v4231_v22 = vld [vmem:[#allocation2 + $0x114] sm:$0xf0]  ;;  %v2855_v31 = vor.u32 %v4199_v18, %v2854_v16 }
  0x9b   :  { %1906 = vmatpush.bf16.msra.mxu2 %v3191_v26  ;;  %v3110_v23 = vld [vmem:[#allocation2 + $0x208] sm:$0xf]  ;;  %v4263_v25 = vld [vmem:[#allocation2 + $0x214] sm:$0xf0]  ;;  %v2983_v35 = vor.u32 %v4231_v22, %v2982_v21 }
  0x9c   :  { %1920 = vmatpush.bf16.msra.mxu3 %v3319_v30  ;;  %v3238_v26 = vld [vmem:[#allocation2 + $0x308] sm:$0xf]  ;;  %v4295_v27 = vld [vmem:[#allocation2 + $0x314] sm:$0xf0] }
  0x9d   :  { %1879 = vmatpush.bf16.msra.mxu0 %v2919_v36  ;;  %v3478_v28 = vld [vmem:[#allocation2 + $0x4e8] sm:$0xf]  ;;  %v4355_v29 = vld [vmem:[#allocation2 + $0x4f4] sm:$0xf0]  ;;  %v3111_v36 = vor.u32 %v4263_v25, %v3110_v23  ;;  %v3239_v40 = vor.u32 %v4295_v27, %v3238_v26 }
  0x9e   :  { %1893 = vmatpush.bf16.msra.mxu1 %v3047_v37  ;;  %v3606_v30 = vld [vmem:[#allocation2 + $0x5e8] sm:$0xf]  ;;  %v4387_v32 = vld [vmem:[#allocation2 + $0x5f4] sm:$0xf0]  ;;  %v3479_v41 = vor.u32 %v4355_v29, %v3478_v28 }
  0x9f   :  { %1907 = vmatpush.bf16.msra.mxu2 %v3175_v38  ;;  %v3734_v33 = vld [vmem:[#allocation2 + $0x6e8] sm:$0xf]  ;;  %v4419_v34 = vld [vmem:[#allocation2 + $0x6f4] sm:$0xf0]  ;;  %v3607_v42 = vor.u32 %v4387_v32, %v3606_v30 }
  0xa0   :  { %1921 = vmatpush.bf16.msra.mxu3 %v3303_v45  ;;  %v3862_v37 = vld [vmem:[#allocation2 + $0x7e8] sm:$0xf]  ;;  %v4451_v38 = vld [vmem:[#allocation2 + $0x7f4] sm:$0xf0]  ;;  %v3735_v45 = vor.u32 %v4419_v34, %v3734_v33 }
  0xa1   :  { %1880 = vmatpush.bf16.msra.mxu0 %v2903_v52  ;;  %v3462_v46 = vld [vmem:[#allocation2 + $0x4c8] sm:$0xf]  ;;  %v4351_v48 = vld [vmem:[#allocation2 + $0x4d4] sm:$0xf0]  ;;  %v3863_v50 = vor.u32 %v4451_v38, %v3862_v37 }
  0xa2   :  { %1894 = vmatpush.bf16.msra.mxu1 %v3031_v53  ;;  %v3590_v49 = vld [vmem:[#allocation2 + $0x5c8] sm:$0xf]  ;;  %v4383_v51 = vld [vmem:[#allocation2 + $0x5d4] sm:$0xf0]  ;;  %v3463_v56 = vor.u32 %v4351_v48, %v3462_v46 }
  0xa3   :  { %1908 = vmatpush.bf16.msra.mxu2 %v3159_v54  ;;  %v3718_v52 = vld [vmem:[#allocation2 + $0x6c8] sm:$0xf]  ;;  %v4415_v53 = vld [vmem:[#allocation2 + $0x6d4] sm:$0xf0]  ;;  %v3591_v57 = vor.u32 %v4383_v51, %v3590_v49 }
  0xa4   :  { %1922 = vmatpush.bf16.msra.mxu3 %v3287_v59  ;;  %v3846_v54 = vld [vmem:[#allocation2 + $0x7c8] sm:$0xf]  ;;  %v4447_v55 = vld [vmem:[#allocation2 + $0x7d4] sm:$0xf0]  ;;  %v3719_v59 = vor.u32 %v4415_v53, %v3718_v52 }
  0xa5   :  { %1881 = vmatpush.bf16.msra.mxu0 %v2887_v2  ;;  %v3446_v60 = vld [vmem:[#allocation2 + $0x4a8] sm:$0xf]  ;;  %v4347_v61 = vld [vmem:[#allocation2 + $0x4b4] sm:$0xf0]  ;;  %v3847_v63 = vor.u32 %v4447_v55, %v3846_v54 }
  0xa6   :  { %1895 = vmatpush.bf16.msra.mxu1 %v3015_v3  ;;  %v3574_v62 = vld [vmem:[#allocation2 + $0x5a8] sm:$0xf]  ;;  %v4379_v0 = vld [vmem:[#allocation2 + $0x5b4] sm:$0xf0]  ;;  %v3447_v6 = vor.u32 %v4347_v61, %v3446_v60 }
  0xa7   :  { %1909 = vmatpush.bf16.msra.mxu2 %v3143_v4  ;;  %v3702_v2 = vld [vmem:[#allocation2 + $0x6a8] sm:$0xf]  ;;  %v4411_v3 = vld [vmem:[#allocation2 + $0x6b4] sm:$0xf0]  ;;  %v3575_v7 = vor.u32 %v4379_v0, %v3574_v62 }
  0xa8   :  { %1923 = vmatpush.bf16.msra.mxu3 %v3271_v8  ;;  %v3830_v4 = vld [vmem:[#allocation2 + $0x7a8] sm:$0xf]  ;;  %v4443_v5 = vld [vmem:[#allocation2 + $0x7b4] sm:$0xf0]  ;;  %v3703_v8 = vor.u32 %v4411_v3, %v3702_v2 }
  0xa9   :  { %1882 = vmatpush.bf16.msra.mxu0 %v2871_v15  ;;  %v3430_v9 = vld [vmem:[#allocation2 + $0x488] sm:$0xf]  ;;  %v4343_v11 = vld [vmem:[#allocation2 + $0x494] sm:$0xf0]  ;;  %v3831_v13 = vor.u32 %v4443_v5, %v3830_v4 }
  0xaa   :  { %1896 = vmatpush.bf16.msra.mxu1 %v2999_v19  ;;  %v3558_v12 = vld [vmem:[#allocation2 + $0x588] sm:$0xf]  ;;  %v4375_v14 = vld [vmem:[#allocation2 + $0x594] sm:$0xf0] }
  0xab   :  { %1910 = vmatpush.bf16.msra.mxu2 %v3127_v20  ;;  %v3686_v15 = vld [vmem:[#allocation2 + $0x688] sm:$0xf]  ;;  %v4407_v16 = vld [vmem:[#allocation2 + $0x694] sm:$0xf0]  ;;  %v3431_v20 = vor.u32 %v4343_v11, %v3430_v9  ;;  %v3559_v21 = vor.u32 %v4375_v14, %v3558_v12  ;;  %v4225_v11 = vld [vmem:[#allocation2 + $0xec] sm:$0xf] }
  0xac   :  { %1924 = vmatpush.bf16.msra.mxu3 %v3255_v24  ;;  %v3814_v18 = vld [vmem:[#allocation2 + $0x788] sm:$0xf]  ;;  %v4439_v19 = vld [vmem:[#allocation2 + $0x794] sm:$0xf0]  ;;  %v3687_v22 = vor.u32 %v4407_v16, %v3686_v15  ;;  %v2968_v12 = vld [vmem:[#allocation2 + $0xf8] sm:$0xf0] }
  0xad   :  { %1883 = vmatpush.bf16.msra.mxu0 %v2855_v31  ;;  %v3414_v23 = vld [vmem:[#allocation2 + $0x468] sm:$0xf]  ;;  %v4339_v24 = vld [vmem:[#allocation2 + $0x474] sm:$0xf0]  ;;  %v3815_v26 = vor.u32 %v4439_v19, %v3814_v18  ;;  %v3096_v15 = vld [vmem:[#allocation2 + $0x1f8] sm:$0xf0] }
  0xae   :  { %1897 = vmatpush.bf16.msra.mxu1 %v2983_v35  ;;  %v3542_v25 = vld [vmem:[#allocation2 + $0x568] sm:$0xf]  ;;  %v4371_v27 = vld [vmem:[#allocation2 + $0x574] sm:$0xf0]  ;;  %v3415_v32 = vor.u32 %v4339_v24, %v3414_v23  ;;  %v4289_v16 = vld [vmem:[#allocation2 + $0x2ec] sm:$0xf]  ;;  %v2971_v24 = vor.u32 %v4225_v11, %v2968_v12 }
  0xaf   :  { %1911 = vmatpush.bf16.msra.mxu2 %v3111_v36  ;;  %v3670_v28 = vld [vmem:[#allocation2 + $0x668] sm:$0xf]  ;;  %v4403_v29 = vld [vmem:[#allocation2 + $0x674] sm:$0xf0]  ;;  %v3543_v33 = vor.u32 %v4371_v27, %v3542_v25  ;;  %v3224_v18 = vld [vmem:[#allocation2 + $0x2f8] sm:$0xf0] }
  0xb0   :  { %1925 = vmatpush.bf16.msra.mxu3 %v3239_v40  ;;  %1884 = vmatmul.bf16.vlgmr.msra.gmra.mxu0 %v4652_v58  ;;  %v3798_v30 = vld [vmem:[#allocation2 + $0x768] sm:$0xf]  ;;  %v4435_v31 = vld [vmem:[#allocation2 + $0x774] sm:$0xf0]  ;;  %v3671_v34 = vor.u32 %v4403_v29, %v3670_v28  ;;  %v4221_v27 = vld [vmem:[#allocation2 + $0xcc] sm:$0xf] }
  0xb1   :  { %1932 = vmatpush.bf16.msrb.mxu0 %v3479_v41  ;;  %1898 = vmatmul.bf16.vlgmr.msra.gmra.mxu1 %v4670_v10  ;;  %v3398_v35 = vld [vmem:[#allocation2 + $0x448] sm:$0xf]  ;;  %v4335_v36 = vld [vmem:[#allocation2 + $0x454] sm:$0xf0]  ;;  %v3799_v38 = vor.u32 %v4435_v31, %v3798_v30  ;;  %v2952_v28 = vld [vmem:[#allocation2 + $0xd8] sm:$0xf0] }
  0xb2   :  { %1946 = vmatpush.bf16.msrb.mxu1 %v3607_v42  ;;  %1912 = vmatmul.bf16.vlgmr.msra.gmra.mxu2 %v4657_v1  ;;  %v3526_v37 = vld [vmem:[#allocation2 + $0x548] sm:$0xf]  ;;  %v4367_v40 = vld [vmem:[#allocation2 + $0x554] sm:$0xf0]  ;;  %v3399_v48 = vor.u32 %v4335_v36, %v3398_v35  ;;  %v4253_v29 = vld [vmem:[#allocation2 + $0x1cc] sm:$0xf]  ;;  %v2955_v36 = vor.u32 %v4221_v27, %v2952_v28 }
  0xb3   :  { %1960 = vmatpush.bf16.msrb.mxu2 %v3735_v45  ;;  %1926 = vmatmul.bf16.vlgmr.msra.gmra.mxu3 %v4675_v17  ;;  %v3654_v41 = vld [vmem:[#allocation2 + $0x648] sm:$0xf]  ;;  %v4399_v42 = vld [vmem:[#allocation2 + $0x654] sm:$0xf0]  ;;  %v3527_v49 = vor.u32 %v4367_v40, %v3526_v37  ;;  %v3080_v31 = vld [vmem:[#allocation2 + $0x1d8] sm:$0xf0] }
  0xb4   :  { %1974 = vmatpush.bf16.msrb.mxu3 %v3863_v50  ;;  %v3782_v45 = vld [vmem:[#allocation2 + $0x748] sm:$0xf]  ;;  %v4431_v46 = vld [vmem:[#allocation2 + $0x754] sm:$0xf0]  ;;  %v3655_v50 = vor.u32 %v4399_v42, %v3654_v41  ;;  %v3336_v35 = vld [vmem:[#allocation2 + $0x3d8] sm:$0xf0]  ;;  %v3083_v37 = vor.u32 %v4253_v29, %v3080_v31 }
  0xb5   :  { %1933 = vmatpush.bf16.msrb.mxu0 %v3463_v56  ;;  %v3382_v51 = vld [vmem:[#allocation2 + $0x428] sm:$0xf]  ;;  %v4331_v52 = vld [vmem:[#allocation2 + $0x434] sm:$0xf0]  ;;  %v3783_v54 = vor.u32 %v4431_v46, %v3782_v45  ;;  %v4217_v40 = vld [vmem:[#allocation2 + $0xac] sm:$0xf] }
  0xb6   :  { %1947 = vmatpush.bf16.msrb.mxu1 %v3591_v57  ;;  %v3510_v53 = vld [vmem:[#allocation2 + $0x528] sm:$0xf]  ;;  %v4363_v55 = vld [vmem:[#allocation2 + $0x534] sm:$0xf0]  ;;  %v3383_v61 = vor.u32 %v4331_v52, %v3382_v51  ;;  %v2936_v41 = vld [vmem:[#allocation2 + $0xb8] sm:$0xf0] }
  0xb7   :  { %1961 = vmatpush.bf16.msrb.mxu2 %v3719_v59  ;;  %v3638_v56 = vld [vmem:[#allocation2 + $0x628] sm:$0xf]  ;;  %v4395_v57 = vld [vmem:[#allocation2 + $0x634] sm:$0xf0]  ;;  %v3511_v0 = vor.u32 %v4363_v55, %v3510_v53  ;;  %v4249_v42 = vld [vmem:[#allocation2 + $0x1ac] sm:$0xf]  ;;  %v2939_v52 = vor.u32 %v4217_v40, %v2936_v41 }
  0xb8   :  { %1975 = vmatpush.bf16.msrb.mxu3 %v3847_v63  ;;  %v3766_v59 = vld [vmem:[#allocation2 + $0x728] sm:$0xf]  ;;  %v4427_v60 = vld [vmem:[#allocation2 + $0x734] sm:$0xf0]  ;;  %v3639_v2 = vor.u32 %v4395_v57, %v3638_v56  ;;  %v3064_v46 = vld [vmem:[#allocation2 + $0x1b8] sm:$0xf0] }
  0xb9   :  { %1934 = vmatpush.bf16.msrb.mxu0 %v3447_v6  ;;  %v3366_v62 = vld [vmem:[#allocation2 + $0x408] sm:$0xf]  ;;  %v4327_v63 = vld [vmem:[#allocation2 + $0x414] sm:$0xf0]  ;;  %v3767_v6 = vor.u32 %v4427_v60, %v3766_v59  ;;  %v3320_v51 = vld [vmem:[#allocation2 + $0x3b8] sm:$0xf0]  ;;  %v3067_v53 = vor.u32 %v4249_v42, %v3064_v46 }
  0xba   :  { %1948 = vmatpush.bf16.msrb.mxu1 %v3575_v7  ;;  %v3494_v3 = vld [vmem:[#allocation2 + $0x508] sm:$0xf]  ;;  %v4359_v4 = vld [vmem:[#allocation2 + $0x514] sm:$0xf0]  ;;  %v3367_v14 = vor.u32 %v4327_v63, %v3366_v62  ;;  %v4213_v55 = vld [vmem:[#allocation2 + $0x8c] sm:$0xf] }
  0xbb   :  { %1962 = vmatpush.bf16.msrb.mxu2 %v3703_v8  ;;  %v3622_v5 = vld [vmem:[#allocation2 + $0x608] sm:$0xf]  ;;  %v4391_v7 = vld [vmem:[#allocation2 + $0x614] sm:$0xf0]  ;;  %v3495_v19 = vor.u32 %v4359_v4, %v3494_v3  ;;  %v2920_v56 = vld [vmem:[#allocation2 + $0x98] sm:$0xf0]  ;;  %v4731_v3 = vpop.f32.mrf.mxu0 }
  0xbc   :  { %1976 = vmatpush.bf16.msrb.mxu3 %v3831_v13  ;;  %v3750_v8 = vld [vmem:[#allocation2 + $0x708] sm:$0xf]  ;;  %v4423_v9 = vld [vmem:[#allocation2 + $0x714] sm:$0xf0]  ;;  %v4257_v13 = vld [vmem:[#allocation2 + $0x1ec] sm:$0xf] }
  0xbd   :  { %1935 = vmatpush.bf16.msrb.mxu0 %v3431_v20  ;;  %v3623_v20 = vor.u32 %v4391_v7, %v3622_v5  ;;  %v3751_v23 = vor.u32 %v4423_v9, %v3750_v8  ;;  %v3099_v25 = vor.u32 %v4257_v13, %v3096_v15  ;;  %v4245_v57 = vld [vmem:[#allocation2 + $0x18c] sm:$0xf]  ;;  %v3048_v60 = vld [vmem:[#allocation2 + $0x198] sm:$0xf0]  ;;  %v4733_v9 = vpop.f32.mrf.mxu1 }
  0xbe   :  { %1949 = vmatpush.bf16.msrb.mxu1 %v3559_v21  ;;  %v4321_v21 = vld [vmem:[#allocation2 + $0x3ec] sm:$0xf]  ;;  %v3176_v62 = vld [vmem:[#allocation2 + $0x298] sm:$0xf0]  ;;  %v3051_v4 = vor.u32 %v4245_v57, %v3048_v60 }
  0xbf   :  { %1963 = vmatpush.bf16.msrb.mxu2 %v3687_v22  ;;  %v3352_v22 = vld [vmem:[#allocation2 + $0x3f8] sm:$0xf0]  ;;  %v4309_v63 = vld [vmem:[#allocation2 + $0x38c] sm:$0xf] }
  0xc0   :  { %1977 = vmatpush.bf16.msrb.mxu3 %v3815_v26  ;;  %v3227_v26 = vor.u32 %v4289_v16, %v3224_v18  ;;  %v3355_v30 = vor.u32 %v4321_v21, %v3352_v22  ;;  %v2904_v7 = vld [vmem:[#allocation2 + $0x78] sm:$0xf0]  ;;  %v4241_v8 = vld [vmem:[#allocation2 + $0x16c] sm:$0xf] }
  0xc1   :  { %1936 = vmatpush.bf16.msrb.mxu0 %v3415_v32  ;;  %v4285_v32 = vld [vmem:[#allocation2 + $0x2cc] sm:$0xf]  ;;  %v3032_v12 = vld [vmem:[#allocation2 + $0x178] sm:$0xf0] }
  0xc2   :  { %1950 = vmatpush.bf16.msrb.mxu1 %v3543_v33  ;;  %v3208_v33 = vld [vmem:[#allocation2 + $0x2d8] sm:$0xf0]  ;;  %v4273_v13 = vld [vmem:[#allocation2 + $0x26c] sm:$0xf] }
  0xc3   :  { %1964 = vmatpush.bf16.msrb.mxu2 %v3671_v34  ;;  %v4317_v34 = vld [vmem:[#allocation2 + $0x3cc] sm:$0xf]  ;;  %v3288_v16 = vld [vmem:[#allocation2 + $0x378] sm:$0xf0] }
  0xc4   :  { %1978 = vmatpush.bf16.msrb.mxu3 %v3799_v38  ;;  %v3211_v38 = vor.u32 %v4285_v32, %v3208_v33  ;;  %v3339_v45 = vor.u32 %v4317_v34, %v3336_v35  ;;  %v4305_v15 = vld [vmem:[#allocation2 + $0x36c] sm:$0xf]  ;;  %v2888_v22 = vld [vmem:[#allocation2 + $0x58] sm:$0xf0]  ;;  %v4737_v32 = vpop.f32.mrf.mxu3 }
  0xc5   :  { %1937 = vmatpush.bf16.msrb.mxu0 %v3399_v48  ;;  %v4281_v48 = vld [vmem:[#allocation2 + $0x2ac] sm:$0xf]  ;;  %v3144_v27 = vld [vmem:[#allocation2 + $0x258] sm:$0xf0] }
  0xc6   :  { %1951 = vmatpush.bf16.msrb.mxu1 %v3527_v49  ;;  %v3192_v49 = vld [vmem:[#allocation2 + $0x2b8] sm:$0xf0]  ;;  %v4205_v21 = vld [vmem:[#allocation2 + $0x4c] sm:$0xf] }
  0xc7   :  { %1965 = vmatpush.bf16.msrb.mxu2 %v3655_v50  ;;  %v4313_v50 = vld [vmem:[#allocation2 + $0x3ac] sm:$0xf]  ;;  %v3272_v29 = vld [vmem:[#allocation2 + $0x358] sm:$0xf0]  ;;  %v2891_v31 = vor.u32 %v4205_v21, %v2888_v22 }
  0xc8   :  { %1979 = vmatpush.bf16.msrb.mxu3 %v3783_v54  ;;  %v3195_v54 = vor.u32 %v4281_v48, %v3192_v49  ;;  %v3323_v59 = vor.u32 %v4313_v50, %v3320_v51  ;;  %v4301_v28 = vld [vmem:[#allocation2 + $0x34c] sm:$0xf]  ;;  %v3000_v40 = vld [vmem:[#allocation2 + $0x138] sm:$0xf0]  ;;  %v4741_v49 = vpop.f32.mrf.mxu1 }
  0xc9   :  { %1938 = vmatpush.bf16.msrb.mxu0 %v3383_v61  ;;  %v4277_v61 = vld [vmem:[#allocation2 + $0x28c] sm:$0xf]  ;;  %v3128_v42 = vld [vmem:[#allocation2 + $0x238] sm:$0xf0] }
  0xca   :  { %1952 = vmatpush.bf16.msrb.mxu1 %v3511_v0  ;;  %v3304_v0 = vld [vmem:[#allocation2 + $0x398] sm:$0xf0]  ;;  %v3179_v5 = vor.u32 %v4277_v61, %v3176_v62  ;;  %v4201_v35 = vld [vmem:[#allocation2 + $0x2c] sm:$0xf] }
  0xcb   :  { %1966 = vmatpush.bf16.msrb.mxu2 %v3639_v2  ;;  %v2923_v2 = vor.u32 %v4213_v55, %v2920_v56  ;;  %v3307_v11 = vor.u32 %v4309_v63, %v3304_v0  ;;  %v4265_v41 = vld [vmem:[#allocation2 + $0x22c] sm:$0xf]  ;;  %v3256_v48 = vld [vmem:[#allocation2 + $0x338] sm:$0xf0] }
  0xcc   :  { %1980 = vmatpush.bf16.msrb.mxu3 %v3767_v6  ;;  %v4209_v6 = vld [vmem:[#allocation2 + $0x6c] sm:$0xf]  ;;  %v2984_v56 = vld [vmem:[#allocation2 + $0x118] sm:$0xf0] }
  0xcd   :  { %1939 = vmatpush.bf16.msrb.mxu0 %v3367_v14  ;;  %v3160_v14 = vld [vmem:[#allocation2 + $0x278] sm:$0xf0]  ;;  %v2907_v18 = vor.u32 %v4209_v6, %v2904_v7  ;;  %v4297_v46 = vld [vmem:[#allocation2 + $0x32c] sm:$0xf] }
  0xce   :  { %1953 = vmatpush.bf16.msrb.mxu1 %v3495_v19  ;;  %v3035_v19 = vor.u32 %v4241_v8, %v3032_v12  ;;  %v4197_v51 = vld [vmem:[#allocation2 + $0xc] sm:$0xf]  ;;  %v3112_v60 = vld [vmem:[#allocation2 + $0x218] sm:$0xf0] }
  0xcf   :  { %1967 = vmatpush.bf16.msrb.mxu2 %v3623_v20  ;;  %v3163_v20 = vor.u32 %v4273_v13, %v3160_v14  ;;  %v4229_v55 = vld [vmem:[#allocation2 + $0x10c] sm:$0xf]  ;;  %v3240_v62 = vld [vmem:[#allocation2 + $0x318] sm:$0xf0] }
  0xd0   :  { %1981 = vmatpush.bf16.msrb.mxu3 %v3751_v23  ;;  %1940 = vmatmul.bf16.vlgmr.msrb.gmra.mxu0 %v4703_v39  ;;  %v4237_v23 = vld [vmem:[#allocation2 + $0x14c] sm:$0xf]  ;;  %v3480_v0 = vld [vmem:[#allocation2 + $0x4f8] sm:$0xf0]  ;;  %v2987_v8 = vor.u32 %v4229_v55, %v2984_v56 }
  0xd1   :  { %1988 = vmatpush.bf16.msra.mxu0 %v2971_v24  ;;  %1954 = vmatmul.bf16.vlgmr.msrb.gmra.mxu1 %v4707_v44  ;;  %v3291_v24 = vor.u32 %v4305_v15, %v3288_v16  ;;  %v4261_v57 = vld [vmem:[#allocation2 + $0x20c] sm:$0xf]  ;;  %v3736_v7 = vld [vmem:[#allocation2 + $0x6f8] sm:$0xf0] }
  0xd2   :  { %2002 = vmatpush.bf16.msra.mxu1 %v3099_v25  ;;  %1968 = vmatmul.bf16.vlgmr.msrb.gmra.mxu2 %v4705_v43  ;;  %v3016_v25 = vld [vmem:[#allocation2 + $0x158] sm:$0xf0]  ;;  %v4293_v61 = vld [vmem:[#allocation2 + $0x30c] sm:$0xf] }
  0xd3   :  { %2016 = vmatpush.bf16.msra.mxu2 %v3227_v26  ;;  %1982 = vmatmul.bf16.vlgmr.msrb.gmra.mxu3 %v4709_v47  ;;  %v4269_v26 = vld [vmem:[#allocation2 + $0x24c] sm:$0xf]  ;;  %v3019_v33 = vor.u32 %v4237_v23, %v3016_v25  ;;  %v3864_v13 = vld [vmem:[#allocation2 + $0x7f8] sm:$0xf0]  ;;  %v3243_v15 = vor.u32 %v4293_v61, %v3240_v62 }
  0xd4   :  { %2030 = vmatpush.bf16.msra.mxu3 %v3355_v30  ;;  %v4735_v30 = vpop.f32.mrf.mxu2  ;;  %v3147_v34 = vor.u32 %v4269_v26, %v3144_v27  ;;  %v4353_v63 = vld [vmem:[#allocation2 + $0x4ec] sm:$0xf]  ;;  %v3464_v22 = vld [vmem:[#allocation2 + $0x4d8] sm:$0xf0] }
  0xd5   :  { %1989 = vmatpush.bf16.msra.mxu0 %v2955_v36  ;;  %v2872_v36 = vld [vmem:[#allocation2 + $0x38] sm:$0xf0]  ;;  %v4417_v6 = vld [vmem:[#allocation2 + $0x6ec] sm:$0xf]  ;;  %v3483_v16 = vor.u32 %v4353_v63, %v3480_v0 }
  0xd6   :  { %2003 = vmatpush.bf16.msra.mxu1 %v3083_v37  ;;  %v4233_v37 = vld [vmem:[#allocation2 + $0x12c] sm:$0xf]  ;;  %v2875_v50 = vor.u32 %v4201_v35, %v2872_v36  ;;  %v3592_v25 = vld [vmem:[#allocation2 + $0x5d8] sm:$0xf0] }
  0xd7   :  { %2017 = vmatpush.bf16.msra.mxu2 %v3211_v38  ;;  %v3275_v38 = vor.u32 %v4301_v28, %v3272_v29  ;;  %v4449_v12 = vld [vmem:[#allocation2 + $0x7ec] sm:$0xf]  ;;  %v3720_v27 = vld [vmem:[#allocation2 + $0x6d8] sm:$0xf0] }
  0xd8   :  { %2031 = vmatpush.bf16.msra.mxu3 %v3339_v45  ;;  %v4739_v45 = vpop.f32.mrf.mxu0  ;;  %v4349_v21 = vld [vmem:[#allocation2 + $0x4cc] sm:$0xf]  ;;  %v3432_v56 = vld [vmem:[#allocation2 + $0x498] sm:$0xf0] }
  0xd9   :  { %1990 = vmatpush.bf16.msra.mxu0 %v2939_v52  ;;  %v2856_v52 = vld [vmem:[#allocation2 + $0x18] sm:$0xf0]  ;;  %v4381_v23 = vld [vmem:[#allocation2 + $0x5cc] sm:$0xf] }
  0xda   :  { %2004 = vmatpush.bf16.msra.mxu1 %v3067_v53  ;;  %v3003_v53 = vor.u32 %v4233_v37, %v3000_v40  ;;  %v4413_v26 = vld [vmem:[#allocation2 + $0x6cc] sm:$0xf]  ;;  %v3595_v35 = vor.u32 %v4381_v23, %v3592_v25  ;;  %v3816_v63 = vld [vmem:[#allocation2 + $0x798] sm:$0xf0] }
  0xdb   :  { %2018 = vmatpush.bf16.msra.mxu2 %v3195_v54  ;;  %v3131_v54 = vor.u32 %v4265_v41, %v3128_v42  ;;  %v4445_v29 = vld [vmem:[#allocation2 + $0x7cc] sm:$0xf]  ;;  %v3723_v36 = vor.u32 %v4413_v26, %v3720_v27  ;;  %v3576_v42 = vld [vmem:[#allocation2 + $0x5b8] sm:$0xf0] }
  0xdc   :  { %2032 = vmatpush.bf16.msra.mxu3 %v3323_v59  ;;  %v3259_v59 = vor.u32 %v4297_v46, %v3256_v48  ;;  %v4743_v14 = vpop.f32.mrf.mxu2  ;;  %v4345_v37 = vld [vmem:[#allocation2 + $0x4ac] sm:$0xf]  ;;  %v3704_v48 = vld [vmem:[#allocation2 + $0x6b8] sm:$0xf0] }
  0xdd   :  { %1991 = vmatpush.bf16.msra.mxu0 %v2923_v2  ;;  %v4385_v2 = vld [vmem:[#allocation2 + $0x5ec] sm:$0xf]  ;;  %v3400_v25 = vld [vmem:[#allocation2 + $0x458] sm:$0xf0] }
  0xde   :  { %2005 = vmatpush.bf16.msra.mxu1 %v3051_v4  ;;  %v2859_v4 = vor.u32 %v4197_v51, %v2856_v52  ;;  %v4377_v40 = vld [vmem:[#allocation2 + $0x5ac] sm:$0xf]  ;;  %v3832_v51 = vld [vmem:[#allocation2 + $0x7b8] sm:$0xf0] }
  0xdf   :  { %2019 = vmatpush.bf16.msra.mxu2 %v3179_v5  ;;  %v3608_v5 = vld [vmem:[#allocation2 + $0x5f8] sm:$0xf0]  ;;  %v4409_v46 = vld [vmem:[#allocation2 + $0x6ac] sm:$0xf] }
  0xe0   :  { %2033 = vmatpush.bf16.msra.mxu3 %v3307_v11  ;;  %v3115_v11 = vor.u32 %v4261_v57, %v3112_v60  ;;  %v4747_v28 = vpop.f32.mrf.mxu0  ;;  %v4341_v55 = vld [vmem:[#allocation2 + $0x48c] sm:$0xf]  ;;  %v3560_v60 = vld [vmem:[#allocation2 + $0x598] sm:$0xf0] }
  0xe1   :  { %1992 = vmatpush.bf16.msra.mxu0 %v2907_v18  ;;  %v4745_v18 = vpop.f32.mrf.mxu3  ;;  %v4405_v61 = vld [vmem:[#allocation2 + $0x68c] sm:$0xf] }
  0xe2   :  { %2006 = vmatpush.bf16.msra.mxu1 %v3035_v19  ;;  %v3611_v19 = vor.u32 %v4385_v2, %v3608_v5  ;;  %v4337_v5 = vld [vmem:[#allocation2 + $0x46c] sm:$0xf] }
  0xe3   :  { %2020 = vmatpush.bf16.msra.mxu2 %v3163_v20  ;;  %v3739_v20 = vor.u32 %v4417_v6, %v3736_v7  ;;  %v3416_v6 = vld [vmem:[#allocation2 + $0x478] sm:$0xf0]  ;;  %v4369_v7 = vld [vmem:[#allocation2 + $0x56c] sm:$0xf] }
  0xe4   :  { %2034 = vmatpush.bf16.msra.mxu3 %v3291_v24  ;;  %v3867_v24 = vor.u32 %v4449_v12, %v3864_v13  ;;  %v4755_v57 = vpop.f32.mrf.mxu2  ;;  %v3544_v12 = vld [vmem:[#allocation2 + $0x578] sm:$0xf0]  ;;  %v4401_v13 = vld [vmem:[#allocation2 + $0x66c] sm:$0xf] }
  0xe5   :  { %1993 = vmatpush.bf16.msra.mxu0 %v2891_v31  ;;  %v3848_v31 = vld [vmem:[#allocation2 + $0x7d8] sm:$0xf0]  ;;  %v4365_v26 = vld [vmem:[#allocation2 + $0x54c] sm:$0xf] }
  0xe6   :  { %2007 = vmatpush.bf16.msra.mxu1 %v3019_v33  ;;  %v4749_v33 = vpop.f32.mrf.mxu1  ;;  %v3851_v41 = vor.u32 %v4445_v29, %v3848_v31  ;;  %v3528_v29 = vld [vmem:[#allocation2 + $0x558] sm:$0xf0]  ;;  %v4397_v31 = vld [vmem:[#allocation2 + $0x64c] sm:$0xf] }
  0xe7   :  { %2021 = vmatpush.bf16.msra.mxu2 %v3147_v34  ;;  %v3467_v34 = vor.u32 %v4349_v21, %v3464_v22  ;;  %v3419_v21 = vor.u32 %v4337_v5, %v3416_v6  ;;  %v3547_v22 = vor.u32 %v4369_v7, %v3544_v12  ;;  %v4357_v5 = vld [vmem:[#allocation2 + $0x50c] sm:$0xf]  ;;  %v3496_v6 = vld [vmem:[#allocation2 + $0x518] sm:$0xf0] }
  0xe8   :  { %2035 = vmatpush.bf16.msra.mxu3 %v3275_v38  ;;  %v3448_v38 = vld [vmem:[#allocation2 + $0x4b8] sm:$0xf0]  ;;  %v4759_v0 = vpop.f32.mrf.mxu0  ;;  %v4389_v12 = vld [vmem:[#allocation2 + $0x60c] sm:$0xf] }
  0xe9   :  { %1994 = vmatpush.bf16.msra.mxu0 %v2875_v50  ;;  %v4441_v50 = vld [vmem:[#allocation2 + $0x7ac] sm:$0xf]  ;;  %v3451_v52 = vor.u32 %v4345_v37, %v3448_v38  ;;  %v4757_v62 = vpop.f32.mrf.mxu3 }
  0xea   :  { %2008 = vmatpush.bf16.msra.mxu1 %v3003_v53  ;;  %v3579_v53 = vor.u32 %v4377_v40, %v3576_v42  ;;  %v3531_v42 = vor.u32 %v4365_v26, %v3528_v29 }
  0xeb   :  { %2022 = vmatpush.bf16.msra.mxu2 %v3131_v54  ;;  %v3707_v54 = vor.u32 %v4409_v46, %v3704_v48 }
  0xec   :  { %2036 = vmatpush.bf16.msra.mxu3 %v3259_v59  ;;  %v3835_v59 = vor.u32 %v4441_v50, %v3832_v51  ;;  %v4769_v38 = vpop.f32.mrf.mxu2  ;;  %v4329_v50 = vld [vmem:[#allocation2 + $0x42c] sm:$0xf]  ;;  %v3384_v51 = vld [vmem:[#allocation2 + $0x438] sm:$0xf0] }
  0xed   :  { %1995 = vmatpush.bf16.msra.mxu0 %v2859_v4 }
  0xee   :  { %2009 = vmatpush.bf16.msra.mxu1 %v2987_v8  ;;  %v4761_v8 = vpop.f32.mrf.mxu1 }
  0xef   :  { %2023 = vmatpush.bf16.msra.mxu2 %v3115_v11 }
  0xf0   :  { %2037 = vmatpush.bf16.msra.mxu3 %v3243_v15  ;;  %1996 = vmatmul.bf16.vlgmr.msra.gmra.mxu0 %v4652_v58  ;;  %v3688_v58 = vld [vmem:[#allocation2 + $0x698] sm:$0xf0]  ;;  %v1773_v48 = vpop.f32.mrf.mxu0 }
  0xf1   :  { %2044 = vmatpush.bf16.msrb.mxu0 %v3483_v16  ;;  %2010 = vmatmul.bf16.vlgmr.msra.gmra.mxu1 %v4670_v10  ;;  %v3435_v10 = vor.u32 %v4341_v55, %v3432_v56  ;;  %v3691_v4 = vor.u32 %v4405_v61, %v3688_v58  ;;  %v3672_v15 = vld [vmem:[#allocation2 + $0x678] sm:$0xf0]  ;;  %v4433_v16 = vld [vmem:[#allocation2 + $0x76c] sm:$0xf] }
  0xf2   :  { %2058 = vmatpush.bf16.msrb.mxu1 %v3611_v19  ;;  %2024 = vmatmul.bf16.vlgmr.msra.gmra.mxu2 %v4657_v1  ;;  %v4373_v1 = vld [vmem:[#allocation2 + $0x58c] sm:$0xf]  ;;  %v3800_v19 = vld [vmem:[#allocation2 + $0x778] sm:$0xf0]  ;;  %v3675_v23 = vor.u32 %v4401_v13, %v3672_v15 }
  0xf3   :  { %2072 = vmatpush.bf16.msrb.mxu2 %v3739_v20  ;;  %2038 = vmatmul.bf16.vlgmr.msra.gmra.mxu3 %v4675_v17  ;;  %v4437_v17 = vld [vmem:[#allocation2 + $0x78c] sm:$0xf]  ;;  %v3563_v2 = vor.u32 %v4373_v1, %v3560_v60  ;;  %v4766_v20 = vld [vmem:[%s4868_s2] sm:$0xf]  ;;  %v3803_v27 = vor.u32 %v4433_v16, %v3800_v19  ;;  %v3512_v55 = vld [vmem:[#allocation2 + $0x538] sm:$0xf0] }
  0xf4   :  { %2086 = vmatpush.bf16.msrb.mxu3 %v3867_v24  ;;  %v3819_v11 = vor.u32 %v4437_v17, %v3816_v63  ;;  %v4333_v24 = vld [vmem:[#allocation2 + $0x44c] sm:$0xf]  ;;  %v324_v37 = vperm.slane %v4766_v20, 0  ;;  %v3640_v1 = vld [vmem:[#allocation2 + $0x638] sm:$0xf0]  ;;  %v325_v60 = vperm.slane %v4766_v20, 1  ;;  %v3387_v17 = vor.u32 %v4329_v50, %v3384_v51 }
  0xf5   :  { %2045 = vmatpush.bf16.msrb.mxu0 %v3467_v34  ;;  %v3656_v34 = vld [vmem:[#allocation2 + $0x658] sm:$0xf0]  ;;  %v3403_v40 = vor.u32 %v4333_v24, %v3400_v25  ;;  %v4393_v56 = vld [vmem:[#allocation2 + $0x62c] sm:$0xf]  ;;  %v4483_v24 = vld [vmem:[#allocation4 + $0xf4] sm:$0xf0]  ;;  %v1801_v25 = vpop.f32.mrf.mxu2 }
  0xf6   :  { %2059 = vmatpush.bf16.msrb.mxu1 %v3595_v35  ;;  %v4429_v35 = vld [vmem:[#allocation2 + $0x74c] sm:$0xf]  ;;  %v3659_v46 = vor.u32 %v4397_v31, %v3656_v34  ;;  %v3768_v58 = vld [vmem:[#allocation2 + $0x738] sm:$0xf0]  ;;  %v1774_v16 = vadd.f32 %v1773_v48, %v325_v60  ;;  %v3982_v48 = vld [vmem:[#allocation4 + $0xe0] sm:$0xf] }
  0xf7   :  { %2073 = vmatpush.bf16.msrb.mxu2 %v3723_v36  ;;  %v3784_v36 = vld [vmem:[#allocation2 + $0x758] sm:$0xf0]  ;;  %v4425_v61 = vld [vmem:[#allocation2 + $0x72c] sm:$0xf]  ;;  %v4481_v50 = vld [vmem:[#allocation4 + $0xe4] sm:$0xf0] }
  0xf8   :  { %2087 = vmatpush.bf16.msrb.mxu3 %v3851_v41  ;;  %v4771_v41 = vpop.f32.mrf.mxu3  ;;  %v4325_v63 = vld [vmem:[#allocation2 + $0x40c] sm:$0xf]  ;;  %v3624_v13 = vld [vmem:[#allocation2 + $0x618] sm:$0xf0] }
  0xf9   :  { %2046 = vmatpush.bf16.msrb.mxu0 %v3451_v52  ;;  %v4361_v52 = vld [vmem:[#allocation2 + $0x52c] sm:$0xf]  ;;  %v3752_v19 = vld [vmem:[#allocation2 + $0x718] sm:$0xf0] }
  0xfa   :  { %2060 = vmatpush.bf16.msrb.mxu1 %v3579_v53  ;;  %v1664_v53 = vadd.f32 %v4739_v45, %v324_v37  ;;  %v3368_v45 = vld [vmem:[#allocation2 + $0x418] sm:$0xf0]  ;;  %v4421_v15 = vld [vmem:[#allocation2 + $0x70c] sm:$0xf] }
  0xfb   :  { %2074 = vmatpush.bf16.msrb.mxu2 %v3707_v54  ;;  %v3787_v54 = vor.u32 %v4429_v35, %v3784_v36  ;;  %v3755_v34 = vor.u32 %v4421_v15, %v3752_v19  ;;  %v3958_v15 = vld [vmem:[#allocation4 + $0xb0] sm:$0xf] }
  0xfc   :  { %2088 = vmatpush.bf16.msrb.mxu3 %v3835_v59  ;;  %v1787_v59 = vpop.f32.mrf.mxu1  ;;  %v1678_v7 = vadd.f32 %v4741_v49, %v1664_v53  ;;  %v3627_v49 = vor.u32 %v4389_v12, %v3624_v13  ;;  %v3894_v12 = vld [vmem:[#allocation4 + $0x30] sm:$0xf]  ;;  %v4459_v13 = vld [vmem:[#allocation4 + $0x34] sm:$0xf0] }
  0xfd   :  { %2047 = vmatpush.bf16.msrb.mxu0 %v3435_v10  ;;  %v1662_v10 = vadd.f32 %v4731_v3, %v324_v37  ;;  %v3371_v3 = vor.u32 %v4325_v63, %v3368_v45  ;;  %v1788_v36 = vadd.f32 %v1787_v59, %v1774_v16  ;;  %v4479_v59 = vld [vmem:[#allocation4 + $0xd4] sm:$0xf0] }
  0xfe   :  { %2061 = vmatpush.bf16.msrb.mxu1 %v3563_v2  ;;  %v3515_v2 = vor.u32 %v4361_v52, %v3512_v55  ;;  %v1692_v31 = vadd.f32 %v4743_v14, %v1678_v7  ;;  %v3983_v55 = vor.u32 %v4481_v50, %v3982_v48  ;;  %v4475_v16 = vld [vmem:[#allocation4 + $0xb4] sm:$0xf0]  ;;  %v3942_v50 = vld [vmem:[#allocation4 + $0x90] sm:$0xf] }
  0xff   :  { %2075 = vmatpush.bf16.msrb.mxu2 %v3691_v4  ;;  %v3643_v4 = vor.u32 %v4393_v56, %v3640_v1  ;;  %v1676_v26 = vadd.f32 %v4733_v9, %v1662_v10  ;;  %v1802_v53 = vadd.f32 %v1801_v25, %v1788_v36  ;;  %v3910_v56 = vld [vmem:[#allocation4 + $0x50] sm:$0xf]  ;;  %v4463_v1 = vld [vmem:[#allocation4 + $0x54] sm:$0xf0]  ;;  %v3950_v25 = vld [vmem:[#allocation4 + $0xa0] sm:$0xf] }
 0x100   :  { %2089 = vmatpush.bf16.msrb.mxu3 %v3819_v11  ;;  %v3771_v11 = vor.u32 %v4425_v61, %v3768_v58  ;;  %v1815_v29 = vpop.f32.mrf.mxu3  ;;  %v1706_v52 = vadd.f32 %v4745_v18, %v1692_v31  ;;  %v3911_v18 = vor.u32 %v4463_v1, %v3910_v56  ;;  %v1803_v58 = vpop.f32.mrf.mxu2  ;;  %v4455_v48 = vld [vmem:[#allocation4 + $0x14] sm:$0xf0]  ;;  %v4453_v56 = vld [vmem:[#allocation4 + $0x4] sm:$0xf0] }
 0x101   :  { %2048 = vmatpush.bf16.msrb.mxu0 %v3419_v21  ;;  %v3926_v21 = vld [vmem:[#allocation4 + $0x70] sm:$0xf]  ;;  %v1690_v9 = vadd.f32 %v4735_v30, %v1676_v26 }
 0x102   :  { %2062 = vmatpush.bf16.msrb.mxu1 %v3547_v22  ;;  %v4467_v22 = vld [vmem:[#allocation4 + $0x74] sm:$0xf0]  ;;  %v3974_v30 = vld [vmem:[#allocation4 + $0xd0] sm:$0xf] }
 0x103   :  { %2076 = vmatpush.bf16.msrb.mxu2 %v3675_v23  ;;  %v3990_v23 = vld [vmem:[#allocation4 + $0xf0] sm:$0xf]  ;;  %v3927_v35 = vor.u32 %v4467_v22, %v3926_v21  ;;  %v1704_v61 = vadd.f32 %v4737_v32, %v1690_v9  ;;  %v3975_v63 = vor.u32 %v4479_v59, %v3974_v30  ;;  %v4471_v9 = vld [vmem:[#allocation4 + $0x94] sm:$0xf0] }
 0x104   :  { %2090 = vmatpush.bf16.msrb.mxu3 %v3803_v27  ;;  %v3499_v27 = vor.u32 %v4357_v5, %v3496_v6  ;;  %v3991_v37 = vor.u32 %v4483_v24, %v3990_v23  ;;  %v1789_v51 = vpop.f32.mrf.mxu1  ;;  %v3959_v23 = vor.u32 %v4475_v16, %v3958_v15  ;;  %v3886_v24 = vld [vmem:[#allocation4 + $0x20] sm:$0xf]  ;;  %v3943_v59 = vor.u32 %v4471_v9, %v3942_v50  ;;  %v3984_v15 = vld [vmem:[#allocation4 + $0xe8] sm:$0xf0]  ;;  %v4489_v50 = vld [vmem:[#allocation4 + $0x124] sm:$0xf0] }
 0x105   :  { %2049 = vmatpush.bf16.msrb.mxu0 %v3403_v40  ;;  %v1775_v40 = vpop.f32.mrf.mxu0  ;;  %v1718_v45 = vadd.f32 %v4747_v28, %v1704_v61  ;;  %v3895_v28 = vor.u32 %v4459_v13, %v3894_v12  ;;  %v3934_v61 = vld [vmem:[#allocation4 + $0x80] sm:$0xf]  ;;  %v4480_v13 = vld [vmem:[#allocation4 + $0xe4] sm:$0xf] }
 0x106   :  { %2063 = vmatpush.bf16.msrb.mxu1 %v3531_v42  ;;  %v3918_v42 = vld [vmem:[#allocation4 + $0x60] sm:$0xf] }
 0x107   :  { %2077 = vmatpush.bf16.msrb.mxu2 %v3659_v46  ;;  %v4465_v46 = vld [vmem:[#allocation4 + $0x64] sm:$0xf0]  ;;  %v1732_v19 = vadd.f32 %v4749_v33, %v1718_v45 }
 0x108   :  { %2091 = vmatpush.bf16.msrb.mxu3 %v3787_v54  ;;  %v3919_v14 = vor.u32 %v4465_v46, %v3918_v42  ;;  %v1776_v54 = vadd.f32 %v1775_v40, %v325_v60  ;;  %v1817_v10 = vpop.f32.mrf.mxu3  ;;  %v3878_v46 = vld [vmem:[#allocation4 + $0x10] sm:$0xf] }
 0x109   :  { %2050 = vmatpush.bf16.msrb.mxu0 %v3387_v17  ;;  %v1720_v17 = vadd.f32 %v4759_v0, %v1706_v52  ;;  %v1746_v31 = vadd.f32 %v4755_v57, %v1732_v19  ;;  %v4046_v52 = vld [vmem:[#allocation4 + $0x160] sm:$0xf] }
 0x10a   :  { %2064 = vmatpush.bf16.msrb.mxu1 %v3515_v2  ;;  %v1790_v60 = vadd.f32 %v1789_v51, %v1776_v54  ;;  %v3902_v2 = vld [vmem:[#allocation4 + $0x40] sm:$0xf]  ;;  %v3879_v54 = vor.u32 %v4455_v48, %v3878_v46  ;;  %v3968_v46 = vld [vmem:[#allocation4 + $0xc8] sm:$0xf0] }
 0x10b   :  { %2078 = vmatpush.bf16.msrb.mxu2 %v3643_v4  ;;  %v3966_v4 = vld [vmem:[#allocation4 + $0xc0] sm:$0xf]  ;;  %v1734_v6 = vadd.f32 %v4761_v8, %v1720_v17  ;;  %v4457_v8 = vld [vmem:[#allocation4 + $0x24] sm:$0xf0]  ;;  %v1760_v57 = vadd.f32 %v4757_v62, %v1746_v31  ;;  %v3912_v31 = vld [vmem:[#allocation4 + $0x58] sm:$0xf0] }
 0x10c   :  { %2092 = vmatpush.bf16.msrb.mxu3 %v3771_v11  ;;  %v1804_v7 = vadd.f32 %v1803_v58, %v1790_v60  ;;  %v3887_v36 = vor.u32 %v4457_v8, %v3886_v24  ;;  %v4466_v58 = vld [vmem:[#allocation4 + $0x74] sm:$0xf]  ;;  %v4038_v60 = vld [vmem:[#allocation4 + $0x150] sm:$0xf]  ;;  %v4014_v48 = vld [vmem:[#allocation4 + $0x120] sm:$0xf] }
 0x10d   :  { %2051 = vmatpush.bf16.msrb.mxu0 %v3371_v3  ;;  %v1829_v5 = vpop.f32.mrf.mxu0  ;;  %v1748_v21 = vadd.f32 %v4769_v38, %v1734_v6  ;;  %v2108_v62 = vmul.f32 0.01, %v1760_v57  ;;  %vm2100_vm1 = vcmp.ge.f32.partialorder %v1760_v57, 0.0 }
 0x10e   :  { %2065 = vmatpush.bf16.msrb.mxu1 %v3499_v27  ;;  %v1818_v22 = vadd.f32 %v1817_v10, %v1804_v7  ;;  %v4473_v27 = vld [vmem:[#allocation4 + $0xa4] sm:$0xf0] }
 0x10f   :  { %2079 = vmatpush.bf16.msrb.mxu2 %v3627_v49  ;;  %v4054_v49 = vld [vmem:[#allocation4 + $0x170] sm:$0xf]  ;;  %v3951_v42 = vor.u32 %v4473_v27, %v3950_v25  ;;  %v2116_v16 = vsel %vm2100_vm1, %v1760_v57, %v2108_v62  ;;  %v3896_v57 = vld [vmem:[#allocation4 + $0x38] sm:$0xf0] }
 0x110   :  { %2093 = vmatpush.bf16.msrb.mxu3 %v3755_v34  ;;  %2052 = vmatmul.bf16.vlgmr.msrb.gmra.mxu0 %v4703_v39  ;;  %v1816_v39 = vadd.f32 %v1815_v29, %v1802_v53  ;;  %v4499_v29 = vld [vmem:[#allocation4 + $0x174] sm:$0xf0]  ;;  %v1762_v34 = vadd.f32 %v4771_v41, %v1748_v21  ;;  %v4030_v21 = vld [vmem:[#allocation4 + $0x140] sm:$0xf]  ;;  %v4022_v25 = vld [vmem:[#allocation4 + $0x130] sm:$0xf] }
 0x111   :  { %2518 = vmatpush.bf16.msra.mxu0 %v3927_v35  ;;  %2066 = vmatmul.bf16.vlgmr.msrb.gmra.mxu1 %v4707_v44  ;;  %v4461_v44 = vld [vmem:[#allocation4 + $0x44] sm:$0xf0]  ;;  %v4055_v38 = vor.u32 %v4499_v29, %v4054_v49  ;;  %v3987_v49 = vor.u32 %v4480_v13, %v3984_v15  ;;  %v4462_v29 = vld [vmem:[#allocation4 + $0x54] sm:$0xf]  ;;  %v4056_v62 = vld [vmem:[#allocation4 + $0x178] sm:$0xf0] }
 0x112   :  { %2532 = vmatpush.bf16.msra.mxu1 %v3991_v37  ;;  %2080 = vmatmul.bf16.vlgmr.msrb.gmra.mxu2 %v4705_v43  ;;  %v4477_v43 = vld [vmem:[#allocation4 + $0xc4] sm:$0xf0]  ;;  %v3903_v32 = vor.u32 %v4461_v44, %v3902_v2  ;;  %v1830_v0 = vadd.f32 %v1829_v5, %v1816_v39  ;;  %vm2104_vm0 = vcmp.ge.f32.partialorder %v1762_v34, 0.0  ;;  %v2112_v53 = vmul.f32 0.01, %v1762_v34 }
 0x113   :  { %2094 = vmatmul.bf16.vlgmr.msrb.gmra.mxu3 %v4709_v47  ;;  %v1843_v47 = vpop.f32.mrf.mxu1  ;;  %v3967_v11 = vor.u32 %v4477_v43, %v3966_v4  ;;  %2546 = vmatpush.bf16.msra.mxu2 %v4055_v38  ;;  %v3928_v39 = vld [vmem:[#allocation4 + $0x78] sm:$0xf0]  ;;  %v4482_v44 = vld [vmem:[#allocation4 + $0xf4] sm:$0xf]  ;;  %v3915_v38 = vor.u32 %v4462_v29, %v3912_v31  ;;  %v4452_v15 = vld [vmem:[#allocation4 + $0x4] sm:$0xf] }
 0x114   :  { %v1844_v3 = vadd.f32 %v1843_v47, %v1830_v0  ;;  %v3992_v4 = vld [vmem:[#allocation4 + $0xf8] sm:$0xf0]  ;;  %v2120_v45 = vsel %vm2104_vm0, %v1762_v34, %v2112_v53  ;;  %v3931_v7 = vor.u32 %v4466_v58, %v3928_v39  ;;  %v4464_v0 = vld [vmem:[#allocation4 + $0x64] sm:$0xf]  ;;  %v4478_v34 = vld [vmem:[#allocation4 + $0xd4] sm:$0xf] }
 0x115   :  { %2519 = vmatpush.bf16.msra.mxu0 %v3919_v14  ;;  %v1857_v26 = vpop.f32.mrf.mxu2  ;;  %v1831_v33 = vpop.f32.mrf.mxu0  ;;  %v4497_v14 = vld [vmem:[#allocation4 + $0x164] sm:$0xf0]  ;;  %v3995_v12 = vor.u32 %v4482_v44, %v3992_v4  ;;  %v4487_v53 = vld [vmem:[#allocation4 + $0x114] sm:$0xf0]  ;;  %v3952_v58 = vld [vmem:[#allocation4 + $0xa8] sm:$0xf0] }
 0x116   :  { %2533 = vmatpush.bf16.msra.mxu1 %v3983_v55  ;;  %v1871_v35 = vpop.f32.mrf.mxu3  ;;  %v1858_v37 = vadd.f32 %v1857_v26, %v1844_v3  ;;  %v1832_v40 = vadd.f32 %v1831_v33, %v1818_v22  ;;  %v4047_v41 = vor.u32 %v4497_v14, %v4046_v52  ;;  %v3870_v55 = vld [vmem:[#allocation4] sm:$0xf]  ;;  %v4493_v3 = vld [vmem:[#allocation4 + $0x144] sm:$0xf0]  ;;  %v4491_v26 = vld [vmem:[#allocation4 + $0x134] sm:$0xf0] }
 0x117   :  { %v3871_v5 = vor.u32 %v4453_v56, %v3870_v55  ;;  %v4031_v8 = vor.u32 %v4493_v3, %v4030_v21  ;;  %v3976_v33 = vld [vmem:[#allocation4 + $0xd8] sm:$0xf0]  ;;  %v4458_v52 = vld [vmem:[#allocation4 + $0x34] sm:$0xf]  ;;  %v4485_v39 = vld [vmem:[#allocation4 + $0x104] sm:$0xf0] }
 0x118   :  { %v1872_v1 = vadd.f32 %v1871_v35, %v1858_v37  ;;  %2547 = vmatpush.bf16.msra.mxu2 %v4047_v41  ;;  %v4023_v35 = vor.u32 %v4491_v26, %v4022_v25  ;;  %v4460_v37 = vld [vmem:[#allocation4 + $0x44] sm:$0xf]  ;;  %v4006_v41 = vld [vmem:[#allocation4 + $0x110] sm:$0xf]  ;;  %v3960_v55 = vld [vmem:[#allocation4 + $0xb8] sm:$0xf0] }
 0x119   :  { %2520 = vmatpush.bf16.msra.mxu0 %v3911_v18  ;;  %v4469_v18 = vld [vmem:[#allocation4 + $0x84] sm:$0xf0]  ;;  %v4007_v56 = vor.u32 %v4487_v53, %v4006_v41  ;;  %v4454_v4 = vld [vmem:[#allocation4 + $0x14] sm:$0xf]  ;;  %v3936_v21 = vld [vmem:[#allocation4 + $0x88] sm:$0xf0] }
 0x11a   :  { %2534 = vmatpush.bf16.msra.mxu1 %v3975_v63  ;;  %v4495_v63 = vld [vmem:[#allocation4 + $0x154] sm:$0xf0]  ;;  %v3935_v6 = vor.u32 %v4469_v18, %v3934_v61  ;;  %vm2101_vm2 = vcmp.ge.f32.partialorder %v1872_v1, 0.0  ;;  %v3888_v61 = vld [vmem:[#allocation4 + $0x28] sm:$0xf0] }
 0x11b   :  { %v1845_v51 = vpop.f32.mrf.mxu1  ;;  %v4039_v43 = vor.u32 %v4495_v63, %v4038_v60  ;;  %v4472_v18 = vld [vmem:[#allocation4 + $0xa4] sm:$0xf]  ;;  %v4498_v63 = vld [vmem:[#allocation4 + $0x174] sm:$0xf]  ;;  %v4040_v3 = vld [vmem:[#allocation4 + $0x158] sm:$0xf0] }
 0x11c   :  { %v1846_v30 = vadd.f32 %v1845_v51, %v1832_v40  ;;  %v3904_v40 = vld [vmem:[#allocation4 + $0x48] sm:$0xf0]  ;;  %v4015_v51 = vor.u32 %v4489_v50, %v4014_v48  ;;  %v3955_v44 = vor.u32 %v4472_v18, %v3952_v58  ;;  %v4492_v29 = vld [vmem:[#allocation4 + $0x144] sm:$0xf]  ;;  %v4486_v41 = vld [vmem:[#allocation4 + $0x114] sm:$0xf] }
 0x11d   :  { %2521 = vmatpush.bf16.msra.mxu0 %v3903_v32  ;;  %v1859_v17 = vpop.f32.mrf.mxu2  ;;  %v2109_v32 = vmul.f32 0.01, %v1872_v1  ;;  %2548 = vmatpush.bf16.msra.mxu2 %v4039_v43  ;;  %v3907_v9 = vor.u32 %v4460_v37, %v3904_v40  ;;  %v3880_v43 = vld [vmem:[#allocation4 + $0x18] sm:$0xf0]  ;;  %v4032_v31 = vld [vmem:[#allocation4 + $0x148] sm:$0xf0] }
 0x11e   :  { %2535 = vmatpush.bf16.msra.mxu1 %v3967_v11  ;;  %v1860_v10 = vadd.f32 %v1859_v17, %v1846_v30  ;;  %v1873_v2 = vpop.f32.mrf.mxu3  ;;  %v3920_v11 = vld [vmem:[#allocation4 + $0x68] sm:$0xf0]  ;;  %v3998_v17 = vld [vmem:[#allocation4 + $0x100] sm:$0xf]  ;;  %v4024_v37 = vld [vmem:[#allocation4 + $0x138] sm:$0xf0] }
 0x11f   :  { %v3923_v22 = vor.u32 %v4464_v0, %v3920_v11  ;;  %v3999_v60 = vor.u32 %v4485_v39, %v3998_v17  ;;  %v326_v0 = vperm.slane %v4766_v20, 2  ;;  %v3883_v11 = vor.u32 %v4454_v4, %v3880_v43  ;;  %v4488_v48 = vld [vmem:[#allocation4 + $0x124] sm:$0xf]  ;;  %v4016_v50 = vld [vmem:[#allocation4 + $0x128] sm:$0xf0] }
 0x120   :  { %v1874_v47 = vadd.f32 %v1873_v2, %v1860_v10  ;;  %v4059_v2 = vor.u32 %v4498_v63, %v4056_v62  ;;  %v4008_v53 = vld [vmem:[#allocation4 + $0x118] sm:$0xf0] }
 0x121   :  { %2522 = vmatpush.bf16.msra.mxu0 %v3895_v28  ;;  %v4796_v28 = vpack.c.bf16 %v2120_v45, %v2116_v16  ;;  %2549 = vmatpush.bf16.msra.mxu2 %v4031_v8  ;;  %v3872_v16 = vld [vmem:[#allocation4 + $0x8] sm:$0xf0] }
 0x122   :  { %2536 = vmatpush.bf16.msra.mxu1 %v3959_v23  ;;  %vm2105_vm3 = vcmp.ge.f32.partialorder %v1874_v47, 0.0  ;;  %v2113_v19 = vmul.f32 0.01, %v1874_v47  ;;  %v2117_v23 = vsel %vm2101_vm2, %v1872_v1, %v2109_v32  ;;  %v3899_v1 = vor.u32 %v4458_v52, %v3896_v57  ;;  %v3944_v32 = vld [vmem:[#allocation4 + $0x98] sm:$0xf0] }
 0x124   :  { %v2121_v24 = vsel %vm2105_vm3, %v1874_v47, %v2113_v19  ;;  %v4468_v19 = vld [vmem:[#allocation4 + $0x84] sm:$0xf] }
 0x125   :  { %2523 = vmatpush.bf16.msra.mxu0 %v3887_v36  ;;  %v4798_v27 = vpack.c.bf16 %v2121_v24, %v2117_v23  ;;  %v3979_v36 = vor.u32 %v4478_v34, %v3976_v33  ;;  %2550 = vmatpush.bf16.msra.mxu2 %v4023_v35  ;;  %v3875_v24 = vor.u32 %v4452_v15, %v3872_v16 }
 0x126   :  { %2537 = vmatpush.bf16.msra.mxu1 %v3951_v42  ;;  %v4476_v42 = vld [vmem:[#allocation4 + $0xc4] sm:$0xf]  ;;  %v3939_v25 = vor.u32 %v4468_v19, %v3936_v21  ;;  %v4035_v35 = vor.u32 %v4492_v29, %v4032_v31  ;;  %v4086_v19 = vld [vmem:[#allocation4 + $0x1b0] sm:$0xf]  ;;  %v4507_v21 = vld [vmem:[#allocation4 + $0x1b4] sm:$0xf0] }
 0x127   :  { %v3971_v14 = vor.u32 %v4476_v42, %v3968_v46  ;;  %v4505_v29 = vld [vmem:[#allocation4 + $0x1a4] sm:$0xf0] }
 0x129   :  { %2524 = vmatpush.bf16.msra.mxu0 %v3879_v54  ;;  %v4474_v54 = vld [vmem:[#allocation4 + $0xb4] sm:$0xf]  ;;  %2551 = vmatpush.bf16.msra.mxu2 %v4015_v51 }
 0x12a   :  { %2538 = vmatpush.bf16.msra.mxu1 %v3943_v59  ;;  %v3963_v30 = vor.u32 %v4474_v54, %v3960_v55  ;;  %v4456_v59 = vld [vmem:[#allocation4 + $0x24] sm:$0xf]  ;;  %v4011_v55 = vor.u32 %v4486_v41, %v4008_v53  ;;  %v327_v53 = vperm.slane %v4766_v20, 3 }
 0x12b   :  { %v3891_v10 = vor.u32 %v4456_v59, %v3888_v61  ;;  %v4118_v59 = vld [vmem:[#allocation4 + $0x1f0] sm:$0xf]  ;;  %v4515_v61 = vld [vmem:[#allocation4 + $0x1f4] sm:$0xf0] }
 0x12c   :  { %v4119_v18 = vor.u32 %v4515_v61, %v4118_v59  ;;  %v4506_v59 = vld [vmem:[#allocation4 + $0x1b4] sm:$0xf]  ;;  %v4088_v61 = vld [vmem:[#allocation4 + $0x1b8] sm:$0xf0] }
 0x12d   :  { %2525 = vmatpush.bf16.msra.mxu0 %v3871_v5  ;;  %2552 = vmatpush.bf16.msra.mxu2 %v4007_v56  ;;  %v1885_v45 = vpop.f32.mrf.mxu0  ;;  %v4470_v5 = vld [vmem:[#allocation4 + $0x94] sm:$0xf]  ;;  %v4484_v56 = vld [vmem:[#allocation4 + $0x104] sm:$0xf] }
 0x12e   :  { %2539 = vmatpush.bf16.msra.mxu1 %v3935_v6  ;;  %v1899_v47 = vpop.f32.mrf.mxu1  ;;  %v4496_v6 = vld [vmem:[#allocation4 + $0x164] sm:$0xf]  ;;  %v3947_v13 = vor.u32 %v4470_v5, %v3944_v32  ;;  %v1886_v23 = vadd.f32 %v1885_v45, %v326_v0  ;;  %2560 = vmatpush.bf16.msra.mxu3 %v4119_v18  ;;  %v4102_v45 = vld [vmem:[#allocation4 + $0x1d0] sm:$0xf]  ;;  %v4511_v5 = vld [vmem:[#allocation4 + $0x1d4] sm:$0xf0]  ;;  %v4091_v18 = vor.u32 %v4506_v59, %v4088_v61 }
 0x12f   :  { %v4524_v59 = vld [vmem:[%s4871_s5 + $0x40] sm:$0xff] }
 0x130   :  { %2526 = vmatmul.bf16.vlgmr.msra.gmra.mxu0 %v4796_v28  ;;  %v1900_v34 = vadd.f32 %v1899_v47, %v1886_v23  ;;  %v4103_v47 = vor.u32 %v4511_v5, %v4102_v45  ;;  %v4072_v45 = vld [vmem:[#allocation4 + $0x198] sm:$0xf0] }
 0x131   :  { %2574 = vmatpush.bf16.msrb.mxu0 %v3931_v7  ;;  %2540 = vmatmul.bf16.vlgmr.msra.gmra.mxu1 %v4798_v27  ;;  %v4048_v7 = vld [vmem:[#allocation4 + $0x168] sm:$0xf0] }
 0x132   :  { %2588 = vmatpush.bf16.msrb.mxu1 %v3995_v12  ;;  %2553 = vmatpush.bf16.msra.mxu2 %v3999_v60  ;;  %v4051_v12 = vor.u32 %v4496_v6, %v4048_v7 }
 0x135   :  { %2575 = vmatpush.bf16.msrb.mxu0 %v3923_v22  ;;  %v4494_v22 = vld [vmem:[#allocation4 + $0x154] sm:$0xf]  ;;  %v1913_v26 = vpop.f32.mrf.mxu2  ;;  %v1887_v33 = vpop.f32.mrf.mxu0 }
 0x136   :  { %2589 = vmatpush.bf16.msrb.mxu1 %v3987_v49  ;;  %2602 = vmatpush.bf16.msrb.mxu2 %v4059_v2  ;;  %v4043_v8 = vor.u32 %v4494_v22, %v4040_v3  ;;  %v1927_v49 = vpop.f32.mrf.mxu3  ;;  %v1914_v40 = vadd.f32 %v1913_v26, %v1900_v34  ;;  %v1888_v42 = vadd.f32 %v1887_v33, %v326_v0  ;;  %v4513_v2 = vld [vmem:[#allocation4 + $0x1e4] sm:$0xf0]  ;;  %v4070_v34 = vld [vmem:[#allocation4 + $0x190] sm:$0xf]  ;;  %v4503_v33 = vld [vmem:[#allocation4 + $0x194] sm:$0xf0] }
 0x138   :  { %v1928_v52 = vadd.f32 %v1927_v49, %v1914_v40  ;;  %v4078_v49 = vld [vmem:[#allocation4 + $0x1a0] sm:$0xf]  ;;  %v4514_v40 = vld [vmem:[#allocation4 + $0x1f4] sm:$0xf] }
 0x139   :  { %2576 = vmatpush.bf16.msrb.mxu0 %v3915_v38  ;;  %v1901_v38 = vpop.f32.mrf.mxu1  ;;  %v4079_v31 = vor.u32 %v4505_v29, %v4078_v49 }
 0x13a   :  { %2590 = vmatpush.bf16.msrb.mxu1 %v3979_v36  ;;  %2603 = vmatpush.bf16.msrb.mxu2 %v4051_v12  ;;  %v4490_v36 = vld [vmem:[#allocation4 + $0x134] sm:$0xf]  ;;  %v4509_v12 = vld [vmem:[#allocation4 + $0x1c4] sm:$0xf0] }
 0x13b   :  { %v4027_v46 = vor.u32 %v4490_v36, %v4024_v37  ;;  %v4501_v36 = vld [vmem:[#allocation4 + $0x184] sm:$0xf0] }
 0x13d   :  { %2577 = vmatpush.bf16.msrb.mxu0 %v3907_v9  ;;  %v1915_v51 = vpop.f32.mrf.mxu2  ;;  %v4019_v9 = vor.u32 %v4488_v48, %v4016_v50  ;;  %v4512_v48 = vld [vmem:[#allocation4 + $0x1e4] sm:$0xf]  ;;  %v4112_v50 = vld [vmem:[#allocation4 + $0x1e8] sm:$0xf0] }
 0x13e   :  { %2591 = vmatpush.bf16.msrb.mxu1 %v3971_v14  ;;  %2604 = vmatpush.bf16.msrb.mxu2 %v4043_v8  ;;  %v1902_v14 = vadd.f32 %v1901_v38, %v1888_v42  ;;  %v1929_v57 = vpop.f32.mrf.mxu3  ;;  %v4062_v38 = vld [vmem:[#allocation4 + $0x180] sm:$0xf]  ;;  %v4120_v42 = vld [vmem:[#allocation4 + $0x1f8] sm:$0xf0] }
 0x13f   :  { %v4063_v37 = vor.u32 %v4501_v36, %v4062_v38  ;;  %v4523_v36 = vld [vmem:[%s4871_s5 + $0x38] sm:$0xff] }
 0x141   :  { %2578 = vmatpush.bf16.msrb.mxu0 %v3899_v1  ;;  %v1916_v1 = vadd.f32 %v1915_v51, %v1902_v14  ;;  %v4115_v51 = vor.u32 %v4512_v48, %v4112_v50  ;;  %v4104_v14 = vld [vmem:[#allocation4 + $0x1d8] sm:$0xf0]  ;;  %v4518_v50 = vld [vmem:[%s4871_s5 + $0x10] sm:$0xff] }
 0x142   :  { %2592 = vmatpush.bf16.msrb.mxu1 %v3963_v30  ;;  %2605 = vmatpush.bf16.msrb.mxu2 %v4035_v35  ;;  %v4071_v35 = vor.u32 %v4503_v33, %v4070_v34  ;;  %v4531_v48 = vld [vmem:[%s4871_s5 + $0x78] sm:$0xff] }
 0x143   :  { %v1930_v17 = vadd.f32 %v1929_v57, %v1916_v1 }
 0x145   :  { %2579 = vmatpush.bf16.msrb.mxu0 %v3891_v10  ;;  %v4110_v10 = vld [vmem:[#allocation4 + $0x1e0] sm:$0xf] }
 0x146   :  { %2593 = vmatpush.bf16.msrb.mxu1 %v3955_v44  ;;  %2606 = vmatpush.bf16.msrb.mxu2 %v4027_v46  ;;  %v4111_v43 = vor.u32 %v4513_v2, %v4110_v10  ;;  %v4123_v46 = vor.u32 %v4514_v40, %v4120_v42  ;;  %v4521_v40 = vld [vmem:[%s4871_s5 + $0x28] sm:$0xff]  ;;  %v4520_v42 = vld [vmem:[%s4871_s5 + $0x20] sm:$0xff] }
 0x148   :  { %2561 = vmatpush.bf16.msra.mxu3 %v4111_v43  ;;  %v4502_v43 = vld [vmem:[#allocation4 + $0x194] sm:$0xf] }
 0x149   :  { %2580 = vmatpush.bf16.msrb.mxu0 %v3883_v11  ;;  %v4094_v11 = vld [vmem:[#allocation4 + $0x1c0] sm:$0xf]  ;;  %v4075_v5 = vor.u32 %v4502_v43, %v4072_v45 }
 0x14a   :  { %2594 = vmatpush.bf16.msrb.mxu1 %v3947_v13  ;;  %2607 = vmatpush.bf16.msrb.mxu2 %v4019_v9  ;;  %v4095_v16 = vor.u32 %v4509_v12, %v4094_v11  ;;  %v4064_v11 = vld [vmem:[#allocation4 + $0x188] sm:$0xf0] }
 0x14c   :  { %2562 = vmatpush.bf16.msra.mxu3 %v4103_v47 }
 0x14d   :  { %2581 = vmatpush.bf16.msrb.mxu0 %v3875_v24  ;;  %v1941_v54 = vpop.f32.mrf.mxu0  ;;  %v4087_v24 = vor.u32 %v4507_v21, %v4086_v19 }
 0x14e   :  { %2595 = vmatpush.bf16.msrb.mxu1 %v3939_v25  ;;  %v1942_v30 = vadd.f32 %v1941_v54, %v1928_v52  ;;  %2608 = vmatpush.bf16.msrb.mxu2 %v4011_v55  ;;  %v4510_v52 = vld [vmem:[#allocation4 + $0x1d4] sm:$0xf]  ;;  %v4508_v54 = vld [vmem:[#allocation4 + $0x1c4] sm:$0xf] }
 0x14f   :  { %v4107_v41 = vor.u32 %v4510_v52, %v4104_v14  ;;  %v4529_v52 = vld [vmem:[%s4871_s5 + $0x68] sm:$0xff]  ;;  %v4516_v14 = vld [vmem:[%s4871_s5] sm:$0xff] }
 0x150   :  { %2582 = vmatmul.bf16.vlgmr.msrb.gmra.mxu0 %v4796_v28  ;;  %v1955_v28 = vpop.f32.mrf.mxu1  ;;  %2563 = vmatpush.bf16.msra.mxu3 %v4095_v16 }
 0x151   :  { %2596 = vmatmul.bf16.vlgmr.msrb.gmra.mxu1 %v4798_v27  ;;  %v4000_v27 = vld [vmem:[#allocation4 + $0x108] sm:$0xf0]  ;;  %v1956_v39 = vadd.f32 %v1955_v28, %v1942_v30  ;;  %2776 = vmatpush.bf16.msra.mxu0 %v4523_v36 }
 0x152   :  { %v4003_v58 = vor.u32 %v4484_v56, %v4000_v27  ;;  %v4096_v28 = vld [vmem:[#allocation4 + $0x1c8] sm:$0xf0]  ;;  %2790 = vmatpush.bf16.msra.mxu1 %v4531_v48 }
 0x153   :  { %v4099_v56 = vor.u32 %v4508_v54, %v4096_v28  ;;  %v4526_v54 = vld [vmem:[%s4871_s5 + $0x50] sm:$0xff] }
 0x154   :  { %2609 = vmatpush.bf16.msrb.mxu2 %v4003_v58  ;;  %2564 = vmatpush.bf16.msra.mxu3 %v4087_v24 }
 0x155   :  { %v1969_v60 = vpop.f32.mrf.mxu2  ;;  %v1943_v63 = vpop.f32.mrf.mxu0 }
 0x156   :  { %v1983_v62 = vpop.f32.mrf.mxu3  ;;  %v1970_v44 = vadd.f32 %v1969_v60, %v1956_v39  ;;  %v1944_v4 = vadd.f32 %v1943_v63, %v1930_v17  ;;  %v4504_v60 = vld [vmem:[#allocation4 + $0x1a4] sm:$0xf]  ;;  %v4080_v63 = vld [vmem:[#allocation4 + $0x1a8] sm:$0xf0] }
 0x158   :  { %v1957_v32 = vpop.f32.mrf.mxu1  ;;  %v1984_v6 = vadd.f32 %v1983_v62, %v1970_v44  ;;  %2565 = vmatpush.bf16.msra.mxu3 %v4079_v31  ;;  %v4083_v62 = vor.u32 %v4504_v60, %v4080_v63 }
 0x159   :  { %v1958_v7 = vadd.f32 %v1957_v32, %v1944_v4 }
 0x15a   :  { %v2110_v22 = vmul.f32 0.01, %v1984_v6  ;;  %vm2102_vm4 = vcmp.ge.f32.partialorder %v1984_v6, 0.0 }
 0x15c   :  { %v2118_v8 = vsel %vm2102_vm4, %v1984_v6, %v2110_v22  ;;  %2566 = vmatpush.bf16.msra.mxu3 %v4071_v35 }
 0x15d   :  { %v1971_v0 = vpop.f32.mrf.mxu2 }
 0x15e   :  { %v1972_v13 = vadd.f32 %v1971_v0, %v1958_v7  ;;  %v1985_v15 = vpop.f32.mrf.mxu3  ;;  %v4500_v0 = vld [vmem:[#allocation4 + $0x184] sm:$0xf] }
 0x15f   :  { %v4067_v12 = vor.u32 %v4500_v0, %v4064_v11 }
 0x160   :  { %v1986_v3 = vadd.f32 %v1985_v15, %v1972_v13  ;;  %2567 = vmatpush.bf16.msra.mxu3 %v4063_v37  ;;  %v4522_v37 = vld [vmem:[%s4871_s5 + $0x30] sm:$0xff] }
 0x161   :  { %2777 = vmatpush.bf16.msra.mxu0 %v4522_v37 }
 0x162   :  { %vm2106_vm5 = vcmp.ge.f32.partialorder %v1986_v3, 0.0  ;;  %v2114_v23 = vmul.f32 0.01, %v1986_v3 }
 0x164   :  { %v2122_v25 = vsel %vm2106_vm5, %v1986_v3, %v2114_v23  ;;  %2616 = vmatpush.bf16.msrb.mxu3 %v4123_v46  ;;  %v4519_v46 = vld [vmem:[%s4871_s5 + $0x18] sm:$0xff] }
 0x165   :  { %v2126_v26 = vpack.c.bf16 %v2122_v25, %v2118_v8  ;;  %2778 = vmatpush.bf16.msra.mxu0 %v4521_v40 }
 0x167   :  { %2554 = vmatmul.bf16.vlgmr.msra.gmra.mxu2 %v2126_v26 }
 0x168   :  { %2617 = vmatpush.bf16.msrb.mxu3 %v4115_v51  ;;  %v4530_v51 = vld [vmem:[%s4871_s5 + $0x70] sm:$0xff] }
 0x169   :  { %2779 = vmatpush.bf16.msra.mxu0 %v4520_v42  ;;  %2791 = vmatpush.bf16.msra.mxu1 %v4530_v51 }
 0x16c   :  { %2618 = vmatpush.bf16.msrb.mxu3 %v4107_v41  ;;  %v4527_v41 = vld [vmem:[%s4871_s5 + $0x58] sm:$0xff] }
 0x16d   :  { %v1997_v9 = vpop.f32.mrf.mxu0  ;;  %2780 = vmatpush.bf16.msra.mxu0 %v4519_v46  ;;  %2792 = vmatpush.bf16.msra.mxu1 %v4529_v52 }
 0x16e   :  { %v2011_v57 = vpop.f32.mrf.mxu1  ;;  %v1998_v1 = vadd.f32 %v1997_v9, %v327_v53  ;;  %v4517_v9 = vld [vmem:[%s4871_s5 + $0x8] sm:$0xff] }
 0x170   :  { %2619 = vmatpush.bf16.msrb.mxu3 %v4099_v56  ;;  %v2012_v58 = vadd.f32 %v2011_v57, %v1998_v1  ;;  %v4528_v57 = vld [vmem:[%s4871_s5 + $0x60] sm:$0xff]  ;;  %v4525_v1 = vld [vmem:[%s4871_s5 + $0x48] sm:$0xff] }
 0x171   :  { %2781 = vmatpush.bf16.msra.mxu0 %v4518_v50  ;;  %2793 = vmatpush.bf16.msra.mxu1 %v4528_v57 }
 0x174   :  { %2620 = vmatpush.bf16.msrb.mxu3 %v4091_v18 }
 0x175   :  { %v2025_v55 = vpop.f32.mrf.mxu2  ;;  %v1999_v27 = vpop.f32.mrf.mxu0  ;;  %2782 = vmatpush.bf16.msra.mxu0 %v4517_v9  ;;  %2794 = vmatpush.bf16.msra.mxu1 %v4527_v41 }
 0x176   :  { %v2039_v30 = vpop.f32.mrf.mxu3  ;;  %v2013_v17 = vpop.f32.mrf.mxu1  ;;  %v2000_v39 = vadd.f32 %v1999_v27, %v327_v53  ;;  %v2026_v20 = vadd.f32 %v2025_v55, %v2012_v58  ;;  %v2192_v55 = vld [vmem:[%s4870_s4] sm:$0x3] }
 0x177   :  { %2610 = vmatmul.bf16.vlgmr.msrb.gmra.mxu2 %v2126_v26 }
 0x178   :  { %2621 = vmatpush.bf16.msrb.mxu3 %v4083_v62  ;;  %v2014_v2 = vadd.f32 %v2013_v17, %v2000_v39  ;;  %v2040_v32 = vadd.f32 %v2039_v30, %v2026_v20  ;;  %v2194_v30 = vperm.slane %v2192_v55, 0 }
 0x179   :  { %2783 = vmatpush.bf16.msra.mxu0 %v4516_v14  ;;  %2795 = vmatpush.bf16.msra.mxu1 %v4526_v54 }
 0x17c   :  { %2622 = vmatpush.bf16.msrb.mxu3 %v4075_v5 }
 0x17d   :  { %v2027_v10 = vpop.f32.mrf.mxu2  ;;  %2796 = vmatpush.bf16.msra.mxu1 %v4525_v1 }
 0x17e   :  { %v2041_v44 = vpop.f32.mrf.mxu3  ;;  %v2028_v6 = vadd.f32 %v2027_v10, %v2014_v2 }
 0x180   :  { %2623 = vmatpush.bf16.msrb.mxu3 %v4067_v12  ;;  %v2042_v15 = vadd.f32 %v2041_v44, %v2028_v6 }
 0x181   :  { %2797 = vmatpush.bf16.msra.mxu1 %v4524_v59 }
 0x18d   :  { %v2053_v4 = vpop.f32.mrf.mxu0 }
 0x18e   :  { %v2067_v47 = vpop.f32.mrf.mxu1  ;;  %v2054_v7 = vadd.f32 %v2053_v4, %v2040_v32  ;;  %v2195_v4 = vperm.slane %v2192_v55, 1 }
 0x190   :  { %v2068_v16 = vadd.f32 %v2067_v47, %v2054_v7 }
 0x195   :  { %v2081_v13 = vpop.f32.mrf.mxu2  ;;  %v2055_v21 = vpop.f32.mrf.mxu0 }
 0x196   :  { %v2095_v19 = vpop.f32.mrf.mxu3  ;;  %v2082_v22 = vadd.f32 %v2081_v13, %v2068_v16  ;;  %v2056_v3 = vadd.f32 %v2055_v21, %v2042_v15  ;;  %v2069_v23 = vpop.f32.mrf.mxu1 }
 0x198   :  { %v2096_v24 = vadd.f32 %v2095_v19, %v2082_v22  ;;  %v2070_v8 = vadd.f32 %v2069_v23, %v2056_v3 }
 0x19a   :  { %v2111_v29 = vmul.f32 0.01, %v2096_v24  ;;  %vm2103_vm6 = vcmp.ge.f32.partialorder %v2096_v24, 0.0 }
 0x19c   :  { %v2119_v33 = vsel %vm2103_vm6, %v2096_v24, %v2111_v29 }
 0x19d   :  { %v2083_v25 = vpop.f32.mrf.mxu2 }
 0x19e   :  { %v2084_v26 = vadd.f32 %v2083_v25, %v2070_v8  ;;  %v2097_v49 = vpop.f32.mrf.mxu3 }
 0x1a0   :  { %v2098_v31 = vadd.f32 %v2097_v49, %v2084_v26 }
 0x1a2   :  { %vm2107_vm7 = vcmp.ge.f32.partialorder %v2098_v31, 0.0  ;;  %v2115_v34 = vmul.f32 0.01, %v2098_v31 }
 0x1a4   :  { %v2123_v35 = vsel %vm2107_vm7, %v2098_v31, %v2115_v34 }
 0x1a5   :  { %v2127_v38 = vpack.c.bf16 %v2123_v35, %v2119_v33  ;;  %v4538_v35 = vld [vmem:[%s4872_s6] ss:$0 sm:$0xff] }
 0x1a7   :  { %2568 = vmatmul.bf16.vlgmr.msra.gmra.mxu3 %v2127_v38 }
 0x1ad   :  { %v2527_v53 = vpop.f32.mrf.mxu0 }
 0x1ae   :  { %v2541_v56 = vpop.f32.mrf.mxu1  ;;  %v2528_v61 = vadd.f32 %v2527_v53, %v2194_v30 }
 0x1b0   :  { %v2542_v17 = vadd.f32 %v2541_v56, %v2528_v61 }
 0x1b5   :  { %v2529_v27 = vpop.f32.mrf.mxu0 }
 0x1b6   :  { %v2543_v39 = vpop.f32.mrf.mxu1  ;;  %v2530_v60 = vadd.f32 %v2529_v27, %v2194_v30 }
 0x1b7   :  { %2624 = vmatmul.bf16.vlgmr.msrb.gmra.mxu3 %v2127_v38 }
 0x1b8   :  { %v2544_v20 = vadd.f32 %v2543_v39, %v2530_v60 }
 0x1cd   :  { %v2583_v62 = vpop.f32.mrf.mxu0 }
 0x1ce   :  { %v2597_v5 = vpop.f32.mrf.mxu1  ;;  %v2584_v6 = vadd.f32 %v2583_v62, %v2195_v4 }
 0x1d0   :  { %v2598_v15 = vadd.f32 %v2597_v5, %v2584_v6 }
 0x1d5   :  { %v2585_v11 = vpop.f32.mrf.mxu0 }
 0x1d6   :  { %v2586_v16 = vadd.f32 %v2585_v11, %v2195_v4  ;;  %v2599_v21 = vpop.f32.mrf.mxu1 }
 0x1d8   :  { %v2600_v3 = vadd.f32 %v2599_v21, %v2586_v16 }
 0x1ea   :  { %v2555_v28 = vpop.f32.mrf.mxu2 }
 0x1eb   :  { %v2556_v63 = vadd.f32 %v2555_v28, %v2542_v17 }
 0x1f2   :  { %v2557_v18 = vpop.f32.mrf.mxu2 }
 0x1f3   :  { %v2558_v2 = vadd.f32 %v2557_v18, %v2544_v20 }
 0x1fa   :  { %v2611_v32 = vpop.f32.mrf.mxu2 }
 0x1fb   :  { %v2612_v19 = vadd.f32 %v2611_v32, %v2598_v15 }
 0x202   :  { %v2613_v22 = vpop.f32.mrf.mxu2 }
 0x203   :  { %v2614_v24 = vadd.f32 %v2613_v22, %v2600_v3 }
 0x22a   :  { %v2569_v58 = vpop.f32.mrf.mxu3 }
 0x22b   :  { %v2570_v10 = vadd.f32 %v2569_v58, %v2556_v63 }
 0x22d   :  { %v2634_v43 = vmul.f32 0.01, %v2570_v10  ;;  %vm2630_vm8 = vcmp.ge.f32.partialorder %v2570_v10, 0.0 }
 0x22f   :  { %v2638_v7 = vsel %vm2630_vm8, %v2570_v10, %v2634_v43 }
 0x232   :  { %v2571_v44 = vpop.f32.mrf.mxu3 }
 0x233   :  { %v2572_v45 = vadd.f32 %v2571_v44, %v2558_v2 }
 0x235   :  { %vm2632_vm9 = vcmp.ge.f32.partialorder %v2572_v45, 0.0  ;;  %v2636_v47 = vmul.f32 0.01, %v2572_v45 }
 0x237   :  { %v2640_v0 = vsel %vm2632_vm9, %v2572_v45, %v2636_v47 }
 0x238   :  { %v2642_v12 = vpack.c.bf16 %v2640_v0, %v2638_v7 }
 0x23a   :  { %v2625_v13 = vpop.f32.mrf.mxu3  ;;  %2784 = vmatmul.bf16.vlgmr.msra.gmra.mxu0 %v2642_v12 }
 0x23b   :  { %v2626_v23 = vadd.f32 %v2625_v13, %v2612_v19 }
 0x23d   :  { %v2635_v25 = vmul.f32 0.01, %v2626_v23  ;;  %vm2631_vm10 = vcmp.ge.f32.partialorder %v2626_v23, 0.0 }
 0x23f   :  { %v2639_v29 = vsel %vm2631_vm10, %v2626_v23, %v2635_v25 }
 0x242   :  { %v2627_v8 = vpop.f32.mrf.mxu3 }
 0x243   :  { %v2628_v26 = vadd.f32 %v2627_v8, %v2614_v24 }
 0x245   :  { %vm2633_vm11 = vcmp.ge.f32.partialorder %v2628_v26, 0.0  ;;  %v2637_v49 = vmul.f32 0.01, %v2628_v26 }
 0x247   :  { %v2641_v31 = vsel %vm2633_vm11, %v2628_v26, %v2637_v49 }
 0x248   :  { %v2643_v34 = vpack.c.bf16 %v2641_v31, %v2639_v29 }
 0x24a   :  { %2798 = vmatmul.bf16.vlgmr.msra.gmra.mxu1 %v2643_v34 }
 0x2b7   :  { %v2785_v33 = vpop.f32.mrf.mxu0 }
 0x2b8   :  { %v2786_v38 = vadd.f32 %v4538_v35, %v2785_v33 }
 0x2bf   :  { %v2787_v40 = vpop.f32.mrf.mxu0 }
 0x2c0   :  { %v2788_v42 = vadd.f32 %v4538_v35, %v2787_v40 }
 0x2c7   :  { %v2799_v36 = vpop.f32.mrf.mxu1 }
 0x2c8   :  { %v2800_v37 = vadd.f32 %v2799_v36, %v2786_v38 }
 0x2ca   :  { %2804 = vst [vmem:[%s4873_s7] sm:$0xff] %v2800_v37 }
 0x2cf   :  { %v2801_v46 = vpop.f32.mrf.mxu1 }
 0x2d0   :  { %v2802_v48 = vadd.f32 %v2801_v46, %v2788_v42 }
 0x2d2   :  { %2805 = vst [vmem:[%s4873_s7 + $0x8] sm:$0xff] %v2802_v48 }
 0x2d3   :  { %2810 = vsyncpa [#allocation3], 1 }
 0x2d4   :  { %2811 = vsyncpa [#allocation5], 1 }

</bundles_post_ra>
